<compile_context>
chip_gen: v7x
topology: tpu7x:2x2x1
jax: 0.10.0
libtpu: 0.0.40
codegen_flags: <defaults>
</compile_context>

<pallas_src>
import functools

import jax
import jax.numpy as jnp
from jax import lax
from jax.experimental import pallas as pl
from jax.experimental.pallas import tpu as pltpu


def _attention_kernel(x_ref, wq_ref, wk_ref, wv_ref, wproj_ref, bproj_ref,
                      o_ref, k_scr, v_scr, ctx_scr, *, num_heads, q_block):
    """One (batch, query-tile) grid step.

    x_ref        : (1, N, C)   full sequence for this batch element (DMA'd once per b)
    w*_ref       : weights in MXU operand dtype (softmax scale pre-folded into wq)
    o_ref        : (1, q_block, C) output tile
    k_scr, v_scr : (N, C)      persistent K/V projections (written at qi == 0)
    ctx_scr      : (q_block, C) per-head context assembly buffer
    """
    qi = pl.program_id(1)
    N, C = x_ref.shape[1], x_ref.shape[2]
    H = num_heads
    hd = C // H
    mxu_dtype = wq_ref.dtype

    # --- K/V projections: once per batch element, persisted in VMEM scratch. ---
    @pl.when(qi == 0)
    def _():
        xc = x_ref[0].astype(mxu_dtype)
        k_scr[...] = jnp.dot(xc, wk_ref[...],
                             preferred_element_type=jnp.float32).astype(mxu_dtype)
        v_scr[...] = jnp.dot(xc, wv_ref[...],
                             preferred_element_type=jnp.float32).astype(mxu_dtype)

    # --- Q projection for this query tile (scale already folded into wq). ---
    if q_block == N:
        xq = x_ref[0].astype(mxu_dtype)
    else:
        q_start = pl.multiple_of(qi * q_block, q_block)
        xq = x_ref[0, pl.ds(q_start, q_block), :].astype(mxu_dtype)
    q = jnp.dot(xq, wq_ref[...], preferred_element_type=jnp.float32).astype(mxu_dtype)

    # --- Per-head attention; softmax math in f32; normalization deferred. ---
    for h in range(H):                      # static unroll; H known at trace time
        lo, hi = h * hd, (h + 1) * hd
        q_h = q[:, lo:hi]                   # (Tq, hd)
        k_h = k_scr[:, lo:hi]               # (N, hd)
        v_h = v_scr[:, lo:hi]               # (N, hd)

        # scores = q_h @ k_h^T (contract over hd; no explicit transpose emitted).
        s = lax.dot_general(q_h, k_h, (((1,), (1,)), ((), ())),
                            preferred_element_type=jnp.float32)      # (Tq, N) f32
        m = jnp.max(s, axis=-1, keepdims=True)
        e = jnp.exp(s - m)                                           # f32, in [0, 1]
        denom = jnp.sum(e, axis=-1, keepdims=True)

        # Unnormalized context, then scale only the (Tq, hd) result (EUP reciprocal).
        ctx_h = jnp.dot(e.astype(mxu_dtype), v_h,
                        preferred_element_type=jnp.float32)          # (Tq, hd) f32
        ctx_h = ctx_h * pl.reciprocal(denom, approx=True)
        ctx_scr[:, lo:hi] = ctx_h.astype(mxu_dtype)                  # bounds live range

    # TODO(synk): attn_drop / proj_drop are identity (p=0.0 / eval mode); omitted.

    # --- Output projection: single full-depth (Tq, C) @ (C, C) MXU dot. ---
    out = jnp.dot(ctx_scr[...], wproj_ref[...], preferred_element_type=jnp.float32)
    out = out + bproj_ref[...]                                       # (1, C) broadcast
    o_ref[0] = out.astype(o_ref.dtype)


def _vmem_bytes_estimate(N, C, q_block, itm_x, mxu_itm):
    """Rough per-grid-step VMEM working-set estimate (blocks + scratch + live temps)."""
    bytes_x = 2 * N * C * itm_x                       # x block (double-buffered over b)
    bytes_w = 4 * C * C * mxu_itm + C * 4             # weights (single-buffered) + bias
    bytes_out = 2 * q_block * C * itm_x               # output tile (double-buffered)
    bytes_scr = (2 * N * C + q_block * C) * mxu_itm   # k / v / ctx scratch
    bytes_live = (q_block * C * (4 + mxu_itm)         # q (f32 + MXU-dtype copy)
                  + 2 * q_block * N * 4               # score / exp tiles (f32)
                  + q_block * C * 4)                  # f32 result before store
    return bytes_x + bytes_w + bytes_out + bytes_scr + bytes_live


def _vmem_budget_bytes():
    """Per-generation VMEM budget: ~3/4 of physical per-core VMEM (v7x has half of v6e)."""
    try:
        return int(pltpu.get_tpu_info().vmem_capacity_bytes) * 3 // 4
    except Exception:
        return 48 * 1024 * 1024   # conservative fallback: 3/4 of v7x's 64 MiB


def attention(x, w_qkv, w_proj, b_proj, *, num_heads, q_block=None, use_bf16_mxu=True):
    """ViT-style multi-head attention forward (qkv_bias=False, dropout in eval mode).

    x: (B, N, C); w_qkv: (C, 3C); w_proj: (C, C); b_proj: (C,) or (1, C).
    """
    B, N, C = x.shape
    assert C % num_heads == 0, "dim must be divisible by num_heads"
    head_dim = C // num_heads
    scale = head_dim ** (-0.5)

    itm_x = x.dtype.itemsize
    mxu_dtype = jnp.bfloat16 if (use_bf16_mxu or x.dtype == jnp.bfloat16) else jnp.float32
    mxu_itm = jnp.dtype(mxu_dtype).itemsize

    budget = _vmem_budget_bytes()
    if q_block is None:
        # Largest tile of N (multiple of 8, dividing N) whose working set fits the budget.
        q_block = N
        while _vmem_bytes_estimate(N, C, q_block, itm_x, mxu_itm) > budget:
            nxt = q_block // 2
            if q_block % 2 != 0 or nxt % 8 != 0 or N % nxt != 0:
                break
            q_block = nxt
    assert N % q_block == 0, "q_block must divide N"
    assert q_block == N or q_block % 8 == 0, "q_block must be a multiple of 8 (or == N)"
    n_q = N // q_block

    est = _vmem_bytes_estimate(N, C, q_block, itm_x, mxu_itm)
    vmem_limit = int(min(budget, max(32 * 1024 * 1024, est * 3 // 2 + 4 * 1024 * 1024)))

    # Host-side weight prep: split the fused qkv weight, fold the softmax scale into wq,
    # and store weights in the MXU operand dtype (accumulation stays f32 in-kernel).
    w_q = (w_qkv[:, 0 * C:1 * C] * scale).astype(mxu_dtype)
    w_k = w_qkv[:, 1 * C:2 * C].astype(mxu_dtype)
    w_v = w_qkv[:, 2 * C:3 * C].astype(mxu_dtype)
    w_o = w_proj.astype(mxu_dtype)
    b2d = jnp.reshape(b_proj, (1, C)).astype(jnp.float32)

    kernel = functools.partial(_attention_kernel, num_heads=num_heads, q_block=q_block)

    flops = B * (4 * N * C * C          # k, v projections (once per batch element)
                 + 2 * N * C * C        # q projection (all query tiles)
                 + 4 * N * N * C        # q@k^T and p@v summed over heads
                 + 2 * N * C * C)       # output projection
    cost = pl.CostEstimate(
        flops=int(flops),
        transcendentals=int(B * num_heads * N * N),
        bytes_accessed=int(2 * B * N * C * itm_x + 4 * C * C * mxu_itm + 4 * C))

    def build(single_buffer_weights):
        if single_buffer_weights:
            def w_spec(shp):
                return pl.BlockSpec(shp, lambda b, qi: (0,) * len(shp),
                                    pipeline_mode=pl.Buffered(1))
        else:
            def w_spec(shp):
                return pl.BlockSpec(shp, lambda b, qi: (0,) * len(shp))
        return pl.pallas_call(
            kernel,
            out_shape=jax.ShapeDtypeStruct((B, N, C), x.dtype),
            grid_spec=pltpu.PrefetchScalarGridSpec(
                num_scalar_prefetch=0,
                grid=(B, n_q),
                in_specs=[
                    # x passed exactly once; block index depends only on b, so the DMA
                    # is elided while qi varies (no duplicated x traffic).
                    pl.BlockSpec((1, N, C), lambda b, qi: (b, 0, 0)),
                    w_spec((C, C)),      # w_q (scale folded in)
                    w_spec((C, C)),      # w_k
                    w_spec((C, C)),      # w_v
                    w_spec((C, C)),      # w_proj
                    w_spec((1, C)),      # b_proj
                ],
                out_specs=pl.BlockSpec((1, q_block, C), lambda b, qi: (b, qi, 0)),
                scratch_shapes=[
                    pltpu.VMEM((N, C), mxu_dtype),        # K projection (per batch elem)
                    pltpu.VMEM((N, C), mxu_dtype),        # V projection
                    pltpu.VMEM((q_block, C), mxu_dtype),  # per-head context assembly
                ],
            ),
            compiler_params=pltpu.CompilerParams(
                # b is independent (feeds both v7x TensorCores); qi carries the K/V
                # scratch dependency so it must remain "arbitrary".
                dimension_semantics=("parallel", "arbitrary"),
                vmem_limit_bytes=vmem_limit,
            ),
            cost_estimate=cost,
        )

    args = (x, w_q, w_k, w_v, w_o, b2d)
    try:
        return build(single_buffer_weights=True)(*args)
    except Exception:
        # Fallback in case this lowering path rejects Buffered(1) single-buffering.
        return build(single_buffer_weights=False)(*args)


def attention_ref(x, w_qkv, w_proj, b_proj, *, num_heads):
    """Pure-JAX reference mirroring the PyTorch forward pass."""
    B, N, C = x.shape
    hd = C // num_heads
    scale = hd ** (-0.5)
    qkv = x @ w_qkv                                           # (B, N, 3C)
    qkv = qkv.reshape(B, N, 3, num_heads, hd).transpose(2, 0, 3, 1, 4)
    q, k, v = qkv[0], qkv[1], qkv[2]                          # (B, H, N, hd)
    attn = (q @ k.transpose(0, 1, 3, 2)) * scale              # (B, H, N, N)
    attn = jax.nn.softmax(attn, axis=-1)
    out = (attn @ v).transpose(0, 2, 1, 3).reshape(B, N, C)
    return out @ w_proj + b_proj


if __name__ == "__main__":
    # Small shapes consistent with the module: B=2, seq N=16, dim C=32, heads=8.
    B, N, C, H = 2, 16, 32, 8

    key = jax.random.PRNGKey(0)
    kx, kq, kp, kb = jax.random.split(key, 4)

    x = jax.random.normal(kx, (B, N, C), dtype=jnp.float32)
    # Deterministic synthetic parameters (not loaded from a checkpoint).
    w_qkv = jax.random.normal(kq, (C, 3 * C), dtype=jnp.float32) * (1.0 / C ** 0.5)
    w_proj = jax.random.normal(kp, (C, C), dtype=jnp.float32) * (1.0 / C ** 0.5)
    b_proj = jax.random.normal(kb, (C,), dtype=jnp.float32) * 0.01

    ref = attention_ref(x, w_qkv, w_proj, b_proj, num_heads=H)

    # Default path: bf16 MXU operands, f32 accumulation/softmax, single query tile.
    out = jax.block_until_ready(attention(x, w_qkv, w_proj, b_proj, num_heads=H))
    assert out.shape == (B, N, C)
    assert jnp.allclose(out, ref, atol=5e-2, rtol=5e-2), "mismatch (bf16 MXU path)"

    # f32 MXU operands: tighter check (only the approx-reciprocal error remains).
    out_f32 = jax.block_until_ready(
        attention(x, w_qkv, w_proj, b_proj, num_heads=H, use_bf16_mxu=False))
    assert jnp.allclose(out_f32, ref, atol=1e-2, rtol=1e-2), "mismatch (f32 MXU path)"

    # Tiled query path (q_block < N) exercising the persistent K/V VMEM scratch.
    out_tiled = jax.block_until_ready(
        attention(x, w_qkv, w_proj, b_proj, num_heads=H, q_block=8))
    assert jnp.allclose(out_tiled, ref, atol=5e-2, rtol=5e-2), "mismatch (tiled path)"

    print("KERNEL_OK")
</pallas_src>

<mosaic_0001>
module attributes {stable_mosaic.version = 11 : i64} {
  func.func @_attention_kernel(%arg0: i32, %arg1: i32, %arg2: memref<1x16x32xf32, #tpu.memory_space<vmem>>, %arg3: memref<32x32xbf16, #tpu.memory_space<vmem>>, %arg4: memref<32x32xbf16, #tpu.memory_space<vmem>>, %arg5: memref<32x32xbf16, #tpu.memory_space<vmem>>, %arg6: memref<32x32xbf16, #tpu.memory_space<vmem>>, %arg7: memref<1x32xf32, #tpu.memory_space<vmem>>, %arg8: memref<1x16x32xf32, #tpu.memory_space<vmem>>, %arg9: memref<16x32xbf16, #tpu.memory_space<vmem>>, %arg10: memref<16x32xbf16, #tpu.memory_space<vmem>>, %arg11: memref<16x32xbf16, #tpu.memory_space<vmem>>) attributes {dimension_semantics = [#tpu.dimension_semantics<parallel>, #tpu.dimension_semantics<arbitrary>], iteration_bounds = array<i64: 2, 1>, scalar_prefetch = 0 : i64, scratch_operands = 3 : i64, tpu.core_type = #tpu.core_type<tc>, window_params = [{transform_indices = @transform_0, window_bounds = array<i64: 1, 16, 32>}, {pipeline_mode = #tpu.pipeline_mode<synchronous>, transform_indices = @transform_1, window_bounds = array<i64: 32, 32>}, {pipeline_mode = #tpu.pipeline_mode<synchronous>, transform_indices = @transform_2, window_bounds = array<i64: 32, 32>}, {pipeline_mode = #tpu.pipeline_mode<synchronous>, transform_indices = @transform_3, window_bounds = array<i64: 32, 32>}, {pipeline_mode = #tpu.pipeline_mode<synchronous>, transform_indices = @transform_4, window_bounds = array<i64: 32, 32>}, {pipeline_mode = #tpu.pipeline_mode<synchronous>, transform_indices = @transform_5, window_bounds = array<i64: 1, 32>}, {transform_indices = @transform_6, window_bounds = array<i64: 1, 16, 32>}]} {
    %c0_i32 = arith.constant 0 : i32
    %0 = arith.cmpi eq, %arg1, %c0_i32 : i32
    %1 = arith.extui %0 : i1 to i32
    %c0_i32_0 = arith.constant 0 : i32
    %2 = arith.cmpi ne, %1, %c0_i32_0 : i32
    scf.if %2 {
      %c0_88 = arith.constant 0 : index
      %c0_89 = arith.constant 0 : index
      %c0_90 = arith.constant 0 : index
      %162 = vector.load %arg2[%c0_88, %c0_89, %c0_90] : memref<1x16x32xf32, #tpu.memory_space<vmem>>, vector<1x16x32xf32>
      %163 = vector.shape_cast %162 : vector<1x16x32xf32> to vector<16x32xf32>
      %164 = arith.truncf %163 : vector<16x32xf32> to vector<16x32xbf16>
      %c0_91 = arith.constant 0 : index
      %c0_92 = arith.constant 0 : index
      %165 = vector.load %arg4[%c0_91, %c0_92] : memref<32x32xbf16, #tpu.memory_space<vmem>>, vector<32x32xbf16>
      %cst_93 = arith.constant dense<0.000000e+00> : vector<16x32xf32>
      %166 = tpu.matmul %164, %165, %cst_93 {dimension_numbers = #tpu.dot_dimension_numbers<[1], [0], [0], [1], [0, 0, 1, 1], [], []>} : vector<16x32xbf16>, vector<32x32xbf16>, vector<16x32xf32> -> vector<16x32xf32>
      %167 = arith.truncf %166 : vector<16x32xf32> to vector<16x32xbf16>
      %c0_94 = arith.constant 0 : index
      %c0_95 = arith.constant 0 : index
      %168 = vector.load %arg9[%c0_94, %c0_95] : memref<16x32xbf16, #tpu.memory_space<vmem>>, vector<16x32xbf16>
      tpu.vector_store %arg9[%c0_94, %c0_95], %167 {strides = array<i32>} : memref<16x32xbf16, #tpu.memory_space<vmem>>, vector<16x32xbf16>,
      %c0_96 = arith.constant 0 : index
      %c0_97 = arith.constant 0 : index
      %169 = vector.load %arg5[%c0_96, %c0_97] : memref<32x32xbf16, #tpu.memory_space<vmem>>, vector<32x32xbf16>
      %cst_98 = arith.constant dense<0.000000e+00> : vector<16x32xf32>
      %170 = tpu.matmul %164, %169, %cst_98 {dimension_numbers = #tpu.dot_dimension_numbers<[1], [0], [0], [1], [0, 0, 1, 1], [], []>} : vector<16x32xbf16>, vector<32x32xbf16>, vector<16x32xf32> -> vector<16x32xf32>
      %171 = arith.truncf %170 : vector<16x32xf32> to vector<16x32xbf16>
      %c0_99 = arith.constant 0 : index
      %c0_100 = arith.constant 0 : index
      %172 = vector.load %arg10[%c0_99, %c0_100] : memref<16x32xbf16, #tpu.memory_space<vmem>>, vector<16x32xbf16>
      tpu.vector_store %arg10[%c0_99, %c0_100], %171 {strides = array<i32>} : memref<16x32xbf16, #tpu.memory_space<vmem>>, vector<16x32xbf16>,
    } else {
    }
    %c0 = arith.constant 0 : index
    %c0_1 = arith.constant 0 : index
    %c0_2 = arith.constant 0 : index
    %3 = vector.load %arg2[%c0, %c0_1, %c0_2] : memref<1x16x32xf32, #tpu.memory_space<vmem>>, vector<1x16x32xf32>
    %4 = vector.shape_cast %3 : vector<1x16x32xf32> to vector<16x32xf32>
    %5 = arith.truncf %4 : vector<16x32xf32> to vector<16x32xbf16>
    %c0_3 = arith.constant 0 : index
    %c0_4 = arith.constant 0 : index
    %6 = vector.load %arg3[%c0_3, %c0_4] : memref<32x32xbf16, #tpu.memory_space<vmem>>, vector<32x32xbf16>
    %cst = arith.constant dense<0.000000e+00> : vector<16x32xf32>
    %7 = tpu.matmul %5, %6, %cst {dimension_numbers = #tpu.dot_dimension_numbers<[1], [0], [0], [1], [0, 0, 1, 1], [], []>} : vector<16x32xbf16>, vector<32x32xbf16>, vector<16x32xf32> -> vector<16x32xf32>
    %8 = arith.truncf %7 : vector<16x32xf32> to vector<16x32xbf16>
    %9 = vector.extract_strided_slice %8 {offsets = [0, 0], sizes = [16, 4], strides = [1, 1]} : vector<16x32xbf16> to vector<16x4xbf16>
    %c0_5 = arith.constant 0 : index
    %c0_6 = arith.constant 0 : index
    %10 = vector.load %arg9[%c0_5, %c0_6] : memref<16x32xbf16, #tpu.memory_space<vmem>>, vector<16x4xbf16>
    %c0_7 = arith.constant 0 : index
    %c0_8 = arith.constant 0 : index
    %11 = vector.load %arg10[%c0_7, %c0_8] : memref<16x32xbf16, #tpu.memory_space<vmem>>, vector<16x4xbf16>
    %cst_9 = arith.constant dense<0.000000e+00> : vector<16x16xf32>
    %12 = tpu.matmul %9, %10, %cst_9 {dimension_numbers = #tpu.dot_dimension_numbers<[1], [1], [0], [0], [0, 0, 1, 0], [], []>} : vector<16x4xbf16>, vector<16x4xbf16>, vector<16x16xf32> -> vector<16x16xf32>
    %cst_10 = arith.constant dense<0xFF800000> : vector<16xf32>
    %13 = vector.multi_reduction <maximumf>, %12, %cst_10 [1] : vector<16x16xf32> to vector<16xf32>
    %14 = vector.shape_cast %13 : vector<16xf32> to vector<16x1xf32>
    %15 = vector.broadcast %14 : vector<16x1xf32> to vector<16x16xf32>
    %16 = arith.subf %12, %15 : vector<16x16xf32>
    %17 = math.exp %16 : vector<16x16xf32>
    %cst_11 = arith.constant dense<0.000000e+00> : vector<16xf32>
    %18 = vector.multi_reduction <add>, %17, %cst_11 [1] : vector<16x16xf32> to vector<16xf32>
    %19 = vector.shape_cast %18 : vector<16xf32> to vector<16x1xf32>
    %20 = arith.truncf %17 : vector<16x16xf32> to vector<16x16xbf16>
    %cst_12 = arith.constant dense<0.000000e+00> : vector<16x4xf32>
    %21 = tpu.matmul %20, %11, %cst_12 {dimension_numbers = #tpu.dot_dimension_numbers<[1], [0], [0], [1], [0, 0, 1, 1], [], []>} : vector<16x16xbf16>, vector<16x4xbf16>, vector<16x4xf32> -> vector<16x4xf32>
    %22 = tpu.reciprocal %19 {approx = true} : vector<16x1xf32> -> vector<16x1xf32>
    %23 = vector.broadcast %22 : vector<16x1xf32> to vector<16x4xf32>
    %24 = arith.mulf %21, %23 : vector<16x4xf32>
    %25 = arith.truncf %24 : vector<16x4xf32> to vector<16x4xbf16>
    %c0_13 = arith.constant 0 : index
    %c0_14 = arith.constant 0 : index
    %26 = vector.load %arg11[%c0_13, %c0_14] : memref<16x32xbf16, #tpu.memory_space<vmem>>, vector<16x4xbf16>
    tpu.vector_store %arg11[%c0_13, %c0_14], %25 {strides = array<i32>} : memref<16x32xbf16, #tpu.memory_space<vmem>>, vector<16x4xbf16>,
    %27 = vector.extract_strided_slice %8 {offsets = [0, 4], sizes = [16, 4], strides = [1, 1]} : vector<16x32xbf16> to vector<16x4xbf16>
    %c0_15 = arith.constant 0 : index
    %c4 = arith.constant 4 : index
    %28 = vector.load %arg9[%c0_15, %c4] : memref<16x32xbf16, #tpu.memory_space<vmem>>, vector<16x4xbf16>
    %c0_16 = arith.constant 0 : index
    %c4_17 = arith.constant 4 : index
    %29 = vector.load %arg10[%c0_16, %c4_17] : memref<16x32xbf16, #tpu.memory_space<vmem>>, vector<16x4xbf16>
    %cst_18 = arith.constant dense<0.000000e+00> : vector<16x16xf32>
    %30 = tpu.matmul %27, %28, %cst_18 {dimension_numbers = #tpu.dot_dimension_numbers<[1], [1], [0], [0], [0, 0, 1, 0], [], []>} : vector<16x4xbf16>, vector<16x4xbf16>, vector<16x16xf32> -> vector<16x16xf32>
    %cst_19 = arith.constant dense<0xFF800000> : vector<16xf32>
    %31 = vector.multi_reduction <maximumf>, %30, %cst_19 [1] : vector<16x16xf32> to vector<16xf32>
    %32 = vector.shape_cast %31 : vector<16xf32> to vector<16x1xf32>
    %33 = vector.broadcast %32 : vector<16x1xf32> to vector<16x16xf32>
    %34 = arith.subf %30, %33 : vector<16x16xf32>
    %35 = math.exp %34 : vector<16x16xf32>
    %cst_20 = arith.constant dense<0.000000e+00> : vector<16xf32>
    %36 = vector.multi_reduction <add>, %35, %cst_20 [1] : vector<16x16xf32> to vector<16xf32>
    %37 = vector.shape_cast %36 : vector<16xf32> to vector<16x1xf32>
    %38 = arith.truncf %35 : vector<16x16xf32> to vector<16x16xbf16>
    %cst_21 = arith.constant dense<0.000000e+00> : vector<16x4xf32>
    %39 = tpu.matmul %38, %29, %cst_21 {dimension_numbers = #tpu.dot_dimension_numbers<[1], [0], [0], [1], [0, 0, 1, 1], [], []>} : vector<16x16xbf16>, vector<16x4xbf16>, vector<16x4xf32> -> vector<16x4xf32>
    %40 = tpu.reciprocal %37 {approx = true} : vector<16x1xf32> -> vector<16x1xf32>
    %41 = vector.broadcast %40 : vector<16x1xf32> to vector<16x4xf32>
    %42 = arith.mulf %39, %41 : vector<16x4xf32>
    %43 = arith.truncf %42 : vector<16x4xf32> to vector<16x4xbf16>
    %c0_22 = arith.constant 0 : index
    %c4_23 = arith.constant 4 : index
    %44 = vector.load %arg11[%c0_22, %c4_23] : memref<16x32xbf16, #tpu.memory_space<vmem>>, vector<16x4xbf16>
    tpu.vector_store %arg11[%c0_22, %c4_23], %43 {strides = array<i32>} : memref<16x32xbf16, #tpu.memory_space<vmem>>, vector<16x4xbf16>,
    %45 = vector.extract_strided_slice %8 {offsets = [0, 8], sizes = [16, 4], strides = [1, 1]} : vector<16x32xbf16> to vector<16x4xbf16>
    %c0_24 = arith.constant 0 : index
    %c8 = arith.constant 8 : index
    %46 = vector.load %arg9[%c0_24, %c8] : memref<16x32xbf16, #tpu.memory_space<vmem>>, vector<16x4xbf16>
    %c0_25 = arith.constant 0 : index
    %c8_26 = arith.constant 8 : index
    %47 = vector.load %arg10[%c0_25, %c8_26] : memref<16x32xbf16, #tpu.memory_space<vmem>>, vector<16x4xbf16>
    %cst_27 = arith.constant dense<0.000000e+00> : vector<16x16xf32>
    %48 = tpu.matmul %45, %46, %cst_27 {dimension_numbers = #tpu.dot_dimension_numbers<[1], [1], [0], [0], [0, 0, 1, 0], [], []>} : vector<16x4xbf16>, vector<16x4xbf16>, vector<16x16xf32> -> vector<16x16xf32>
    %cst_28 = arith.constant dense<0xFF800000> : vector<16xf32>
    %49 = vector.multi_reduction <maximumf>, %48, %cst_28 [1] : vector<16x16xf32> to vector<16xf32>
    %50 = vector.shape_cast %49 : vector<16xf32> to vector<16x1xf32>
    %51 = vector.broadcast %50 : vector<16x1xf32> to vector<16x16xf32>
    %52 = arith.subf %48, %51 : vector<16x16xf32>
    %53 = math.exp %52 : vector<16x16xf32>
    %cst_29 = arith.constant dense<0.000000e+00> : vector<16xf32>
    %54 = vector.multi_reduction <add>, %53, %cst_29 [1] : vector<16x16xf32> to vector<16xf32>
    %55 = vector.shape_cast %54 : vector<16xf32> to vector<16x1xf32>
    %56 = arith.truncf %53 : vector<16x16xf32> to vector<16x16xbf16>
    %cst_30 = arith.constant dense<0.000000e+00> : vector<16x4xf32>
    %57 = tpu.matmul %56, %47, %cst_30 {dimension_numbers = #tpu.dot_dimension_numbers<[1], [0], [0], [1], [0, 0, 1, 1], [], []>} : vector<16x16xbf16>, vector<16x4xbf16>, vector<16x4xf32> -> vector<16x4xf32>
    %58 = tpu.reciprocal %55 {approx = true} : vector<16x1xf32> -> vector<16x1xf32>
    %59 = vector.broadcast %58 : vector<16x1xf32> to vector<16x4xf32>
    %60 = arith.mulf %57, %59 : vector<16x4xf32>
    %61 = arith.truncf %60 : vector<16x4xf32> to vector<16x4xbf16>
    %c0_31 = arith.constant 0 : index
    %c8_32 = arith.constant 8 : index
    %62 = vector.load %arg11[%c0_31, %c8_32] : memref<16x32xbf16, #tpu.memory_space<vmem>>, vector<16x4xbf16>
    tpu.vector_store %arg11[%c0_31, %c8_32], %61 {strides = array<i32>} : memref<16x32xbf16, #tpu.memory_space<vmem>>, vector<16x4xbf16>,
    %63 = vector.extract_strided_slice %8 {offsets = [0, 12], sizes = [16, 4], strides = [1, 1]} : vector<16x32xbf16> to vector<16x4xbf16>
    %c0_33 = arith.constant 0 : index
    %c12 = arith.constant 12 : index
    %64 = vector.load %arg9[%c0_33, %c12] : memref<16x32xbf16, #tpu.memory_space<vmem>>, vector<16x4xbf16>
    %c0_34 = arith.constant 0 : index
    %c12_35 = arith.constant 12 : index
    %65 = vector.load %arg10[%c0_34, %c12_35] : memref<16x32xbf16, #tpu.memory_space<vmem>>, vector<16x4xbf16>
    %cst_36 = arith.constant dense<0.000000e+00> : vector<16x16xf32>
    %66 = tpu.matmul %63, %64, %cst_36 {dimension_numbers = #tpu.dot_dimension_numbers<[1], [1], [0], [0], [0, 0, 1, 0], [], []>} : vector<16x4xbf16>, vector<16x4xbf16>, vector<16x16xf32> -> vector<16x16xf32>
    %cst_37 = arith.constant dense<0xFF800000> : vector<16xf32>
    %67 = vector.multi_reduction <maximumf>, %66, %cst_37 [1] : vector<16x16xf32> to vector<16xf32>
    %68 = vector.shape_cast %67 : vector<16xf32> to vector<16x1xf32>
    %69 = vector.broadcast %68 : vector<16x1xf32> to vector<16x16xf32>
    %70 = arith.subf %66, %69 : vector<16x16xf32>
    %71 = math.exp %70 : vector<16x16xf32>
    %cst_38 = arith.constant dense<0.000000e+00> : vector<16xf32>
    %72 = vector.multi_reduction <add>, %71, %cst_38 [1] : vector<16x16xf32> to vector<16xf32>
    %73 = vector.shape_cast %72 : vector<16xf32> to vector<16x1xf32>
    %74 = arith.truncf %71 : vector<16x16xf32> to vector<16x16xbf16>
    %cst_39 = arith.constant dense<0.000000e+00> : vector<16x4xf32>
    %75 = tpu.matmul %74, %65, %cst_39 {dimension_numbers = #tpu.dot_dimension_numbers<[1], [0], [0], [1], [0, 0, 1, 1], [], []>} : vector<16x16xbf16>, vector<16x4xbf16>, vector<16x4xf32> -> vector<16x4xf32>
    %76 = tpu.reciprocal %73 {approx = true} : vector<16x1xf32> -> vector<16x1xf32>
    %77 = vector.broadcast %76 : vector<16x1xf32> to vector<16x4xf32>
    %78 = arith.mulf %75, %77 : vector<16x4xf32>
    %79 = arith.truncf %78 : vector<16x4xf32> to vector<16x4xbf16>
    %c0_40 = arith.constant 0 : index
    %c12_41 = arith.constant 12 : index
    %80 = vector.load %arg11[%c0_40, %c12_41] : memref<16x32xbf16, #tpu.memory_space<vmem>>, vector<16x4xbf16>
    tpu.vector_store %arg11[%c0_40, %c12_41], %79 {strides = array<i32>} : memref<16x32xbf16, #tpu.memory_space<vmem>>, vector<16x4xbf16>,
    %81 = vector.extract_strided_slice %8 {offsets = [0, 16], sizes = [16, 4], strides = [1, 1]} : vector<16x32xbf16> to vector<16x4xbf16>
    %c0_42 = arith.constant 0 : index
    %c16 = arith.constant 16 : index
    %82 = vector.load %arg9[%c0_42, %c16] : memref<16x32xbf16, #tpu.memory_space<vmem>>, vector<16x4xbf16>
    %c0_43 = arith.constant 0 : index
    %c16_44 = arith.constant 16 : index
    %83 = vector.load %arg10[%c0_43, %c16_44] : memref<16x32xbf16, #tpu.memory_space<vmem>>, vector<16x4xbf16>
    %cst_45 = arith.constant dense<0.000000e+00> : vector<16x16xf32>
    %84 = tpu.matmul %81, %82, %cst_45 {dimension_numbers = #tpu.dot_dimension_numbers<[1], [1], [0], [0], [0, 0, 1, 0], [], []>} : vector<16x4xbf16>, vector<16x4xbf16>, vector<16x16xf32> -> vector<16x16xf32>
    %cst_46 = arith.constant dense<0xFF800000> : vector<16xf32>
    %85 = vector.multi_reduction <maximumf>, %84, %cst_46 [1] : vector<16x16xf32> to vector<16xf32>
    %86 = vector.shape_cast %85 : vector<16xf32> to vector<16x1xf32>
    %87 = vector.broadcast %86 : vector<16x1xf32> to vector<16x16xf32>
    %88 = arith.subf %84, %87 : vector<16x16xf32>
    %89 = math.exp %88 : vector<16x16xf32>
    %cst_47 = arith.constant dense<0.000000e+00> : vector<16xf32>
    %90 = vector.multi_reduction <add>, %89, %cst_47 [1] : vector<16x16xf32> to vector<16xf32>
    %91 = vector.shape_cast %90 : vector<16xf32> to vector<16x1xf32>
    %92 = arith.truncf %89 : vector<16x16xf32> to vector<16x16xbf16>
    %cst_48 = arith.constant dense<0.000000e+00> : vector<16x4xf32>
    %93 = tpu.matmul %92, %83, %cst_48 {dimension_numbers = #tpu.dot_dimension_numbers<[1], [0], [0], [1], [0, 0, 1, 1], [], []>} : vector<16x16xbf16>, vector<16x4xbf16>, vector<16x4xf32> -> vector<16x4xf32>
    %94 = tpu.reciprocal %91 {approx = true} : vector<16x1xf32> -> vector<16x1xf32>
    %95 = vector.broadcast %94 : vector<16x1xf32> to vector<16x4xf32>
    %96 = arith.mulf %93, %95 : vector<16x4xf32>
    %97 = arith.truncf %96 : vector<16x4xf32> to vector<16x4xbf16>
    %c0_49 = arith.constant 0 : index
    %c16_50 = arith.constant 16 : index
    %98 = vector.load %arg11[%c0_49, %c16_50] : memref<16x32xbf16, #tpu.memory_space<vmem>>, vector<16x4xbf16>
    tpu.vector_store %arg11[%c0_49, %c16_50], %97 {strides = array<i32>} : memref<16x32xbf16, #tpu.memory_space<vmem>>, vector<16x4xbf16>,
    %99 = vector.extract_strided_slice %8 {offsets = [0, 20], sizes = [16, 4], strides = [1, 1]} : vector<16x32xbf16> to vector<16x4xbf16>
    %c0_51 = arith.constant 0 : index
    %c20 = arith.constant 20 : index
    %100 = vector.load %arg9[%c0_51, %c20] : memref<16x32xbf16, #tpu.memory_space<vmem>>, vector<16x4xbf16>
    %c0_52 = arith.constant 0 : index
    %c20_53 = arith.constant 20 : index
    %101 = vector.load %arg10[%c0_52, %c20_53] : memref<16x32xbf16, #tpu.memory_space<vmem>>, vector<16x4xbf16>
    %cst_54 = arith.constant dense<0.000000e+00> : vector<16x16xf32>
    %102 = tpu.matmul %99, %100, %cst_54 {dimension_numbers = #tpu.dot_dimension_numbers<[1], [1], [0], [0], [0, 0, 1, 0], [], []>} : vector<16x4xbf16>, vector<16x4xbf16>, vector<16x16xf32> -> vector<16x16xf32>
    %cst_55 = arith.constant dense<0xFF800000> : vector<16xf32>
    %103 = vector.multi_reduction <maximumf>, %102, %cst_55 [1] : vector<16x16xf32> to vector<16xf32>
    %104 = vector.shape_cast %103 : vector<16xf32> to vector<16x1xf32>
    %105 = vector.broadcast %104 : vector<16x1xf32> to vector<16x16xf32>
    %106 = arith.subf %102, %105 : vector<16x16xf32>
    %107 = math.exp %106 : vector<16x16xf32>
    %cst_56 = arith.constant dense<0.000000e+00> : vector<16xf32>
    %108 = vector.multi_reduction <add>, %107, %cst_56 [1] : vector<16x16xf32> to vector<16xf32>
    %109 = vector.shape_cast %108 : vector<16xf32> to vector<16x1xf32>
    %110 = arith.truncf %107 : vector<16x16xf32> to vector<16x16xbf16>
    %cst_57 = arith.constant dense<0.000000e+00> : vector<16x4xf32>
    %111 = tpu.matmul %110, %101, %cst_57 {dimension_numbers = #tpu.dot_dimension_numbers<[1], [0], [0], [1], [0, 0, 1, 1], [], []>} : vector<16x16xbf16>, vector<16x4xbf16>, vector<16x4xf32> -> vector<16x4xf32>
    %112 = tpu.reciprocal %109 {approx = true} : vector<16x1xf32> -> vector<16x1xf32>
    %113 = vector.broadcast %112 : vector<16x1xf32> to vector<16x4xf32>
    %114 = arith.mulf %111, %113 : vector<16x4xf32>
    %115 = arith.truncf %114 : vector<16x4xf32> to vector<16x4xbf16>
    %c0_58 = arith.constant 0 : index
    %c20_59 = arith.constant 20 : index
    %116 = vector.load %arg11[%c0_58, %c20_59] : memref<16x32xbf16, #tpu.memory_space<vmem>>, vector<16x4xbf16>
    tpu.vector_store %arg11[%c0_58, %c20_59], %115 {strides = array<i32>} : memref<16x32xbf16, #tpu.memory_space<vmem>>, vector<16x4xbf16>,
    %117 = vector.extract_strided_slice %8 {offsets = [0, 24], sizes = [16, 4], strides = [1, 1]} : vector<16x32xbf16> to vector<16x4xbf16>
    %c0_60 = arith.constant 0 : index
    %c24 = arith.constant 24 : index
    %118 = vector.load %arg9[%c0_60, %c24] : memref<16x32xbf16, #tpu.memory_space<vmem>>, vector<16x4xbf16>
    %c0_61 = arith.constant 0 : index
    %c24_62 = arith.constant 24 : index
    %119 = vector.load %arg10[%c0_61, %c24_62] : memref<16x32xbf16, #tpu.memory_space<vmem>>, vector<16x4xbf16>
    %cst_63 = arith.constant dense<0.000000e+00> : vector<16x16xf32>
    %120 = tpu.matmul %117, %118, %cst_63 {dimension_numbers = #tpu.dot_dimension_numbers<[1], [1], [0], [0], [0, 0, 1, 0], [], []>} : vector<16x4xbf16>, vector<16x4xbf16>, vector<16x16xf32> -> vector<16x16xf32>
    %cst_64 = arith.constant dense<0xFF800000> : vector<16xf32>
    %121 = vector.multi_reduction <maximumf>, %120, %cst_64 [1] : vector<16x16xf32> to vector<16xf32>
    %122 = vector.shape_cast %121 : vector<16xf32> to vector<16x1xf32>
    %123 = vector.broadcast %122 : vector<16x1xf32> to vector<16x16xf32>
    %124 = arith.subf %120, %123 : vector<16x16xf32>
    %125 = math.exp %124 : vector<16x16xf32>
    %cst_65 = arith.constant dense<0.000000e+00> : vector<16xf32>
    %126 = vector.multi_reduction <add>, %125, %cst_65 [1] : vector<16x16xf32> to vector<16xf32>
    %127 = vector.shape_cast %126 : vector<16xf32> to vector<16x1xf32>
    %128 = arith.truncf %125 : vector<16x16xf32> to vector<16x16xbf16>
    %cst_66 = arith.constant dense<0.000000e+00> : vector<16x4xf32>
    %129 = tpu.matmul %128, %119, %cst_66 {dimension_numbers = #tpu.dot_dimension_numbers<[1], [0], [0], [1], [0, 0, 1, 1], [], []>} : vector<16x16xbf16>, vector<16x4xbf16>, vector<16x4xf32> -> vector<16x4xf32>
    %130 = tpu.reciprocal %127 {approx = true} : vector<16x1xf32> -> vector<16x1xf32>
    %131 = vector.broadcast %130 : vector<16x1xf32> to vector<16x4xf32>
    %132 = arith.mulf %129, %131 : vector<16x4xf32>
    %133 = arith.truncf %132 : vector<16x4xf32> to vector<16x4xbf16>
    %c0_67 = arith.constant 0 : index
    %c24_68 = arith.constant 24 : index
    %134 = vector.load %arg11[%c0_67, %c24_68] : memref<16x32xbf16, #tpu.memory_space<vmem>>, vector<16x4xbf16>
    tpu.vector_store %arg11[%c0_67, %c24_68], %133 {strides = array<i32>} : memref<16x32xbf16, #tpu.memory_space<vmem>>, vector<16x4xbf16>,
    %135 = vector.extract_strided_slice %8 {offsets = [0, 28], sizes = [16, 4], strides = [1, 1]} : vector<16x32xbf16> to vector<16x4xbf16>
    %c0_69 = arith.constant 0 : index
    %c28 = arith.constant 28 : index
    %136 = vector.load %arg9[%c0_69, %c28] : memref<16x32xbf16, #tpu.memory_space<vmem>>, vector<16x4xbf16>
    %c0_70 = arith.constant 0 : index
    %c28_71 = arith.constant 28 : index
    %137 = vector.load %arg10[%c0_70, %c28_71] : memref<16x32xbf16, #tpu.memory_space<vmem>>, vector<16x4xbf16>
    %cst_72 = arith.constant dense<0.000000e+00> : vector<16x16xf32>
    %138 = tpu.matmul %135, %136, %cst_72 {dimension_numbers = #tpu.dot_dimension_numbers<[1], [1], [0], [0], [0, 0, 1, 0], [], []>} : vector<16x4xbf16>, vector<16x4xbf16>, vector<16x16xf32> -> vector<16x16xf32>
    %cst_73 = arith.constant dense<0xFF800000> : vector<16xf32>
    %139 = vector.multi_reduction <maximumf>, %138, %cst_73 [1] : vector<16x16xf32> to vector<16xf32>
    %140 = vector.shape_cast %139 : vector<16xf32> to vector<16x1xf32>
    %141 = vector.broadcast %140 : vector<16x1xf32> to vector<16x16xf32>
    %142 = arith.subf %138, %141 : vector<16x16xf32>
    %143 = math.exp %142 : vector<16x16xf32>
    %cst_74 = arith.constant dense<0.000000e+00> : vector<16xf32>
    %144 = vector.multi_reduction <add>, %143, %cst_74 [1] : vector<16x16xf32> to vector<16xf32>
    %145 = vector.shape_cast %144 : vector<16xf32> to vector<16x1xf32>
    %146 = arith.truncf %143 : vector<16x16xf32> to vector<16x16xbf16>
    %cst_75 = arith.constant dense<0.000000e+00> : vector<16x4xf32>
    %147 = tpu.matmul %146, %137, %cst_75 {dimension_numbers = #tpu.dot_dimension_numbers<[1], [0], [0], [1], [0, 0, 1, 1], [], []>} : vector<16x16xbf16>, vector<16x4xbf16>, vector<16x4xf32> -> vector<16x4xf32>
    %148 = tpu.reciprocal %145 {approx = true} : vector<16x1xf32> -> vector<16x1xf32>
    %149 = vector.broadcast %148 : vector<16x1xf32> to vector<16x4xf32>
    %150 = arith.mulf %147, %149 : vector<16x4xf32>
    %151 = arith.truncf %150 : vector<16x4xf32> to vector<16x4xbf16>
    %c0_76 = arith.constant 0 : index
    %c28_77 = arith.constant 28 : index
    %152 = vector.load %arg11[%c0_76, %c28_77] : memref<16x32xbf16, #tpu.memory_space<vmem>>, vector<16x4xbf16>
    tpu.vector_store %arg11[%c0_76, %c28_77], %151 {strides = array<i32>} : memref<16x32xbf16, #tpu.memory_space<vmem>>, vector<16x4xbf16>,
    %c0_78 = arith.constant 0 : index
    %c0_79 = arith.constant 0 : index
    %153 = vector.load %arg11[%c0_78, %c0_79] : memref<16x32xbf16, #tpu.memory_space<vmem>>, vector<16x32xbf16>
    %c0_80 = arith.constant 0 : index
    %c0_81 = arith.constant 0 : index
    %154 = vector.load %arg6[%c0_80, %c0_81] : memref<32x32xbf16, #tpu.memory_space<vmem>>, vector<32x32xbf16>
    %cst_82 = arith.constant dense<0.000000e+00> : vector<16x32xf32>
    %155 = tpu.matmul %153, %154, %cst_82 {dimension_numbers = #tpu.dot_dimension_numbers<[1], [0], [0], [1], [0, 0, 1, 1], [], []>} : vector<16x32xbf16>, vector<32x32xbf16>, vector<16x32xf32> -> vector<16x32xf32>
    %c0_83 = arith.constant 0 : index
    %c0_84 = arith.constant 0 : index
    %156 = vector.load %arg7[%c0_83, %c0_84] : memref<1x32xf32, #tpu.memory_space<vmem>>, vector<1x32xf32>
    %157 = vector.broadcast %156 : vector<1x32xf32> to vector<16x32xf32>
    %158 = arith.addf %155, %157 : vector<16x32xf32>
    %c0_85 = arith.constant 0 : index
    %c0_86 = arith.constant 0 : index
    %c0_87 = arith.constant 0 : index
    %159 = vector.load %arg8[%c0_85, %c0_86, %c0_87] : memref<1x16x32xf32, #tpu.memory_space<vmem>>, vector<1x16x32xf32>
    %160 = vector.shape_cast %159 : vector<1x16x32xf32> to vector<16x32xf32>
    %161 = vector.shape_cast %158 : vector<16x32xf32> to vector<1x16x32xf32>
    tpu.vector_store %arg8[%c0_85, %c0_86, %c0_87], %161 {strides = array<i32>} : memref<1x16x32xf32, #tpu.memory_space<vmem>>, vector<1x16x32xf32>,
    return
  }
  func.func @transform_0(%arg0: i32, %arg1: i32) -> (i32, i32, i32) {
    %c0_i32 = arith.constant 0 : i32
    %c0_i32_0 = arith.constant 0 : i32
    %c0_i32_1 = arith.constant 0 : i32
    return %arg0, %c0_i32, %c0_i32_0 : i32, i32, i32
  }
  func.func @transform_1(%arg0: i32, %arg1: i32) -> (i32, i32) {
    %c0_i32 = arith.constant 0 : i32
    %c0_i32_0 = arith.constant 0 : i32
    %c0_i32_1 = arith.constant 0 : i32
    return %c0_i32, %c0_i32_0 : i32, i32
  }
  func.func @transform_2(%arg0: i32, %arg1: i32) -> (i32, i32) {
    %c0_i32 = arith.constant 0 : i32
    %c0_i32_0 = arith.constant 0 : i32
    %c0_i32_1 = arith.constant 0 : i32
    return %c0_i32, %c0_i32_0 : i32, i32
  }
  func.func @transform_3(%arg0: i32, %arg1: i32) -> (i32, i32) {
    %c0_i32 = arith.constant 0 : i32
    %c0_i32_0 = arith.constant 0 : i32
    %c0_i32_1 = arith.constant 0 : i32
    return %c0_i32, %c0_i32_0 : i32, i32
  }
  func.func @transform_4(%arg0: i32, %arg1: i32) -> (i32, i32) {
    %c0_i32 = arith.constant 0 : i32
    %c0_i32_0 = arith.constant 0 : i32
    %c0_i32_1 = arith.constant 0 : i32
    return %c0_i32, %c0_i32_0 : i32, i32
  }
  func.func @transform_5(%arg0: i32, %arg1: i32) -> (i32, i32) {
    %c0_i32 = arith.constant 0 : i32
    %c0_i32_0 = arith.constant 0 : i32
    %c0_i32_1 = arith.constant 0 : i32
    return %c0_i32, %c0_i32_0 : i32, i32
  }
  func.func @transform_6(%arg0: i32, %arg1: i32) -> (i32, i32, i32) {
    %c0_i32 = arith.constant 0 : i32
    %c0_i32_0 = arith.constant 0 : i32
    return %arg0, %arg1, %c0_i32 : i32, i32, i32
  }
}

module attributes {stable_mosaic.version = 11 : i64} {
  func.func @_attention_kernel(%arg0: i32, %arg1: i32, %arg2: memref<1x16x32xf32, #tpu.memory_space<vmem>>, %arg3: memref<32x32xbf16, #tpu.memory_space<vmem>>, %arg4: memref<32x32xbf16, #tpu.memory_space<vmem>>, %arg5: memref<32x32xbf16, #tpu.memory_space<vmem>>, %arg6: memref<32x32xbf16, #tpu.memory_space<vmem>>, %arg7: memref<1x32xf32, #tpu.memory_space<vmem>>, %arg8: memref<1x16x32xf32, #tpu.memory_space<vmem>>, %arg9: memref<16x32xbf16, #tpu.memory_space<vmem>>, %arg10: memref<16x32xbf16, #tpu.memory_space<vmem>>, %arg11: memref<16x32xbf16, #tpu.memory_space<vmem>>) attributes {dimension_semantics = [#tpu.dimension_semantics<parallel>, #tpu.dimension_semantics<arbitrary>], iteration_bounds = array<i64: 2, 1>, scalar_prefetch = 0 : i64, scratch_operands = 3 : i64, tpu.core_type = #tpu.core_type<tc>, window_params = [{transform_indices = @transform_0, window_bounds = array<i64: 1, 16, 32>}, {pipeline_mode = #tpu.pipeline_mode<synchronous>, transform_indices = @transform_1, window_bounds = array<i64: 32, 32>}, {pipeline_mode = #tpu.pipeline_mode<synchronous>, transform_indices = @transform_2, window_bounds = array<i64: 32, 32>}, {pipeline_mode = #tpu.pipeline_mode<synchronous>, transform_indices = @transform_3, window_bounds = array<i64: 32, 32>}, {pipeline_mode = #tpu.pipeline_mode<synchronous>, transform_indices = @transform_4, window_bounds = array<i64: 32, 32>}, {pipeline_mode = #tpu.pipeline_mode<synchronous>, transform_indices = @transform_5, window_bounds = array<i64: 1, 32>}, {transform_indices = @transform_6, window_bounds = array<i64: 1, 16, 32>}]} {
    %c0_i32 = arith.constant 0 : i32
    %0 = arith.cmpi eq, %arg1, %c0_i32 : i32
    %1 = arith.extui %0 : i1 to i32
    %c0_i32_0 = arith.constant 0 : i32
    %2 = arith.cmpi ne, %1, %c0_i32_0 : i32
    scf.if %2 {
      %c0_88 = arith.constant 0 : index
      %c0_89 = arith.constant 0 : index
      %c0_90 = arith.constant 0 : index
      %162 = vector.load %arg2[%c0_88, %c0_89, %c0_90] : memref<1x16x32xf32, #tpu.memory_space<vmem>>, vector<1x16x32xf32>
      %163 = vector.shape_cast %162 : vector<1x16x32xf32> to vector<16x32xf32>
      %164 = arith.truncf %163 : vector<16x32xf32> to vector<16x32xbf16>
      %c0_91 = arith.constant 0 : index
      %c0_92 = arith.constant 0 : index
      %165 = vector.load %arg4[%c0_91, %c0_92] : memref<32x32xbf16, #tpu.memory_space<vmem>>, vector<32x32xbf16>
      %cst_93 = arith.constant dense<0.000000e+00> : vector<16x32xf32>
      %166 = tpu.matmul %164, %165, %cst_93 {dimension_numbers = #tpu.dot_dimension_numbers<[1], [0], [0], [1], [0, 0, 1, 1], [], []>} : vector<16x32xbf16>, vector<32x32xbf16>, vector<16x32xf32> -> vector<16x32xf32>
      %167 = arith.truncf %166 : vector<16x32xf32> to vector<16x32xbf16>
      %c0_94 = arith.constant 0 : index
      %c0_95 = arith.constant 0 : index
      %168 = vector.load %arg9[%c0_94, %c0_95] : memref<16x32xbf16, #tpu.memory_space<vmem>>, vector<16x32xbf16>
      tpu.vector_store %arg9[%c0_94, %c0_95], %167 {strides = array<i32>} : memref<16x32xbf16, #tpu.memory_space<vmem>>, vector<16x32xbf16>,
      %c0_96 = arith.constant 0 : index
      %c0_97 = arith.constant 0 : index
      %169 = vector.load %arg5[%c0_96, %c0_97] : memref<32x32xbf16, #tpu.memory_space<vmem>>, vector<32x32xbf16>
      %cst_98 = arith.constant dense<0.000000e+00> : vector<16x32xf32>
      %170 = tpu.matmul %164, %169, %cst_98 {dimension_numbers = #tpu.dot_dimension_numbers<[1], [0], [0], [1], [0, 0, 1, 1], [], []>} : vector<16x32xbf16>, vector<32x32xbf16>, vector<16x32xf32> -> vector<16x32xf32>
      %171 = arith.truncf %170 : vector<16x32xf32> to vector<16x32xbf16>
      %c0_99 = arith.constant 0 : index
      %c0_100 = arith.constant 0 : index
      %172 = vector.load %arg10[%c0_99, %c0_100] : memref<16x32xbf16, #tpu.memory_space<vmem>>, vector<16x32xbf16>
      tpu.vector_store %arg10[%c0_99, %c0_100], %171 {strides = array<i32>} : memref<16x32xbf16, #tpu.memory_space<vmem>>, vector<16x32xbf16>,
    } else {
    }
    %c0 = arith.constant 0 : index
    %c0_1 = arith.constant 0 : index
    %c0_2 = arith.constant 0 : index
    %3 = vector.load %arg2[%c0, %c0_1, %c0_2] : memref<1x16x32xf32, #tpu.memory_space<vmem>>, vector<1x16x32xf32>
    %4 = vector.shape_cast %3 : vector<1x16x32xf32> to vector<16x32xf32>
    %5 = arith.truncf %4 : vector<16x32xf32> to vector<16x32xbf16>
    %c0_3 = arith.constant 0 : index
    %c0_4 = arith.constant 0 : index
    %6 = vector.load %arg3[%c0_3, %c0_4] : memref<32x32xbf16, #tpu.memory_space<vmem>>, vector<32x32xbf16>
    %cst = arith.constant dense<0.000000e+00> : vector<16x32xf32>
    %7 = tpu.matmul %5, %6, %cst {dimension_numbers = #tpu.dot_dimension_numbers<[1], [0], [0], [1], [0, 0, 1, 1], [], []>} : vector<16x32xbf16>, vector<32x32xbf16>, vector<16x32xf32> -> vector<16x32xf32>
    %8 = arith.truncf %7 : vector<16x32xf32> to vector<16x32xbf16>
    %9 = vector.extract_strided_slice %8 {offsets = [0, 0], sizes = [16, 4], strides = [1, 1]} : vector<16x32xbf16> to vector<16x4xbf16>
    %c0_5 = arith.constant 0 : index
    %c0_6 = arith.constant 0 : index
    %10 = vector.load %arg9[%c0_5, %c0_6] : memref<16x32xbf16, #tpu.memory_space<vmem>>, vector<16x4xbf16>
    %c0_7 = arith.constant 0 : index
    %c0_8 = arith.constant 0 : index
    %11 = vector.load %arg10[%c0_7, %c0_8] : memref<16x32xbf16, #tpu.memory_space<vmem>>, vector<16x4xbf16>
    %cst_9 = arith.constant dense<0.000000e+00> : vector<16x16xf32>
    %12 = tpu.matmul %9, %10, %cst_9 {dimension_numbers = #tpu.dot_dimension_numbers<[1], [1], [0], [0], [0, 0, 1, 0], [], []>} : vector<16x4xbf16>, vector<16x4xbf16>, vector<16x16xf32> -> vector<16x16xf32>
    %cst_10 = arith.constant dense<0xFF800000> : vector<16xf32>
    %13 = vector.multi_reduction <maximumf>, %12, %cst_10 [1] : vector<16x16xf32> to vector<16xf32>
    %14 = vector.shape_cast %13 : vector<16xf32> to vector<16x1xf32>
    %15 = vector.broadcast %14 : vector<16x1xf32> to vector<16x16xf32>
    %16 = arith.subf %12, %15 : vector<16x16xf32>
    %17 = math.exp %16 : vector<16x16xf32>
    %cst_11 = arith.constant dense<0.000000e+00> : vector<16xf32>
    %18 = vector.multi_reduction <add>, %17, %cst_11 [1] : vector<16x16xf32> to vector<16xf32>
    %19 = vector.shape_cast %18 : vector<16xf32> to vector<16x1xf32>
    %20 = arith.truncf %17 : vector<16x16xf32> to vector<16x16xbf16>
    %cst_12 = arith.constant dense<0.000000e+00> : vector<16x4xf32>
    %21 = tpu.matmul %20, %11, %cst_12 {dimension_numbers = #tpu.dot_dimension_numbers<[1], [0], [0], [1], [0, 0, 1, 1], [], []>} : vector<16x16xbf16>, vector<16x4xbf16>, vector<16x4xf32> -> vector<16x4xf32>
    %22 = tpu.reciprocal %19 {approx = true} : vector<16x1xf32> -> vector<16x1xf32>
    %23 = vector.broadcast %22 : vector<16x1xf32> to vector<16x4xf32>
    %24 = arith.mulf %21, %23 : vector<16x4xf32>
    %25 = arith.truncf %24 : vector<16x4xf32> to vector<16x4xbf16>
    %c0_13 = arith.constant 0 : index
    %c0_14 = arith.constant 0 : index
    %26 = vector.load %arg11[%c0_13, %c0_14] : memref<16x32xbf16, #tpu.memory_space<vmem>>, vector<16x4xbf16>
    tpu.vector_store %arg11[%c0_13, %c0_14], %25 {strides = array<i32>} : memref<16x32xbf16, #tpu.memory_space<vmem>>, vector<16x4xbf16>,
    %27 = vector.extract_strided_slice %8 {offsets = [0, 4], sizes = [16, 4], strides = [1, 1]} : vector<16x32xbf16> to vector<16x4xbf16>
    %c0_15 = arith.constant 0 : index
    %c4 = arith.constant 4 : index
    %28 = vector.load %arg9[%c0_15, %c4] : memref<16x32xbf16, #tpu.memory_space<vmem>>, vector<16x4xbf16>
    %c0_16 = arith.constant 0 : index
    %c4_17 = arith.constant 4 : index
    %29 = vector.load %arg10[%c0_16, %c4_17] : memref<16x32xbf16, #tpu.memory_space<vmem>>, vector<16x4xbf16>
    %cst_18 = arith.constant dense<0.000000e+00> : vector<16x16xf32>
    %30 = tpu.matmul %27, %28, %cst_18 {dimension_numbers = #tpu.dot_dimension_numbers<[1], [1], [0], [0], [0, 0, 1, 0], [], []>} : vector<16x4xbf16>, vector<16x4xbf16>, vector<16x16xf32> -> vector<16x16xf32>
    %cst_19 = arith.constant dense<0xFF800000> : vector<16xf32>
    %31 = vector.multi_reduction <maximumf>, %30, %cst_19 [1] : vector<16x16xf32> to vector<16xf32>
    %32 = vector.shape_cast %31 : vector<16xf32> to vector<16x1xf32>
    %33 = vector.broadcast %32 : vector<16x1xf32> to vector<16x16xf32>
    %34 = arith.subf %30, %33 : vector<16x16xf32>
    %35 = math.exp %34 : vector<16x16xf32>
    %cst_20 = arith.constant dense<0.000000e+00> : vector<16xf32>
    %36 = vector.multi_reduction <add>, %35, %cst_20 [1] : vector<16x16xf32> to vector<16xf32>
    %37 = vector.shape_cast %36 : vector<16xf32> to vector<16x1xf32>
    %38 = arith.truncf %35 : vector<16x16xf32> to vector<16x16xbf16>
    %cst_21 = arith.constant dense<0.000000e+00> : vector<16x4xf32>
    %39 = tpu.matmul %38, %29, %cst_21 {dimension_numbers = #tpu.dot_dimension_numbers<[1], [0], [0], [1], [0, 0, 1, 1], [], []>} : vector<16x16xbf16>, vector<16x4xbf16>, vector<16x4xf32> -> vector<16x4xf32>
    %40 = tpu.reciprocal %37 {approx = true} : vector<16x1xf32> -> vector<16x1xf32>
    %41 = vector.broadcast %40 : vector<16x1xf32> to vector<16x4xf32>
    %42 = arith.mulf %39, %41 : vector<16x4xf32>
    %43 = arith.truncf %42 : vector<16x4xf32> to vector<16x4xbf16>
    %c0_22 = arith.constant 0 : index
    %c4_23 = arith.constant 4 : index
    %44 = vector.load %arg11[%c0_22, %c4_23] : memref<16x32xbf16, #tpu.memory_space<vmem>>, vector<16x4xbf16>
    tpu.vector_store %arg11[%c0_22, %c4_23], %43 {strides = array<i32>} : memref<16x32xbf16, #tpu.memory_space<vmem>>, vector<16x4xbf16>,
    %45 = vector.extract_strided_slice %8 {offsets = [0, 8], sizes = [16, 4], strides = [1, 1]} : vector<16x32xbf16> to vector<16x4xbf16>
    %c0_24 = arith.constant 0 : index
    %c8 = arith.constant 8 : index
    %46 = vector.load %arg9[%c0_24, %c8] : memref<16x32xbf16, #tpu.memory_space<vmem>>, vector<16x4xbf16>
    %c0_25 = arith.constant 0 : index
    %c8_26 = arith.constant 8 : index
    %47 = vector.load %arg10[%c0_25, %c8_26] : memref<16x32xbf16, #tpu.memory_space<vmem>>, vector<16x4xbf16>
    %cst_27 = arith.constant dense<0.000000e+00> : vector<16x16xf32>
    %48 = tpu.matmul %45, %46, %cst_27 {dimension_numbers = #tpu.dot_dimension_numbers<[1], [1], [0], [0], [0, 0, 1, 0], [], []>} : vector<16x4xbf16>, vector<16x4xbf16>, vector<16x16xf32> -> vector<16x16xf32>
    %cst_28 = arith.constant dense<0xFF800000> : vector<16xf32>
    %49 = vector.multi_reduction <maximumf>, %48, %cst_28 [1] : vector<16x16xf32> to vector<16xf32>
    %50 = vector.shape_cast %49 : vector<16xf32> to vector<16x1xf32>
    %51 = vector.broadcast %50 : vector<16x1xf32> to vector<16x16xf32>
    %52 = arith.subf %48, %51 : vector<16x16xf32>
    %53 = math.exp %52 : vector<16x16xf32>
    %cst_29 = arith.constant dense<0.000000e+00> : vector<16xf32>
    %54 = vector.multi_reduction <add>, %53, %cst_29 [1] : vector<16x16xf32> to vector<16xf32>
    %55 = vector.shape_cast %54 : vector<16xf32> to vector<16x1xf32>
    %56 = arith.truncf %53 : vector<16x16xf32> to vector<16x16xbf16>
    %cst_30 = arith.constant dense<0.000000e+00> : vector<16x4xf32>
    %57 = tpu.matmul %56, %47, %cst_30 {dimension_numbers = #tpu.dot_dimension_numbers<[1], [0], [0], [1], [0, 0, 1, 1], [], []>} : vector<16x16xbf16>, vector<16x4xbf16>, vector<16x4xf32> -> vector<16x4xf32>
    %58 = tpu.reciprocal %55 {approx = true} : vector<16x1xf32> -> vector<16x1xf32>
    %59 = vector.broadcast %58 : vector<16x1xf32> to vector<16x4xf32>
    %60 = arith.mulf %57, %59 : vector<16x4xf32>
    %61 = arith.truncf %60 : vector<16x4xf32> to vector<16x4xbf16>
    %c0_31 = arith.constant 0 : index
    %c8_32 = arith.constant 8 : index
    %62 = vector.load %arg11[%c0_31, %c8_32] : memref<16x32xbf16, #tpu.memory_space<vmem>>, vector<16x4xbf16>
    tpu.vector_store %arg11[%c0_31, %c8_32], %61 {strides = array<i32>} : memref<16x32xbf16, #tpu.memory_space<vmem>>, vector<16x4xbf16>,
    %63 = vector.extract_strided_slice %8 {offsets = [0, 12], sizes = [16, 4], strides = [1, 1]} : vector<16x32xbf16> to vector<16x4xbf16>
    %c0_33 = arith.constant 0 : index
    %c12 = arith.constant 12 : index
    %64 = vector.load %arg9[%c0_33, %c12] : memref<16x32xbf16, #tpu.memory_space<vmem>>, vector<16x4xbf16>
    %c0_34 = arith.constant 0 : index
    %c12_35 = arith.constant 12 : index
    %65 = vector.load %arg10[%c0_34, %c12_35] : memref<16x32xbf16, #tpu.memory_space<vmem>>, vector<16x4xbf16>
    %cst_36 = arith.constant dense<0.000000e+00> : vector<16x16xf32>
    %66 = tpu.matmul %63, %64, %cst_36 {dimension_numbers = #tpu.dot_dimension_numbers<[1], [1], [0], [0], [0, 0, 1, 0], [], []>} : vector<16x4xbf16>, vector<16x4xbf16>, vector<16x16xf32> -> vector<16x16xf32>
    %cst_37 = arith.constant dense<0xFF800000> : vector<16xf32>
    %67 = vector.multi_reduction <maximumf>, %66, %cst_37 [1] : vector<16x16xf32> to vector<16xf32>
    %68 = vector.shape_cast %67 : vector<16xf32> to vector<16x1xf32>
    %69 = vector.broadcast %68 : vector<16x1xf32> to vector<16x16xf32>
    %70 = arith.subf %66, %69 : vector<16x16xf32>
    %71 = math.exp %70 : vector<16x16xf32>
    %cst_38 = arith.constant dense<0.000000e+00> : vector<16xf32>
    %72 = vector.multi_reduction <add>, %71, %cst_38 [1] : vector<16x16xf32> to vector<16xf32>
    %73 = vector.shape_cast %72 : vector<16xf32> to vector<16x1xf32>
    %74 = arith.truncf %71 : vector<16x16xf32> to vector<16x16xbf16>
    %cst_39 = arith.constant dense<0.000000e+00> : vector<16x4xf32>
    %75 = tpu.matmul %74, %65, %cst_39 {dimension_numbers = #tpu.dot_dimension_numbers<[1], [0], [0], [1], [0, 0, 1, 1], [], []>} : vector<16x16xbf16>, vector<16x4xbf16>, vector<16x4xf32> -> vector<16x4xf32>
    %76 = tpu.reciprocal %73 {approx = true} : vector<16x1xf32> -> vector<16x1xf32>
    %77 = vector.broadcast %76 : vector<16x1xf32> to vector<16x4xf32>
    %78 = arith.mulf %75, %77 : vector<16x4xf32>
    %79 = arith.truncf %78 : vector<16x4xf32> to vector<16x4xbf16>
    %c0_40 = arith.constant 0 : index
    %c12_41 = arith.constant 12 : index
    %80 = vector.load %arg11[%c0_40, %c12_41] : memref<16x32xbf16, #tpu.memory_space<vmem>>, vector<16x4xbf16>
    tpu.vector_store %arg11[%c0_40, %c12_41], %79 {strides = array<i32>} : memref<16x32xbf16, #tpu.memory_space<vmem>>, vector<16x4xbf16>,
    %81 = vector.extract_strided_slice %8 {offsets = [0, 16], sizes = [16, 4], strides = [1, 1]} : vector<16x32xbf16> to vector<16x4xbf16>
    %c0_42 = arith.constant 0 : index
    %c16 = arith.constant 16 : index
    %82 = vector.load %arg9[%c0_42, %c16] : memref<16x32xbf16, #tpu.memory_space<vmem>>, vector<16x4xbf16>
    %c0_43 = arith.constant 0 : index
    %c16_44 = arith.constant 16 : index
    %83 = vector.load %arg10[%c0_43, %c16_44] : memref<16x32xbf16, #tpu.memory_space<vmem>>, vector<16x4xbf16>
    %cst_45 = arith.constant dense<0.000000e+00> : vector<16x16xf32>
    %84 = tpu.matmul %81, %82, %cst_45 {dimension_numbers = #tpu.dot_dimension_numbers<[1], [1], [0], [0], [0, 0, 1, 0], [], []>} : vector<16x4xbf16>, vector<16x4xbf16>, vector<16x16xf32> -> vector<16x16xf32>
    %cst_46 = arith.constant dense<0xFF800000> : vector<16xf32>
    %85 = vector.multi_reduction <maximumf>, %84, %cst_46 [1] : vector<16x16xf32> to vector<16xf32>
    %86 = vector.shape_cast %85 : vector<16xf32> to vector<16x1xf32>
    %87 = vector.broadcast %86 : vector<16x1xf32> to vector<16x16xf32>
    %88 = arith.subf %84, %87 : vector<16x16xf32>
    %89 = math.exp %88 : vector<16x16xf32>
    %cst_47 = arith.constant dense<0.000000e+00> : vector<16xf32>
    %90 = vector.multi_reduction <add>, %89, %cst_47 [1] : vector<16x16xf32> to vector<16xf32>
    %91 = vector.shape_cast %90 : vector<16xf32> to vector<16x1xf32>
    %92 = arith.truncf %89 : vector<16x16xf32> to vector<16x16xbf16>
    %cst_48 = arith.constant dense<0.000000e+00> : vector<16x4xf32>
    %93 = tpu.matmul %92, %83, %cst_48 {dimension_numbers = #tpu.dot_dimension_numbers<[1], [0], [0], [1], [0, 0, 1, 1], [], []>} : vector<16x16xbf16>, vector<16x4xbf16>, vector<16x4xf32> -> vector<16x4xf32>
    %94 = tpu.reciprocal %91 {approx = true} : vector<16x1xf32> -> vector<16x1xf32>
    %95 = vector.broadcast %94 : vector<16x1xf32> to vector<16x4xf32>
    %96 = arith.mulf %93, %95 : vector<16x4xf32>
    %97 = arith.truncf %96 : vector<16x4xf32> to vector<16x4xbf16>
    %c0_49 = arith.constant 0 : index
    %c16_50 = arith.constant 16 : index
    %98 = vector.load %arg11[%c0_49, %c16_50] : memref<16x32xbf16, #tpu.memory_space<vmem>>, vector<16x4xbf16>
    tpu.vector_store %arg11[%c0_49, %c16_50], %97 {strides = array<i32>} : memref<16x32xbf16, #tpu.memory_space<vmem>>, vector<16x4xbf16>,
    %99 = vector.extract_strided_slice %8 {offsets = [0, 20], sizes = [16, 4], strides = [1, 1]} : vector<16x32xbf16> to vector<16x4xbf16>
    %c0_51 = arith.constant 0 : index
    %c20 = arith.constant 20 : index
    %100 = vector.load %arg9[%c0_51, %c20] : memref<16x32xbf16, #tpu.memory_space<vmem>>, vector<16x4xbf16>
    %c0_52 = arith.constant 0 : index
    %c20_53 = arith.constant 20 : index
    %101 = vector.load %arg10[%c0_52, %c20_53] : memref<16x32xbf16, #tpu.memory_space<vmem>>, vector<16x4xbf16>
    %cst_54 = arith.constant dense<0.000000e+00> : vector<16x16xf32>
    %102 = tpu.matmul %99, %100, %cst_54 {dimension_numbers = #tpu.dot_dimension_numbers<[1], [1], [0], [0], [0, 0, 1, 0], [], []>} : vector<16x4xbf16>, vector<16x4xbf16>, vector<16x16xf32> -> vector<16x16xf32>
    %cst_55 = arith.constant dense<0xFF800000> : vector<16xf32>
    %103 = vector.multi_reduction <maximumf>, %102, %cst_55 [1] : vector<16x16xf32> to vector<16xf32>
    %104 = vector.shape_cast %103 : vector<16xf32> to vector<16x1xf32>
    %105 = vector.broadcast %104 : vector<16x1xf32> to vector<16x16xf32>
    %106 = arith.subf %102, %105 : vector<16x16xf32>
    %107 = math.exp %106 : vector<16x16xf32>
    %cst_56 = arith.constant dense<0.000000e+00> : vector<16xf32>
    %108 = vector.multi_reduction <add>, %107, %cst_56 [1] : vector<16x16xf32> to vector<16xf32>
    %109 = vector.shape_cast %108 : vector<16xf32> to vector<16x1xf32>
    %110 = arith.truncf %107 : vector<16x16xf32> to vector<16x16xbf16>
    %cst_57 = arith.constant dense<0.000000e+00> : vector<16x4xf32>
    %111 = tpu.matmul %110, %101, %cst_57 {dimension_numbers = #tpu.dot_dimension_numbers<[1], [0], [0], [1], [0, 0, 1, 1], [], []>} : vector<16x16xbf16>, vector<16x4xbf16>, vector<16x4xf32> -> vector<16x4xf32>
    %112 = tpu.reciprocal %109 {approx = true} : vector<16x1xf32> -> vector<16x1xf32>
    %113 = vector.broadcast %112 : vector<16x1xf32> to vector<16x4xf32>
    %114 = arith.mulf %111, %113 : vector<16x4xf32>
    %115 = arith.truncf %114 : vector<16x4xf32> to vector<16x4xbf16>
    %c0_58 = arith.constant 0 : index
    %c20_59 = arith.constant 20 : index
    %116 = vector.load %arg11[%c0_58, %c20_59] : memref<16x32xbf16, #tpu.memory_space<vmem>>, vector<16x4xbf16>
    tpu.vector_store %arg11[%c0_58, %c20_59], %115 {strides = array<i32>} : memref<16x32xbf16, #tpu.memory_space<vmem>>, vector<16x4xbf16>,
    %117 = vector.extract_strided_slice %8 {offsets = [0, 24], sizes = [16, 4], strides = [1, 1]} : vector<16x32xbf16> to vector<16x4xbf16>
    %c0_60 = arith.constant 0 : index
    %c24 = arith.constant 24 : index
    %118 = vector.load %arg9[%c0_60, %c24] : memref<16x32xbf16, #tpu.memory_space<vmem>>, vector<16x4xbf16>
    %c0_61 = arith.constant 0 : index
    %c24_62 = arith.constant 24 : index
    %119 = vector.load %arg10[%c0_61, %c24_62] : memref<16x32xbf16, #tpu.memory_space<vmem>>, vector<16x4xbf16>
    %cst_63 = arith.constant dense<0.000000e+00> : vector<16x16xf32>
    %120 = tpu.matmul %117, %118, %cst_63 {dimension_numbers = #tpu.dot_dimension_numbers<[1], [1], [0], [0], [0, 0, 1, 0], [], []>} : vector<16x4xbf16>, vector<16x4xbf16>, vector<16x16xf32> -> vector<16x16xf32>
    %cst_64 = arith.constant dense<0xFF800000> : vector<16xf32>
    %121 = vector.multi_reduction <maximumf>, %120, %cst_64 [1] : vector<16x16xf32> to vector<16xf32>
    %122 = vector.shape_cast %121 : vector<16xf32> to vector<16x1xf32>
    %123 = vector.broadcast %122 : vector<16x1xf32> to vector<16x16xf32>
    %124 = arith.subf %120, %123 : vector<16x16xf32>
    %125 = math.exp %124 : vector<16x16xf32>
    %cst_65 = arith.constant dense<0.000000e+00> : vector<16xf32>
    %126 = vector.multi_reduction <add>, %125, %cst_65 [1] : vector<16x16xf32> to vector<16xf32>
    %127 = vector.shape_cast %126 : vector<16xf32> to vector<16x1xf32>
    %128 = arith.truncf %125 : vector<16x16xf32> to vector<16x16xbf16>
    %cst_66 = arith.constant dense<0.000000e+00> : vector<16x4xf32>
    %129 = tpu.matmul %128, %119, %cst_66 {dimension_numbers = #tpu.dot_dimension_numbers<[1], [0], [0], [1], [0, 0, 1, 1], [], []>} : vector<16x16xbf16>, vector<16x4xbf16>, vector<16x4xf32> -> vector<16x4xf32>
    %130 = tpu.reciprocal %127 {approx = true} : vector<16x1xf32> -> vector<16x1xf32>
    %131 = vector.broadcast %130 : vector<16x1xf32> to vector<16x4xf32>
    %132 = arith.mulf %129, %131 : vector<16x4xf32>
    %133 = arith.truncf %132 : vector<16x4xf32> to vector<16x4xbf16>
    %c0_67 = arith.constant 0 : index
    %c24_68 = arith.constant 24 : index
    %134 = vector.load %arg11[%c0_67, %c24_68] : memref<16x32xbf16, #tpu.memory_space<vmem>>, vector<16x4xbf16>
    tpu.vector_store %arg11[%c0_67, %c24_68], %133 {strides = array<i32>} : memref<16x32xbf16, #tpu.memory_space<vmem>>, vector<16x4xbf16>,
    %135 = vector.extract_strided_slice %8 {offsets = [0, 28], sizes = [16, 4], strides = [1, 1]} : vector<16x32xbf16> to vector<16x4xbf16>
    %c0_69 = arith.constant 0 : index
    %c28 = arith.constant 28 : index
    %136 = vector.load %arg9[%c0_69, %c28] : memref<16x32xbf16, #tpu.memory_space<vmem>>, vector<16x4xbf16>
    %c0_70 = arith.constant 0 : index
    %c28_71 = arith.constant 28 : index
    %137 = vector.load %arg10[%c0_70, %c28_71] : memref<16x32xbf16, #tpu.memory_space<vmem>>, vector<16x4xbf16>
    %cst_72 = arith.constant dense<0.000000e+00> : vector<16x16xf32>
    %138 = tpu.matmul %135, %136, %cst_72 {dimension_numbers = #tpu.dot_dimension_numbers<[1], [1], [0], [0], [0, 0, 1, 0], [], []>} : vector<16x4xbf16>, vector<16x4xbf16>, vector<16x16xf32> -> vector<16x16xf32>
    %cst_73 = arith.constant dense<0xFF800000> : vector<16xf32>
    %139 = vector.multi_reduction <maximumf>, %138, %cst_73 [1] : vector<16x16xf32> to vector<16xf32>
    %140 = vector.shape_cast %139 : vector<16xf32> to vector<16x1xf32>
    %141 = vector.broadcast %140 : vector<16x1xf32> to vector<16x16xf32>
    %142 = arith.subf %138, %141 : vector<16x16xf32>
    %143 = math.exp %142 : vector<16x16xf32>
    %cst_74 = arith.constant dense<0.000000e+00> : vector<16xf32>
    %144 = vector.multi_reduction <add>, %143, %cst_74 [1] : vector<16x16xf32> to vector<16xf32>
    %145 = vector.shape_cast %144 : vector<16xf32> to vector<16x1xf32>
    %146 = arith.truncf %143 : vector<16x16xf32> to vector<16x16xbf16>
    %cst_75 = arith.constant dense<0.000000e+00> : vector<16x4xf32>
    %147 = tpu.matmul %146, %137, %cst_75 {dimension_numbers = #tpu.dot_dimension_numbers<[1], [0], [0], [1], [0, 0, 1, 1], [], []>} : vector<16x16xbf16>, vector<16x4xbf16>, vector<16x4xf32> -> vector<16x4xf32>
    %148 = tpu.reciprocal %145 {approx = true} : vector<16x1xf32> -> vector<16x1xf32>
    %149 = vector.broadcast %148 : vector<16x1xf32> to vector<16x4xf32>
    %150 = arith.mulf %147, %149 : vector<16x4xf32>
    %151 = arith.truncf %150 : vector<16x4xf32> to vector<16x4xbf16>
    %c0_76 = arith.constant 0 : index
    %c28_77 = arith.constant 28 : index
    %152 = vector.load %arg11[%c0_76, %c28_77] : memref<16x32xbf16, #tpu.memory_space<vmem>>, vector<16x4xbf16>
    tpu.vector_store %arg11[%c0_76, %c28_77], %151 {strides = array<i32>} : memref<16x32xbf16, #tpu.memory_space<vmem>>, vector<16x4xbf16>,
    %c0_78 = arith.constant 0 : index
    %c0_79 = arith.constant 0 : index
    %153 = vector.load %arg11[%c0_78, %c0_79] : memref<16x32xbf16, #tpu.memory_space<vmem>>, vector<16x32xbf16>
    %c0_80 = arith.constant 0 : index
    %c0_81 = arith.constant 0 : index
    %154 = vector.load %arg6[%c0_80, %c0_81] : memref<32x32xbf16, #tpu.memory_space<vmem>>, vector<32x32xbf16>
    %cst_82 = arith.constant dense<0.000000e+00> : vector<16x32xf32>
    %155 = tpu.matmul %153, %154, %cst_82 {dimension_numbers = #tpu.dot_dimension_numbers<[1], [0], [0], [1], [0, 0, 1, 1], [], []>} : vector<16x32xbf16>, vector<32x32xbf16>, vector<16x32xf32> -> vector<16x32xf32>
    %c0_83 = arith.constant 0 : index
    %c0_84 = arith.constant 0 : index
    %156 = vector.load %arg7[%c0_83, %c0_84] : memref<1x32xf32, #tpu.memory_space<vmem>>, vector<1x32xf32>
    %157 = vector.broadcast %156 : vector<1x32xf32> to vector<16x32xf32>
    %158 = arith.addf %155, %157 : vector<16x32xf32>
    %c0_85 = arith.constant 0 : index
    %c0_86 = arith.constant 0 : index
    %c0_87 = arith.constant 0 : index
    %159 = vector.load %arg8[%c0_85, %c0_86, %c0_87] : memref<1x16x32xf32, #tpu.memory_space<vmem>>, vector<1x16x32xf32>
    %160 = vector.shape_cast %159 : vector<1x16x32xf32> to vector<16x32xf32>
    %161 = vector.shape_cast %158 : vector<16x32xf32> to vector<1x16x32xf32>
    tpu.vector_store %arg8[%c0_85, %c0_86, %c0_87], %161 {strides = array<i32>} : memref<1x16x32xf32, #tpu.memory_space<vmem>>, vector<1x16x32xf32>,
    return
  }
  func.func @transform_0(%arg0: i32, %arg1: i32) -> (i32, i32, i32) {
    %c0_i32 = arith.constant 0 : i32
    %c0_i32_0 = arith.constant 0 : i32
    %c0_i32_1 = arith.constant 0 : i32
    return %arg0, %c0_i32, %c0_i32_0 : i32, i32, i32
  }
  func.func @transform_1(%arg0: i32, %arg1: i32) -> (i32, i32) {
    %c0_i32 = arith.constant 0 : i32
    %c0_i32_0 = arith.constant 0 : i32
    %c0_i32_1 = arith.constant 0 : i32
    return %c0_i32, %c0_i32_0 : i32, i32
  }
  func.func @transform_2(%arg0: i32, %arg1: i32) -> (i32, i32) {
    %c0_i32 = arith.constant 0 : i32
    %c0_i32_0 = arith.constant 0 : i32
    %c0_i32_1 = arith.constant 0 : i32
    return %c0_i32, %c0_i32_0 : i32, i32
  }
  func.func @transform_3(%arg0: i32, %arg1: i32) -> (i32, i32) {
    %c0_i32 = arith.constant 0 : i32
    %c0_i32_0 = arith.constant 0 : i32
    %c0_i32_1 = arith.constant 0 : i32
    return %c0_i32, %c0_i32_0 : i32, i32
  }
  func.func @transform_4(%arg0: i32, %arg1: i32) -> (i32, i32) {
    %c0_i32 = arith.constant 0 : i32
    %c0_i32_0 = arith.constant 0 : i32
    %c0_i32_1 = arith.constant 0 : i32
    return %c0_i32, %c0_i32_0 : i32, i32
  }
  func.func @transform_5(%arg0: i32, %arg1: i32) -> (i32, i32) {
    %c0_i32 = arith.constant 0 : i32
    %c0_i32_0 = arith.constant 0 : i32
    %c0_i32_1 = arith.constant 0 : i32
    return %c0_i32, %c0_i32_0 : i32, i32
  }
  func.func @transform_6(%arg0: i32, %arg1: i32) -> (i32, i32, i32) {
    %c0_i32 = arith.constant 0 : i32
    %c0_i32_0 = arith.constant 0 : i32
    return %arg0, %arg1, %c0_i32 : i32, i32, i32
  }
}

</mosaic_0001>

<bundles_post_ra>
// kernel: tpu_custom_call.1
= control target key start
LH: loop header
LB: loop body
LE: loop exit
PB: predicated region body
PF: predicated region fallthrough
CT: control target
= control target key end

     0   :  { %s3073_s0 = inlined_call_operand.hbm [shape: f32[2,16,32], index: 0, kind: input, shape index: {}]   ;;  %s3074_s1 = inlined_call_operand.hbm [shape: bf16[32,32], index: 1, kind: input, shape index: {}]   ;;  %s3075_s2 = inlined_call_operand.hbm [shape: bf16[32,32], index: 2, kind: input, shape index: {}]   ;;  %s3076_s3 = inlined_call_operand.hbm [shape: bf16[32,32], index: 3, kind: input, shape index: {}]   ;;  %s3077_s4 = inlined_call_operand.hbm [shape: bf16[32,32], index: 4, kind: input, shape index: {}]   ;;  %s3078_s5 = inlined_call_operand.vmem [shape: f32[1,32], index: 5, kind: input, shape index: {}]   ;;  %s3079_s6 = inlined_call_operand.hbm [shape: f32[2,16,32], index: 6, kind: output, shape index: {}]  }
   0x1   :  { %3087 = sst [smem:[#allocation21_spill]] %s3079_s6 }
   0x2   :  { %11 = vsyncpa [#allocation6], 0 }
   0x3   :  { %13 = vsyncpa [#allocation6 + $0x1], 0 }
   0x4   :  { %14 = vsyncpa [#allocation9], 0 }
   0x5   :  { %15 = vsyncpa [#allocation12], 0 }
   0x6   :  { %16 = vsyncpa [#allocation7], 0 }
   0x7   :  { %18 = vsyncpa [#allocation7 + $0x1], 0  ;;  %s2509_s21 = smov 0   ;;  %s2511_s22 = smov 0  }
   0x8   :  { %s2513_s23 = smov 0   ;;  %s2515_s24 = smov 0  }
   0x9   :  { %s2517_s25 = smov 0   ;;  %s2519_s26 = smov 0  }
   0xa LB: > { %3088 = sst [smem:[#allocation19_spill]] %s2425_s21  ;;  %s1791_s27 = sadd.s32 4294967295, %s2445_s26   ;;  %s2445_s26 = sphi %s2519_s26, %s24_s26   ;;  %s2441_s25 = sphi %s2517_s25, %s3112_s25   ;;  %s2437_s24 = sphi %s2515_s24, %s3111_s24   ;;  %s2433_s23 = sphi %s2513_s23, %s3110_s23   ;;  %s2429_s22 = sphi %s2511_s22, %s3109_s22   ;;  %s2425_s21 = sphi %s2509_s21, %s3108_s21  }
   0xb   : > { %s1792_s28 = sadd.s32 4294967294, %s2445_s26   ;;  %p56_p0 = scmp.ne.s32.totalorder %s2429_s22, %s2425_s21 }
   0xc   : > { %p2543_p1 = scmp.eq.s32.totalorder %s1791_s27, 0  ;;  %p2547_p2 = scmp.eq.s32.totalorder %s1791_s27, 1 }
   0xd   : > { %p193_p3 = scmp.eq.s32.totalorder %s1792_s28, 1  ;;  %p1793_p5 = scmp.ge.s32.totalorder %s2445_s26, 1 }
   0xe   : > { %s3089_s29 = scalar_select %p2543_p1, 1, 0 }
   0xf   : > { %s3090_s30 = scalar_select %p2547_p2, 1, 0 }
  0x10   : > { %p2553_p4 = por %p2543_p1, %p56_p0  ;;  %p2558_p6 = por %p193_p3, %p56_p0 }
  0x11   : > { %p200_p7 = scmp.lt.s32.totalorder %s2445_s26, 3  ;;  %s2447_s10 = smov [#allocation8]  }
  0x12   : > { %s3091_s7 = scalar_select %p2553_p4, 1, 0 }
  0x13   : > { %s3092_s8 = scalar_select %p2558_p6, 1, 0 }
  0x14   : > { %p2563_p8 = pnand %p1793_p5, %p200_p7  ;;  %s212_s11 = sshll.u32 %s2447_s10, 4  ;;  %s2567_s11 = int_to_ptr.vmem [resolvable:$true] %s212_s11 }
  0x15   : > { %3093 = sst [smem:[#allocation20_spill]] %s3092_s8  ;;  %s2448_s13 = smov [#allocation11]  }
  0x16   : > { %s3094_s9 = scalar_select %p2563_p8, 1, 0 }
  0x17   : > { %p2037_p9 = pneg %p2563_p8  ;;  %s238_s14 = sshll.u32 %s2448_s13, 4  ;;  %s2578_s14 = int_to_ptr.vmem [resolvable:$true] %s238_s14 }
  0x18   : > { %s2449_s15 = smov [#allocation10]   ;;  %s2213_s19 = scalar_lea.hbm %s3074_s1, 256 }
  0x19   : > { %p2574_p11 = pnand %p2037_p9, %p2543_p1  ;;  %s2580_s16 = sshll.u32 %s2449_s15, 4  ;;  %s226_s16 = int_to_ptr.vmem [resolvable:$true] %s2580_s16 }
  0x1a   : > { %p2214_p12 = scmp.ne.s32.totalorder %s3074_s1, %s2213_s19  ;;  %p2220_p5 = scmp.lt.u32.totalorder %s2213_s19, %s3074_s1 }
  0x1b   : > { %p2590_p13 = pneg %p2574_p11 }
  0x1d   : > { %p2216_p0 = pnand %p2590_p13, %p2214_p12 }
  0x1f   : > { %p2217_p3 = pneg %p2216_p0 }
  0x21   : > { %p2222_p7 = pnand %p2220_p5, %p2217_p3 }
  0x23   : > { %2225 = shalt.err (!%p2222_p7)
}
  0x24   : > { %s2226_s15 = scalar_lea.vmem %s2567_s11, 256  ;;  %p2234_p1 = scmp.lt.s32.totalorder %s2567_s11, %s2567_s11 }
  0x25   : > { %p2227_p9 = scmp.ne.s32.totalorder %s2567_s11, %s2226_s15  ;;  %p2235_p4 = scmp.lt.s32.totalorder %s2226_s15, %s2226_s15 }
  0x27   : > { %p2229_p10 = pnand %p2227_p9, %p2590_p13  ;;  %p2236_p12 = por %p2235_p4, %p2234_p1 }
  0x29   : > { %p2230_p6 = pneg %p2229_p10 }
  0x2b   : > { %p2237_p0 = pnand %p2236_p12, %p2230_p6 }
  0x2d   : > { %2240 = shalt.err (!%p2237_p0)
}
  0x2e   : > { %s2450_s17 = smov 64   ;;  %s2451_s18 = smov 4  }
  0x2f   : > { %2040 = dma.hbm_to_vmem [thread:$0]  (!%p2574_p11), %s3074_s1, 256, %s2567_s11, [#allocation9], %s2450_s17, %s2450_s17, %s2451_s18  }
  0x30   : > { %s2241_s13 = scalar_lea.hbm %s3076_s3, 256 }
  0x31   : > { %p2242_p1 = scmp.ne.s32.totalorder %s3076_s3, %s2241_s13  ;;  %p2248_p10 = scmp.lt.u32.totalorder %s2241_s13, %s3076_s3 }
  0x33   : > { %p2244_p4 = pnand %p2242_p1, %p2590_p13 }
  0x35   : > { %p2245_p6 = pneg %p2244_p4 }
  0x37   : > { %p2250_p3 = pnand %p2248_p10, %p2245_p6 }
  0x39   : > { %2253 = shalt.err (!%p2250_p3)
}
  0x3a   : > { %s2254_s11 = scalar_lea.vmem %s2578_s14, 256  ;;  %p2262_p12 = scmp.lt.s32.totalorder %s2578_s14, %s2578_s14 }
  0x3b   : > { %p2255_p5 = scmp.ne.s32.totalorder %s2578_s14, %s2254_s11  ;;  %p2263_p0 = scmp.lt.s32.totalorder %s2254_s11, %s2254_s11 }
  0x3d   : > { %p2257_p7 = pnand %p2255_p5, %p2590_p13  ;;  %p2264_p1 = por %p2263_p0, %p2262_p12 }
  0x3f   : > { %p2258_p9 = pneg %p2257_p7 }
  0x41   : > { %p2265_p4 = pnand %p2264_p1, %p2258_p9 }
  0x43   : > { %2268 = shalt.err (!%p2265_p4)
}
  0x44   : > { %2046 = dma.hbm_to_vmem [thread:$0]  (!%p2574_p11), %s3076_s3, 256, %s2578_s14, [#allocation12], %s2450_s17, %s2450_s17, %s2451_s18  }
  0x45   : > { %s2269_s20 = scalar_lea.hbm %s3075_s2, 256 }
  0x46   : > { %p2270_p6 = scmp.ne.s32.totalorder %s3075_s2, %s2269_s20  ;;  %p2276_p5 = scmp.lt.u32.totalorder %s2269_s20, %s3075_s2 }
  0x48   : > { %p2272_p10 = pnand %p2270_p6, %p2590_p13 }
  0x4a   : > { %p2273_p3 = pneg %p2272_p10 }
  0x4c   : > { %p2278_p7 = pnand %p2276_p5, %p2273_p3 }
  0x4e   : > { %2281 = shalt.err (!%p2278_p7)
}
  0x4f   : > { %s2282_s11 = scalar_lea.vmem %s226_s16, 256  ;;  %p2290_p1 = scmp.lt.s32.totalorder %s226_s16, %s226_s16 }
  0x50   : > { %p2283_p9 = scmp.ne.s32.totalorder %s226_s16, %s2282_s11  ;;  %p2291_p4 = scmp.lt.s32.totalorder %s2282_s11, %s2282_s11 }
  0x52   : > { %p2285_p12 = pnand %p2283_p9, %p2590_p13  ;;  %p2292_p8 = por %p2291_p4, %p2290_p1 }
  0x54   : > { %p2286_p0 = pneg %p2285_p12 }
  0x56   : > { %p2293_p2 = pnand %p2292_p8, %p2286_p0 }
  0x58   : > { %2296 = shalt.err (!%p2293_p2)
}
  0x59   : > { %2043 = dma.hbm_to_vmem [thread:$0]  (!%p2574_p11), %s3075_s2, 256, %s226_s16, [#allocation9], %s2450_s17, %s2450_s17, %s2451_s18  }
  0x5a   : > { %s2452_s21 = smov [#allocation13]   ;;  %s2297_s27 = scalar_lea.hbm %s3077_s4, 256 }
  0x5b   : > { %s251_s8 = sshll.u32 %s2452_s21, 4  ;;  %p2298_p2 = scmp.ne.s32.totalorder %s3077_s4, %s2297_s27  ;;  %s252_s8 = int_to_ptr.vmem [resolvable:$true] %s251_s8 }
  0x5c   : > { %p2304_p10 = scmp.lt.u32.totalorder %s2297_s27, %s3077_s4 }
  0x5d   : > { %p2300_p8 = pnand %p2298_p2, %p2590_p13 }
  0x5f   : > { %p2301_p6 = pneg %p2300_p8 }
  0x61   : > { %p2306_p3 = pnand %p2304_p10, %p2301_p6 }
  0x63   : > { %2309 = shalt.err (!%p2306_p3)
}
  0x64   : > { %s2310_s16 = scalar_lea.vmem %s252_s8, 256  ;;  %p2318_p12 = scmp.lt.s32.totalorder %s252_s8, %s252_s8 }
  0x65   : > { %p2311_p5 = scmp.ne.s32.totalorder %s252_s8, %s2310_s16  ;;  %p2319_p0 = scmp.lt.s32.totalorder %s2310_s16, %s2310_s16 }
  0x67   : > { %p2313_p7 = pnand %p2311_p5, %p2590_p13  ;;  %p2320_p1 = por %p2319_p0, %p2318_p12 }
  0x69   : > { %p2314_p9 = pneg %p2313_p7 }
  0x6b   : > { %p2321_p4 = pnand %p2320_p1, %p2314_p9 }
  0x6d   : > { %2324 = shalt.err (!%p2321_p4)
}
  0x6e   : > { %2049 = dma.hbm_to_vmem [thread:$0]  (!%p2574_p11), %s3077_s4, 256, %s252_s8, [#allocation12], %s2450_s17, %s2450_s17, %s2451_s18  }
  0x6f   : > { %s36_s28 = sadd.s32 1, %s2441_s25  ;;  %s43_s12 = sadd.s32 1, %s2433_s23 }
  0x70   : > { %p38_p13 = scmp.ge.s32.totalorder %s36_s28, 2  ;;  %p50_p2 = scmp.ne.s32.totalorder %s2433_s23, %s2429_s22 }
  0x71   : > { %p51_p8 = scmp.eq.s32.totalorder %s2445_s26, 0  ;;  %p2062_p6 = scmp.lt.s32.totalorder %s2445_s26, 2 }
  0x72   : > { %s3114_s28 = smov (%p38_p13, %s36_s28), 0  ;;  %p3097_p3 = scmp.ne.s32.totalorder %s3090_s30, 0 }
  0x73   : > { %p52_p10 = por %p51_p8, %p50_p2  ;;  %s40_s19 = ssub.s32 %s2441_s25, %s3114_s28 }
  0x74   : > { %p2693_p5 = por %p3097_p3, %p50_p2  ;;  %s268_s20 = sand.u32 1, %s2433_s23  }
  0x75   : > { %p41_p7 = scmp.eq.s32.totalorder %s40_s19, 0  ;;  %s1799_s17 = sshll.u32 %s268_s20, 4 }
  0x76   : > { %s1843_s18 = sshll.u32 %s2441_s25, 8  ;;  %s272_s30 = scalar_lea.vmem [#allocation5], %s1799_s17 }
  0x77   : > { %s2702_s8 = scalar_select %p41_p7, %s2433_s23, %s43_s12  }
  0x78   : > { %s2707_s13 = scalar_lea.hbm %s3073_s0, %s1843_s18  ;;  %s279_s15 = sshll.u32 %s272_s30, 4  ;;  %s2715_s15 = int_to_ptr.vmem [resolvable:$true] %s279_s15 }
  0x79   : > { %p2711_p11 = pnand %p2062_p6, %p52_p10  ;;  %s2717_s16 = scalar_lea.sflag [#allocation6], %s268_s20 }
  0x7a   : > { %s2325_s14 = scalar_lea.hbm %s2707_s13, 256  ;;  %s2330_s19 = scalar_lea.hbm %s3073_s0, 512 }
  0x7b   : > { %p2326_p9 = scmp.ne.s32.totalorder %s2707_s13, %s2325_s14  ;;  %p2327_p12 = pneg %p2711_p11 }
  0x7c   : > { %p2331_p4 = scmp.lt.u32.totalorder %s2707_s13, %s3073_s0  ;;  %p2332_p13 = scmp.lt.u32.totalorder %s2330_s19, %s2325_s14 }
  0x7d   : > { %p2328_p0 = pnand %p2327_p12, %p2326_p9  ;;  %p2334_p8 = scmp.lt.u32.totalorder %s2325_s14, %s2707_s13 }
  0x7e   : > { %p2333_p2 = por %p2332_p13, %p2331_p4 }
  0x7f   : > { %p2329_p1 = pneg %p2328_p0 }
  0x80   : > { %p2335_p6 = por %p2334_p8, %p2333_p2 }
  0x82   : > { %p2336_p10 = pnand %p2335_p6, %p2329_p1 }
  0x84   : > { %2339 = shalt.err (!%p2336_p10)
}
  0x85   : > { %s2340_s20 = scalar_lea.vmem %s2715_s15, 256  ;;  %s2453_s27 = smov [#allocation5]  }
  0x86   : > { %p2341_p3 = scmp.ne.s32.totalorder %s2715_s15, %s2340_s20  ;;  %s2345_s10 = sshll.u32 %s2453_s27, 4  ;;  %s2346_s10 = int_to_ptr.vmem [resolvable:$false] %s2345_s10 }
  0x87   : > { %s2347_s30 = scalar_lea.vmem %s2346_s10, 512  ;;  %p2348_p0 = scmp.lt.s32.totalorder %s2715_s15, %s2346_s10 }
  0x88   : > { %p2343_p7 = pnand %p2341_p3, %p2327_p12  ;;  %p2349_p4 = scmp.lt.s32.totalorder %s2347_s30, %s2340_s20 }
  0x8a   : > { %p2344_p9 = pneg %p2343_p7  ;;  %p2350_p13 = por %p2349_p4, %p2348_p0 }
  0x8c   : > { %p2351_p2 = pnand %p2350_p13, %p2344_p9 }
  0x8e   : > { %2354 = shalt.err (!%p2351_p2)
}
  0x8f   : > { %s2454_s14 = smov 128   ;;  %s2455_s6 = smov 8  }
  0x90   : > { %2053 = dma.hbm_to_vmem [thread:$0]  (!%p2711_p11), %s2707_s13, 256, %s2715_s15, %s2717_s16, %s2454_s14, %s2454_s14, %s2455_s6  }
  0x91   : > { %p3100_p12 = scmp.ne.s32.totalorder %s3094_s9, 0 }
  0x92   : > { %s2748_s12 = sand.u32 (!%p3100_p12), 1, %s2429_s22   ;;  %p3101_p1 = scmp.ne.s32.totalorder (!%p3100_p12), %s3091_s7, 0 }
  0x93   : > { %291 = sbr.rel (%p3100_p12) target bundleno = 1546 (0x60a), region = 44  ;;  %s1803_s19 = sshll.u32 (!%p3100_p12), %s2748_s12, 4 }
  0x94   : > { %s294_s17 = scalar_lea.sflag (!%p3100_p12), [#allocation6], %s2748_s12  ;;  %s297_s18 = scalar_lea.vmem (!%p3100_p12), [#allocation5], %s1803_s19 }
  0x9a   : > { %2408 = dma.done.wait (%p3101_p1), %s294_s17, 256  }
  0x9b   : > { %2410 = vsyncadd (%p3101_p1), %s294_s17, 4294967040  ;;  %p3102_p11 = scmp.ne.s32.totalorder %s3089_s29, 0 }
  0x9d   : > { %2412 = dma.done.wait (%p3102_p11), [#allocation9], 512  }
  0x9e   : > { %2414 = vsyncadd (%p3102_p11), [#allocation9], 4294966784 }
  0x9f   : > { %2416 = dma.done.wait (%p3102_p11), [#allocation12], 512  }
  0xa0   : > { %2418 = vsyncadd (%p3102_p11), [#allocation12], 4294966784  ;;  %v2456_v0 = vmov 0.0   ;;  %vm2457_vm0 = vmmov 0   ;;  %v2141_v1 = vld [vmem:[#allocation10] sm:$0xff]   ;;  %v2142_v2 = vld [vmem:[#allocation10 + $0x8] sm:$0xff]  }
  0xa1   : > { %1889 = vmatprep.subr.bf16.mxu0 %v2456_v0  ;;  %1893 = vmatprep.mubr.msk.bf16.mxu0 %vm2457_vm0, %v2456_v0  ;;  %v348_v3 = vld [vmem:[%s297_s18] sm:$0xff]  ;;  %v349_v4 = vld [vmem:[%s297_s18 + $0x8] sm:$0xff]  ;;  %vm367_vm1 = vcmask 261120   ;;  %vm540_vm2 = vcmask 31744   ;;  %s2458_s29 = smov 120   ;;  %s2459_s7 = smov 124  }
  0xa2   : > { %1897 = vmatprep.subr.bf16.mxu1 %v2456_v0  ;;  %1901 = vmatprep.mubr.msk.bf16.mxu1 %vm2457_vm0, %v2456_v0  ;;  %v2143_v5 = vld [vmem:[#allocation8] sm:$0xff]   ;;  %v350_v6 = vpack.c.bf16 %v349_v4, %v348_v3  ;;  %v2146_v8 = vld [vmem:[#allocation11 + $0x8] sm:$0xff]   ;;  %s2460_s9 = smov 116   ;;  %s2461_s13 = smov 112   ;;  %vm588_vm3 = vcmask 130048   ;;  %vm789_vm4 = vcmask 64544  }
  0xa3   : > { %1890 = vmatpush3.bf16.msra.mxu0 %v2141_v1  ;;  %v2145_v7 = vld [vmem:[#allocation11] sm:$0xff]   ;;  %v2144_v9 = vld [vmem:[#allocation8 + $0x8] sm:$0xff]   ;;  %s2462_s15 = smov 108   ;;  %s2463_s11 = smov 104   ;;  %vm921_vm5 = vcmask 97344   ;;  %vm1053_vm6 = vcmask 130144  }
  0xa4   : > { %1891 = vmatprep.subr.bf16.mxu0 %v2456_v0  ;;  %1898 = vmatpush3.bf16.msra.mxu1 %v2145_v7  ;;  %s2464_s16 = smov 100   ;;  %s2465_s20 = smov 4   ;;  %vm1185_vm7 = vcmask 162944   ;;  %vm1317_vm8 = vcmask 195744   ;;  %vm1449_vm9 = vcmask 228544   ;;  %vm1581_vm10 = vcmask 261344  }
  0xa5   : > { %1899 = vmatprep.subr.bf16.mxu1 %v2456_v0  ;;  %s2466_s27 = smov 8   ;;  %s2467_s10 = smov 12  }
  0xa6   : > { %s2468_s30 = smov 16   ;;  %s2469_s14 = smov 20  }
  0xa7   : > { %1892 = vmatpush3.bf16.msra.mxu0 %v2142_v2  ;;  %s2470_s6 = smov 24   ;;  %s2471_s17 = smov 28  }
  0xa8   : > { %1905 = vmatprep.subr.bf16.mxu0 %v2456_v0  ;;  %1900 = vmatpush3.bf16.msra.mxu1 %v2146_v8 }
  0xa9   : > { %1913 = vmatprep.subr.bf16.mxu1 %v2456_v0 }
  0xaa   : > { %1894 = vmatmul.mubr.msk.bf16.vlgmr.msra.gmra.mrb[0].mxu0 %vm367_vm1, %v350_v6 }
  0xab   : > { %1906 = vmatpush3.bf16.msra.mxu0 %v2143_v5  ;;  %1909 = vmatprep.mubr.msk.bf16.mxu0 %vm2457_vm0, %v2456_v0 }
  0xac   : > { %1907 = vmatprep.subr.bf16.mxu0 %v2456_v0  ;;  %1902 = vmatmul.mubr.msk.bf16.vlgmr.msra.gmra.mrb[0].mxu1 %vm367_vm1, %v350_v6 }
  0xad   : > { %1915 = vmatprep.mubr.msk.bf16.mxu1 %vm2457_vm0, %v2456_v0 }
  0xaf   : > { %1908 = vmatpush3.bf16.msra.mxu0 %v2144_v9 }
  0xb0   : > { %1919 = vmatprep.subr.bf16.mxu0 %v2456_v0 }
  0xb2   : > { %1910 = vmatmul.mubr.msk.bf16.vlgmr.msra.gmra.mrb[4].mxu0 %vm367_vm1, %v350_v6 }
  0xb3   : > { %1921 = vmatprep.mubr.msk.bf16.mxu0 %vm2457_vm0, %v2456_v0 }
 0x17d   : > { %v405_v10 = vpop.f32.mrb[0].mxu0 }
 0x17e   : > { %v1895_v11 = vpop.f32.mrb[1].mxu0 }
 0x17f   : > { %v408_v12 = vpop.f32.mrb[2].mxu0  ;;  %v464_v22 = vpop.f32.mrb[0].mxu1 }
 0x180   : > { %v412_v13 = vpack.c.bf16 %v408_v12, %v405_v10  ;;  %v1896_v14 = vpop.f32.mrb[3].mxu0  ;;  %v1903_v23 = vpop.f32.mrb[1].mxu1 }
 0x181   : > { %v467_v24 = vpop.f32.mrb[2].mxu1 }
 0x182   : > { %413 = vst.msk [vmem:[#allocation2] sm:$0xff] %vm367_vm1, %v412_v13  ;;  %v471_v25 = vpack.c.bf16 %v467_v24, %v464_v22  ;;  %v1904_v26 = vpop.f32.mrb[3].mxu1 }
 0x184   : > { %472 = vst.msk [vmem:[#allocation3] sm:$0xff] %vm367_vm1, %v471_v25 }
 0x185   : > { %v530_v15 = vpop.f32.mrb[4].mxu0 }
 0x186   : > { %v1911_v16 = vpop.f32.mrb[5].mxu0 }
 0x187   : > { %v533_v17 = vpop.f32.mrb[6].mxu0 }
 0x188   : > { %v537_v18 = vpack.c.bf16 %v533_v17, %v530_v15  ;;  %v1912_v19 = vpop.f32.mrb[7].mxu0 }
 0x189   : > { %v791_v20 = vld [vmem:[#allocation2] sm:$0xff] }
 0x18a   : > { %796 = vrot.lane.b32.xlu1 %v791_v20, %s2458_s29  ;;  %664 = vrot.lane.b32.xlu0 %v791_v20, %s2459_s7  ;;  %v545_v21 = vsel %vm540_vm2, %v791_v20, 0 }
 0x18b   : > { %1914 = vmatpush3.bf16.xpose.msra.mxu1 %v545_v21  ;;  %v2806_v27 = vld [vmem:[#allocation3] sm:$0xff] }
 0x18c   : > { %1925 = vmatprep.subr.bf16.mxu1 %v2456_v0  ;;  %1920 = vmatpush3.bf16.msra.mxu0 %v2806_v27 }
 0x18d   : > { %1931 = vmatprep.subr.bf16.mxu0 %v2456_v0 }
 0x18e   : > { %793 = vrot.lane.b32.xlu1 %v537_v18, %s2458_s29  ;;  %661 = vrot.lane.b32.xlu0 %v537_v18, %s2459_s7 }
 0x192   : > { %925 = vrot.lane.b32.xlu1 %v537_v18, %s2460_s9  ;;  %928 = vrot.lane.b32.xlu0 %v791_v20, %s2460_s9 }
 0x193   : > { %1916 = vmatmul.mubr.msk.bf16.vlgmr.msra.gmra.mrb[4].mxu1 %vm540_vm2, %v537_v18 }
 0x194   : > { %1927 = vmatprep.mubr.msk.bf16.mxu1 %vm2457_vm0, %v2456_v0 }
 0x196   : > { %1057 = vrot.lane.b32.xlu1 %v537_v18, %s2461_s13  ;;  %1060 = vrot.lane.b32.xlu0 %v791_v20, %s2461_s13 }
 0x19a   : > { %1189 = vrot.lane.b32.xlu1 %v537_v18, %s2462_s15  ;;  %1192 = vrot.lane.b32.xlu0 %v791_v20, %s2462_s15 }
 0x19e   : > { %1321 = vrot.lane.b32.xlu1 %v537_v18, %s2463_s11  ;;  %1324 = vrot.lane.b32.xlu0 %v791_v20, %s2463_s11 }
 0x1a2   : > { %1453 = vrot.lane.b32.xlu1 %v537_v18, %s2464_s16  ;;  %1456 = vrot.lane.b32.xlu0 %v791_v20, %s2464_s16 }
 0x1a6   : > { %733 = vrot.lane.b32.xlu1 %v2806_v27, %s2459_s7  ;;  %865 = vrot.lane.b32.xlu0 %v2806_v27, %s2458_s29  ;;  %s341_s7 = scalar_lea.vmem [#allocation14], %s1803_s19 }
 0x1aa   : > { %997 = vrot.lane.b32.xlu1 %v2806_v27, %s2460_s9  ;;  %s1669_s9 = sshll.u32 %s341_s7, 4  ;;  %s3016_s9 = int_to_ptr.vmem [resolvable:$true] %s1669_s9 }
 0x1fc   : > { %v665_v28 = vpop.permute.xlu0 %664  ;;  %v797_v30 = vpop.permute.xlu1 %796 }
 0x1fd   : > { %v670_v29 = vsel %vm540_vm2, %v665_v28, 0  ;;  %v802_v32 = vsel %vm540_vm2, %v797_v30, 0 }
 0x1fe   : > { %1926 = vmatpush3.bf16.xpose.msra.mxu1 %v670_v29 }
 0x1ff   : > { %1937 = vmatprep.subr.bf16.mxu1 %v2456_v0 }
 0x200   : > { %v662_v31 = vpop.permute.xlu0 %661  ;;  %v794_v34 = vpop.permute.xlu1 %793 }
 0x204   : > { %v929_v33 = vpop.permute.xlu0 %928  ;;  %v926_v37 = vpop.permute.xlu1 %925 }
 0x205   : > { %1928 = vmatmul.mubr.msk.bf16.vlgmr.msra.gmra.mrb[8].mxu1 %vm540_vm2, %v662_v31  ;;  %v934_v35 = vsel %vm540_vm2, %v929_v33, 0 }
 0x206   : > { %1938 = vmatpush3.bf16.xpose.msra.mxu1 %v802_v32  ;;  %1939 = vmatprep.mubr.msk.bf16.mxu1 %vm2457_vm0, %v2456_v0 }
 0x207   : > { %1949 = vmatprep.subr.bf16.mxu1 %v2456_v0 }
 0x208   : > { %v1061_v36 = vpop.permute.xlu0 %1060  ;;  %v1058_v40 = vpop.permute.xlu1 %1057 }
 0x209   : > { %v1066_v38 = vsel %vm540_vm2, %v1061_v36, 0 }
 0x20c   : > { %v1193_v39 = vpop.permute.xlu0 %1192  ;;  %v1190_v43 = vpop.permute.xlu1 %1189 }
 0x20d   : > { %1940 = vmatmul.mubr.msk.bf16.vlgmr.msra.gmra.mrb[12].mxu1 %vm540_vm2, %v794_v34  ;;  %v1198_v41 = vsel %vm540_vm2, %v1193_v39, 0 }
 0x20e   : > { %1950 = vmatpush3.bf16.xpose.msra.mxu1 %v934_v35  ;;  %1951 = vmatprep.mubr.msk.bf16.mxu1 %vm2457_vm0, %v2456_v0 }
 0x20f   : > { %1961 = vmatprep.subr.bf16.mxu1 %v2456_v0 }
 0x210   : > { %v1325_v42 = vpop.permute.xlu0 %1324  ;;  %v1322_v46 = vpop.permute.xlu1 %1321 }
 0x211   : > { %v1330_v44 = vsel %vm540_vm2, %v1325_v42, 0 }
 0x214   : > { %v1457_v45 = vpop.permute.xlu0 %1456  ;;  %v1454_v48 = vpop.permute.xlu1 %1453 }
 0x215   : > { %1952 = vmatmul.mubr.msk.bf16.vlgmr.msra.gmra.mrb[16].mxu1 %vm540_vm2, %v926_v37  ;;  %v1462_v47 = vsel %vm540_vm2, %v1457_v45, 0 }
 0x216   : > { %1962 = vmatpush3.bf16.xpose.msra.mxu1 %v1066_v38  ;;  %1963 = vmatprep.mubr.msk.bf16.mxu1 %vm2457_vm0, %v2456_v0 }
 0x217   : > { %1973 = vmatprep.subr.bf16.mxu1 %v2456_v0 }
 0x218   : > { %v734_v10 = vpop.permute.xlu1 %733  ;;  %v2876_v11 = vpop.permute.xlu0 %865 }
 0x21c   : > { %v2880_v14 = vpop.permute.xlu1 %997 }
 0x21d   : > { %1964 = vmatmul.mubr.msk.bf16.vlgmr.msra.gmra.mrb[20].mxu1 %vm540_vm2, %v1058_v40 }
 0x21e   : > { %1974 = vmatpush3.bf16.xpose.msra.mxu1 %v1198_v41  ;;  %1975 = vmatprep.mubr.msk.bf16.mxu1 %vm2457_vm0, %v2456_v0 }
 0x21f   : > { %1985 = vmatprep.subr.bf16.mxu1 %v2456_v0 }
 0x225   : > { %1976 = vmatmul.mubr.msk.bf16.vlgmr.msra.gmra.mrb[24].mxu1 %vm540_vm2, %v1190_v43 }
 0x226   : > { %1986 = vmatpush3.bf16.xpose.msra.mxu1 %v1330_v44  ;;  %1987 = vmatprep.mubr.msk.bf16.mxu1 %vm2457_vm0, %v2456_v0 }
 0x227   : > { %1997 = vmatprep.subr.bf16.mxu1 %v2456_v0 }
 0x22d   : > { %1988 = vmatmul.mubr.msk.bf16.vlgmr.msra.gmra.mrb[28].mxu1 %vm540_vm2, %v1322_v46 }
 0x22e   : > { %1998 = vmatpush3.bf16.xpose.msra.mxu1 %v1462_v47  ;;  %1999 = vmatprep.mubr.msk.bf16.mxu1 %vm2457_vm0, %v2456_v0 }
 0x22f   : > { %2009 = vmatprep.subr.bf16.mxu1 %v2456_v0 }
 0x235   : > { %2000 = vmatmul.mubr.msk.bf16.vlgmr.msra.gmra.mrb[32].mxu1 %vm540_vm2, %v1454_v48 }
 0x236   : > { %2013 = vmatprep.mubr.msk.bf16.mxu1 %vm2457_vm0, %v2456_v0 }
 0x266   : > { %v581_v49 = vpop.f32.mrb[4].mxu1 }
 0x267   : > { %v1917_v50 = vpop.f32.mrb[5].mxu1  ;;  %v589_v51 = vsel %vm588_vm3, %v581_v49, -inf }
 0x268   : > { %590 = vmax.xlane.f32.xlu0 %v589_v51  ;;  %v584_v52 = vpop.f32.mrb[6].mxu1 }
 0x269   : > { %v1918_v53 = vpop.f32.mrb[7].mxu1  ;;  %v592_v54 = vsel %vm588_vm3, %v584_v52, -inf }
 0x26a   : > { %593 = vmax.xlane.f32.xlu1 %v592_v54 }
 0x2d8   : > { %v2852_v55 = vpop.f32.mrb[8].mxu1 }
 0x2d9   : > { %v1929_v56 = vpop.f32.mrb[9].mxu1  ;;  %v713_v57 = vsel %vm588_vm3, %v2852_v55, -inf }
 0x2da   : > { %714 = vmax.xlane.f32.xlu0 %v713_v57  ;;  %v2856_v58 = vpop.f32.mrb[10].mxu1 }
 0x2db   : > { %v1930_v59 = vpop.f32.mrb[11].mxu1  ;;  %v716_v60 = vsel %vm588_vm3, %v2856_v58, -inf }
 0x2de   : > { %717 = vmax.xlane.f32.xlu0 %v716_v60 }
 0x2e0   : > { %v2860_v61 = vpop.f32.mrb[12].mxu1 }
 0x2e1   : > { %v1941_v62 = vpop.f32.mrb[13].mxu1  ;;  %v845_v63 = vsel %vm588_vm3, %v2860_v61, -inf }
 0x2e2   : > { %846 = vmax.xlane.f32.xlu1 %v845_v63  ;;  %v2864_v1 = vpop.f32.mrb[14].mxu1 }
 0x2e3   : > { %v1942_v2 = vpop.f32.mrb[15].mxu1  ;;  %v848_v3 = vsel %vm588_vm3, %v2864_v1, -inf }
 0x2e4   : > { %849 = vmax.xlane.f32.xlu0 %v848_v3 }
 0x2e8   : > { %v2868_v4 = vpop.f32.mrb[16].mxu1 }
 0x2e9   : > { %v1953_v5 = vpop.f32.mrb[17].mxu1  ;;  %v977_v6 = vsel %vm588_vm3, %v2868_v4, -inf }
 0x2ea   : > { %978 = vmax.xlane.f32.xlu1 %v977_v6  ;;  %v2872_v7 = vpop.f32.mrb[18].mxu1 }
 0x2eb   : > { %v1954_v8 = vpop.f32.mrb[19].mxu1  ;;  %v980_v9 = vsel %vm588_vm3, %v2872_v7, -inf }
 0x2ec   : > { %981 = vmax.xlane.f32.xlu0 %v980_v9 }
 0x2f0   : > { %v2878_v12 = vpop.f32.mrb[20].mxu1 }
 0x2f1   : > { %v1965_v13 = vpop.f32.mrb[21].mxu1  ;;  %v1109_v15 = vsel %vm588_vm3, %v2878_v12, -inf }
 0x2f2   : > { %1110 = vmax.xlane.f32.xlu1 %v1109_v15  ;;  %v2884_v16 = vpop.f32.mrb[22].mxu1 }
 0x2f3   : > { %v1966_v17 = vpop.f32.mrb[23].mxu1  ;;  %v1112_v18 = vsel %vm588_vm3, %v2884_v16, -inf }
 0x2f4   : > { %1113 = vmax.xlane.f32.xlu0 %v1112_v18 }
 0x2f5   : > { %v591_v19 = vpop.xlane.xlu0 %590 }
 0x2f6   : > { %v595_v20 = vsub.f32 %v581_v49, %v591_v19 }
 0x2f7   : > { %v594_v21 = vpop.xlane.xlu1 %593 }
 0x2f8   : > { %v597_v22 = vmul.f32 1.442695, %v595_v20  ;;  %v596_v23 = vsub.f32 %v584_v52, %v594_v21  ;;  %v2888_v24 = vpop.f32.mrb[24].mxu1 }
 0x2f9   : > { %v1977_v25 = vpop.f32.mrb[25].mxu1  ;;  %v1241_v26 = vsel %vm588_vm3, %v2888_v24, -inf }
 0x2fa   : > { %v599_v28 = vmul.f32 1.442695, %v596_v23  ;;  %1242 = vmax.xlane.f32.xlu0 %v1241_v26  ;;  %v2892_v29 = vpop.f32.mrb[26].mxu1  ;;  %2149 = vpow2.f32 %v597_v22 }
 0x2fb   : > { %v1978_v30 = vpop.f32.mrb[27].mxu1  ;;  %v1244_v31 = vsel %vm588_vm3, %v2892_v29, -inf }
 0x2fc   : > { %2151 = vpow2.f32 %v599_v28 }
 0x2fe   : > { %1245 = vmax.xlane.f32.xlu0 %v1244_v31 }
 0x300   : > { %v2896_v32 = vpop.f32.mrb[28].mxu1 }
 0x301   : > { %v1989_v33 = vpop.f32.mrb[29].mxu1  ;;  %v1373_v46 = vsel %vm588_vm3, %v2896_v32, -inf }
 0x302   : > { %v2898_v34 = vpop.f32.mrb[30].mxu1 }
 0x303   : > { %1129 = vrot.lane.b32.xlu1 %v2806_v27, %s2461_s13  ;;  %v1990_v35 = vpop.f32.mrb[31].mxu1  ;;  %v1376_v36 = vsel %vm588_vm3, %v2898_v34, -inf  ;;  %s1844_s13 = sshll.u32 %s2437_s24, 8  ;;  %s1654_s24 = scalar_lea.sflag [#allocation7], %s2748_s12 }
 0x304   : > { %1377 = vmax.xlane.f32.xlu0 %v1376_v36  ;;  %v2904_v37 = vpop.eup %2149 }
 0x306   : > { %v2906_v38 = vpop.eup %2151 }
 0x307   : > { %v607_v39 = vpack.c.bf16 %v2906_v38, %v2904_v37 }
 0x308   : > { %v2910_v40 = vpop.f32.mrb[32].mxu1 }
 0x309   : > { %1922 = vmatmul.mubr.msk.bf16.vlgmr.msra.gmra.mrb[8].mxu0 %vm588_vm3, %v607_v39  ;;  %v2001_v41 = vpop.f32.mrb[33].mxu1  ;;  %v1505_v42 = vsel %vm588_vm3, %v2910_v40, -inf }
 0x30a   : > { %1506 = vmax.xlane.f32.xlu0 %v1505_v42  ;;  %v2915_v43 = vpop.f32.mrb[34].mxu1  ;;  %1932 = vmatpush3.bf16.msra.mxu0 %v734_v10 }
 0x30b   : > { %v2002_v44 = vpop.f32.mrb[35].mxu1  ;;  %1933 = vmatprep.mubr.msk.bf16.mxu0 %vm2457_vm0, %v2456_v0  ;;  %1943 = vmatprep.subr.bf16.mxu0 %v2456_v0  ;;  %v1508_v45 = vsel %vm588_vm3, %v2915_v43, -inf }
 0x30e   : > { %1509 = vmax.xlane.f32.xlu0 %v1508_v45 }
 0x324   : > { %1261 = vrot.lane.b32.xlu0 %v2806_v27, %s2462_s15 }
 0x327   : > { %1374 = vmax.xlane.f32.xlu1 %v1373_v46 }
 0x338   : > { %1393 = vrot.lane.b32.xlu1 %v2806_v27, %s2463_s11 }
 0x33c   : > { %1525 = vrot.lane.b32.xlu1 %v2806_v27, %s2464_s16  ;;  %s3103_s16 = sld [smem:[#allocation21_spill]] }
 0x342   : > { %s3022_s19 = scalar_lea.hbm %s3103_s16, %s1844_s13 }
 0x367   : > { %v715_v47 = vpop.xlane.xlu0 %714 }
 0x368   : > { %v719_v48 = vsub.f32 %v2852_v55, %v715_v47 }
 0x36a   : > { %v721_v49 = vmul.f32 1.442695, %v719_v48 }
 0x36b   : > { %v718_v50 = vpop.xlane.xlu0 %717 }
 0x36c   : > { %2153 = vpow2.f32 %v721_v49  ;;  %v720_v51 = vsub.f32 %v2856_v58, %v718_v50 }
 0x36e   : > { %v723_v52 = vmul.f32 1.442695, %v720_v51 }
 0x36f   : > { %v847_v53 = vpop.xlane.xlu1 %846 }
 0x370   : > { %2155 = vpow2.f32 %v723_v52  ;;  %v851_v54 = vsub.f32 %v2860_v61, %v847_v53 }
 0x371   : > { %v850_v56 = vpop.xlane.xlu0 %849 }
 0x372   : > { %v853_v57 = vmul.f32 1.442695, %v851_v54  ;;  %v852_v59 = vsub.f32 %v2864_v1, %v850_v56 }
 0x374   : > { %2157 = vpow2.f32 %v853_v57  ;;  %v855_v60 = vmul.f32 1.442695, %v852_v59 }
 0x376   : > { %v2154_v27 = vpop.eup %2153  ;;  %2159 = vpow2.f32 %v855_v60 }
 0x377   : > { %v979_v62 = vpop.xlane.xlu1 %978  ;;  %v725_v55 = vsel %vm588_vm3, %v2154_v27, 0.0 }
 0x378   : > { %v983_v63 = vsub.f32 %v2868_v4, %v979_v62  ;;  %726 = vadd.xlane.f32.xlu1 %v725_v55 }
 0x379   : > { %v982_v58 = vpop.xlane.xlu0 %981 }
 0x37a   : > { %v2156_v2 = vpop.eup %2155  ;;  %v985_v3 = vmul.f32 1.442695, %v983_v63  ;;  %v984_v5 = vsub.f32 %v2872_v7, %v982_v58 }
 0x37b   : > { %v728_v61 = vsel %vm588_vm3, %v2156_v2, 0.0  ;;  %v731_v6 = vpack.c.bf16 %v2156_v2, %v2154_v27  ;;  %v604_v27 = vsel %vm588_vm3, %v2906_v38, 0.0  ;;  %v601_v38 = vsel %vm588_vm3, %v2904_v37, 0.0 }
 0x37c   : > { %2161 = vpow2.f32 %v985_v3  ;;  %v987_v1 = vmul.f32 1.442695, %v984_v5  ;;  %729 = vadd.xlane.f32.xlu0 %v728_v61 }
 0x37d   : > { %1934 = vmatmul.mubr.msk.bf16.vlgmr.msra.gmra.mrb[12].mxu0 %vm588_vm3, %v731_v6 }
 0x37e   : > { %v2158_v8 = vpop.eup %2157  ;;  %2163 = vpow2.f32 %v987_v1  ;;  %1944 = vmatpush3.bf16.msra.mxu0 %v2876_v11  ;;  %1945 = vmatprep.mubr.msk.bf16.mxu0 %vm2457_vm0, %v2456_v0 }
 0x37f   : > { %v1111_v4 = vpop.xlane.xlu1 %1110  ;;  %v857_v9 = vsel %vm588_vm3, %v2158_v8, 0.0  ;;  %1955 = vmatprep.subr.bf16.mxu0 %v2456_v0 }
 0x380   : > { %v2160_v7 = vpop.eup %2159  ;;  %v1115_v10 = vsub.f32 %v2878_v12, %v1111_v4  ;;  %858 = vadd.xlane.f32.xlu1 %v857_v9 }
 0x381   : > { %v1114_v13 = vpop.xlane.xlu0 %1113  ;;  %v863_v15 = vpack.c.bf16 %v2160_v7, %v2158_v8  ;;  %v860_v19 = vsel %vm588_vm3, %v2160_v7, 0.0 }
 0x382   : > { %v1117_v17 = vmul.f32 1.442695, %v1115_v10  ;;  %v1116_v18 = vsub.f32 %v2884_v16, %v1114_v13 }
 0x383   : > { %v1130_v30 = vpop.permute.xlu1 %1129 }
 0x384   : > { %2165 = vpow2.f32 %v1117_v17  ;;  %v1119_v11 = vmul.f32 1.442695, %v1116_v18  ;;  %861 = vadd.xlane.f32.xlu1 %v860_v19 }
 0x385   : > { %1946 = vmatmul.mubr.msk.bf16.vlgmr.msra.gmra.mrb[16].mxu0 %vm588_vm3, %v863_v15 }
 0x386   : > { %v2162_v20 = vpop.eup %2161  ;;  %2167 = vpow2.f32 %v1119_v11  ;;  %1956 = vmatpush3.bf16.msra.mxu0 %v2880_v14  ;;  %1957 = vmatprep.mubr.msk.bf16.mxu0 %vm2457_vm0, %v2456_v0 }
 0x387   : > { %v1243_v12 = vpop.xlane.xlu0 %1242  ;;  %v989_v21 = vsel %vm588_vm3, %v2162_v20, 0.0  ;;  %1967 = vmatprep.subr.bf16.mxu0 %v2456_v0 }
 0x388   : > { %v2164_v16 = vpop.eup %2163  ;;  %v1247_v22 = vsub.f32 %v2888_v24, %v1243_v12  ;;  %990 = vadd.xlane.f32.xlu0 %v989_v21 }
 0x389   : > { %v992_v23 = vsel %vm588_vm3, %v2164_v16, 0.0  ;;  %v995_v25 = vpack.c.bf16 %v2164_v16, %v2162_v20 }
 0x38a   : > { %v1249_v26 = vmul.f32 1.442695, %v1247_v22  ;;  %993 = vadd.xlane.f32.xlu1 %v992_v23 }
 0x38b   : > { %v1246_v28 = vpop.xlane.xlu0 %1245 }
 0x38c   : > { %2169 = vpow2.f32 %v1249_v26  ;;  %v1248_v14 = vsub.f32 %v2892_v29, %v1246_v28 }
 0x38d   : > { %1958 = vmatmul.mubr.msk.bf16.vlgmr.msra.gmra.mrb[20].mxu0 %vm588_vm3, %v995_v25 }
 0x38e   : > { %v2166_v31 = vpop.eup %2165  ;;  %v1251_v33 = vmul.f32 1.442695, %v1248_v14  ;;  %1968 = vmatpush3.bf16.msra.mxu0 %v1130_v30  ;;  %1969 = vmatprep.mubr.msk.bf16.mxu0 %vm2457_vm0, %v2456_v0 }
 0x38f   : > { %v1121_v24 = vsel %vm588_vm3, %v2166_v31, 0.0  ;;  %1979 = vmatprep.subr.bf16.mxu0 %v2456_v0 }
 0x390   : > { %v2168_v35 = vpop.eup %2167  ;;  %2171 = vpow2.f32 %v1251_v33  ;;  %1122 = vadd.xlane.f32.xlu0 %v1121_v24 }
 0x391   : > { %v1378_v36 = vpop.xlane.xlu0 %1377  ;;  %v1124_v39 = vsel %vm588_vm3, %v2168_v35, 0.0  ;;  %v1127_v29 = vpack.c.bf16 %v2168_v35, %v2166_v31 }
 0x392   : > { %v1380_v41 = vsub.f32 %v2898_v34, %v1378_v36  ;;  %1125 = vadd.xlane.f32.xlu1 %v1124_v39 }
 0x394   : > { %v1383_v42 = vmul.f32 1.442695, %v1380_v41 }
 0x395   : > { %1970 = vmatmul.mubr.msk.bf16.vlgmr.msra.gmra.mrb[24].mxu0 %vm588_vm3, %v1127_v29 }
 0x396   : > { %v2170_v44 = vpop.eup %2169  ;;  %2173 = vpow2.f32 %v1383_v42  ;;  %1981 = vmatprep.mubr.msk.bf16.mxu0 %vm2457_vm0, %v2456_v0 }
 0x397   : > { %v1507_v45 = vpop.xlane.xlu0 %1506  ;;  %v1253_v46 = vsel %vm588_vm3, %v2170_v44, 0.0 }
 0x398   : > { %v1511_v47 = vsub.f32 %v2910_v40, %v1507_v45  ;;  %1254 = vadd.xlane.f32.xlu0 %v1253_v46 }
 0x39a   : > { %v2172_v48 = vpop.eup %2171  ;;  %v1513_v49 = vmul.f32 1.442695, %v1511_v47 }
 0x39b   : > { %v1510_v50 = vpop.xlane.xlu0 %1509  ;;  %v1256_v34 = vsel %vm588_vm3, %v2172_v48, 0.0  ;;  %v1259_v51 = vpack.c.bf16 %v2172_v48, %v2170_v44 }
 0x39c   : > { %v1512_v52 = vsub.f32 %v2915_v43, %v1510_v50  ;;  %1257 = vadd.xlane.f32.xlu1 %v1256_v34  ;;  %2175 = vpow2.f32 %v1513_v49 }
 0x39e   : > { %v1515_v53 = vmul.f32 1.442695, %v1512_v52 }
 0x39f   : > { %v1262_v54 = vpop.permute.xlu0 %1261 }
 0x3a0   : > { %v2174_v56 = vpop.eup %2173  ;;  %2177 = vpow2.f32 %v1515_v53  ;;  %1980 = vmatpush3.bf16.msra.mxu0 %v1262_v54 }
 0x3a1   : > { %v1388_v57 = vsel %vm588_vm3, %v2174_v56, 0.0  ;;  %1991 = vmatprep.subr.bf16.mxu0 %v2456_v0 }
 0x3a2   : > { %1389 = vadd.xlane.f32.xlu1 %v1388_v57 }
 0x3a3   : > { %1982 = vmatmul.mubr.msk.bf16.vlgmr.msra.gmra.mrb[28].mxu0 %vm588_vm3, %v1259_v51 }
 0x3a4   : > { %1993 = vmatprep.mubr.msk.bf16.mxu0 %vm2457_vm0, %v2456_v0 }
 0x3a6   : > { %v2176_v40 = vpop.eup %2175 }
 0x3aa   : > { %v2178_v59 = vpop.eup %2177 }
 0x3ab   : > { %v1520_v43 = vsel %vm588_vm3, %v2178_v59, 0.0  ;;  %v1523_v60 = vpack.c.bf16 %v2178_v59, %v2176_v40 }
 0x3ac   : > { %1521 = vadd.xlane.f32.xlu1 %v1520_v43 }
 0x3b0   : > { %605 = vadd.xlane.f32.xlu1 %v604_v27 }
 0x3b4   : > { %v1375_v62 = vpop.xlane.xlu1 %1374 }
 0x3b5   : > { %v1379_v55 = vsub.f32 %v2896_v32, %v1375_v62  ;;  %v1517_v32 = vsel %vm588_vm3, %v2176_v40, 0.0 }
 0x3b7   : > { %v1381_v63 = vmul.f32 1.442695, %v1379_v55 }
 0x3b8   : > { %v1394_v58 = vpop.permute.xlu1 %1393 }
 0x3b9   : > { %2179 = vpow2.f32 %v1381_v63  ;;  %1992 = vmatpush3.bf16.msra.mxu0 %v1394_v58 }
 0x3ba   : > { %2003 = vmatprep.subr.bf16.mxu0 %v2456_v0 }
 0x3bc   : > { %v1526_v61 = vpop.permute.xlu1 %1525 }
 0x3c3   : > { %v2180_v2 = vpop.eup %2179 }
 0x3c4   : > { %v1385_v3 = vsel %vm588_vm3, %v2180_v2, 0.0  ;;  %v1391_v5 = vpack.c.bf16 %v2174_v56, %v2180_v2 }
 0x3c5   : > { %1386 = vadd.xlane.f32.xlu0 %v1385_v3 }
 0x3c6   : > { %1994 = vmatmul.mubr.msk.bf16.vlgmr.msra.gmra.mrb[32].mxu0 %vm588_vm3, %v1391_v5 }
 0x3c7   : > { %2004 = vmatpush3.bf16.msra.mxu0 %v1526_v61  ;;  %2005 = vmatprep.mubr.msk.bf16.mxu0 %vm2457_vm0, %v2456_v0 }
 0x3c9   : > { %1518 = vadd.xlane.f32.xlu0 %v1517_v32 }
 0x3cd   : > { %602 = vadd.xlane.f32.xlu0 %v601_v38 }
 0x3ce   : > { %2006 = vmatmul.mubr.msk.bf16.vlgmr.msra.gmra.mrb[36].mxu0 %vm588_vm3, %v1523_v60 }
 0x3dc   : > { %v2988_v6 = vpop.f32.mrb[8].mxu0 }
 0x3dd   : > { %v1923_v1 = vpop.f32.mrb[9].mxu0 }
 0x3de   : > { %v648_v8 = vpop.f32.mrb[10].mxu0 }
 0x3df   : > { %v1924_v4 = vpop.f32.mrb[11].mxu0 }
 0x405   : > { %v727_v9 = vpop.xlane.xlu1 %726 }
 0x406   : > { %2181 = vrcp.f32 %v727_v9 }
 0x409   : > { %v730_v15 = vpop.xlane.xlu0 %729 }
 0x40a   : > { %2183 = vrcp.f32 %v730_v15 }
 0x40d   : > { %v859_v7 = vpop.xlane.xlu1 %858 }
 0x40e   : > { %2185 = vrcp.f32 %v859_v7 }
 0x410   : > { %v2182_v16 = vpop.eup %2181 }
 0x411   : > { %v862_v10 = vpop.xlane.xlu1 %861 }
 0x412   : > { %2187 = vrcp.f32 %v862_v10 }
 0x414   : > { %v2184_v23 = vpop.eup %2183 }
 0x415   : > { %v991_v18 = vpop.xlane.xlu0 %990 }
 0x416   : > { %2189 = vrcp.f32 %v991_v18 }
 0x417   : > { %v994_v13 = vpop.xlane.xlu1 %993 }
 0x418   : > { %2191 = vrcp.f32 %v994_v13  ;;  %v2186_v36 = vpop.eup %2185 }
 0x41c   : > { %v2188_v29 = vpop.eup %2187 }
 0x41d   : > { %v1123_v37 = vpop.xlane.xlu0 %1122 }
 0x41f   : > { %v1126_v17 = vpop.xlane.xlu1 %1125 }
 0x420   : > { %v2190_v49 = vpop.eup %2189 }
 0x422   : > { %v2192_v34 = vpop.eup %2191 }
 0x425   : > { %v1255_v20 = vpop.xlane.xlu0 %1254 }
 0x429   : > { %v2990_v19 = vpop.xlane.xlu1 %1257 }
 0x42f   : > { %v2992_v11 = vpop.xlane.xlu1 %1389 }
 0x439   : > { %v2994_v12 = vpop.xlane.xlu1 %1521 }
 0x43d   : > { %v606_v33 = vpop.xlane.xlu1 %605 }
 0x43e   : > { %2193 = vrcp.f32 %v606_v33 }
 0x448   : > { %v2194_v52 = vpop.eup %2193 }
 0x449   : > { %v655_v59 = vmul.f32 %v2194_v52, %v648_v8 }
 0x450   : > { %v773_v21 = vpop.f32.mrb[12].mxu0 }
 0x451   : > { %v1935_v22 = vpop.f32.mrb[13].mxu0  ;;  %v782_v28 = vmul.f32 %v2182_v16, %v773_v21 }
 0x452   : > { %v2996_v25 = vpop.xlane.xlu0 %1386  ;;  %v776_v26 = vpop.f32.mrb[14].mxu0  ;;  %v2148_v22 = vld [vmem:[#allocation13 + $0x8] sm:$0xff]  }
 0x453   : > { %v783_v14 = vmul.f32 %v2184_v23, %v776_v26  ;;  %v1936_v30 = vpop.f32.mrb[15].mxu0 }
 0x455   : > { %v784_v31 = vpack.c.bf16 %v783_v14, %v782_v28 }
 0x456   : > { %v2998_v24 = vpop.xlane.xlu0 %1518 }
 0x457   : > { %786 = vrot.lane.b32.xlu0 %v784_v31, %s2465_s20  ;;  %s2355_s20 = scalar_lea.vmem %s3016_s9, 256 }
 0x458   : > { %v905_v35 = vpop.f32.mrb[16].mxu0  ;;  %p2356_p8 = scmp.ne.s32.totalorder %s3016_s9, %s2355_s20 }
 0x459   : > { %v1947_v39 = vpop.f32.mrb[17].mxu0  ;;  %v914_v44 = vmul.f32 %v2186_v36, %v905_v35 }
 0x45a   : > { %v603_v41 = vpop.xlane.xlu0 %602  ;;  %v908_v42 = vpop.f32.mrb[18].mxu0  ;;  %p2357_p6 = pnand %p2356_p8, %p2693_p5 }
 0x45b   : > { %2195 = vrcp.f32 %v603_v41  ;;  %v915_v45 = vmul.f32 %v2188_v29, %v908_v42  ;;  %v1948_v46 = vpop.f32.mrb[19].mxu0 }
 0x45c   : > { %2197 = vrcp.f32 %v1123_v37  ;;  %v2147_v37 = vld [vmem:[#allocation13] sm:$0xff]   ;;  %p2358_p10 = pneg %p2357_p6 }
 0x45d   : > { %v916_v47 = vpack.c.bf16 %v915_v45, %v914_v44  ;;  %2199 = vrcp.f32 %v1126_v17  ;;  %2010 = vmatpush3.bf16.msra.mxu1 %v2147_v37  ;;  %v1834_v44 = vld [vmem:[%s3078_s5] ss:$0 sm:$0xff] }
 0x45e   : > { %2201 = vrcp.f32 %v1255_v20  ;;  %2011 = vmatprep.subr.bf16.mxu1 %v2456_v0 }
 0x45f   : > { %918 = vrot.lane.b32.xlu1 %v916_v47, %s2466_s27  ;;  %2203 = vrcp.f32 %v2990_v19 }
 0x460   : > { %v1037_v48 = vpop.f32.mrb[20].mxu0  ;;  %2205 = vrcp.f32 %v2992_v11 }
 0x461   : > { %v1959_v50 = vpop.f32.mrb[21].mxu0  ;;  %v1046_v53 = vmul.f32 %v2190_v49, %v1037_v48  ;;  %2207 = vrcp.f32 %v2996_v25  ;;  %2012 = vmatpush3.bf16.msra.mxu1 %v2148_v22 }
 0x462   : > { %v1040_v51 = vpop.f32.mrb[22].mxu0  ;;  %2209 = vrcp.f32 %v2998_v24 }
 0x463   : > { %v1047_v54 = vmul.f32 %v2192_v34, %v1040_v51  ;;  %v1960_v56 = vpop.f32.mrb[23].mxu0  ;;  %2211 = vrcp.f32 %v2994_v12 }
 0x465   : > { %v2196_v57 = vpop.eup %2195  ;;  %v1048_v40 = vpack.c.bf16 %v1047_v54, %v1046_v53 }
 0x466   : > { %v654_v43 = vmul.f32 %v2196_v57, %v2988_v6  ;;  %v2198_v62 = vpop.eup %2197 }
 0x467   : > { %1050 = vrot.lane.b32.xlu1 %v1048_v40, %s2467_s10  ;;  %v2200_v63 = vpop.eup %2199  ;;  %s2472_s10 = smov [#allocation14]  }
 0x468   : > { %v1169_v60 = vpop.f32.mrb[24].mxu0  ;;  %v656_v27 = vpack.c.bf16 %v655_v59, %v654_v43  ;;  %v2202_v38 = vpop.eup %2201 }
 0x469   : > { %v1971_v55 = vpop.f32.mrb[25].mxu0  ;;  %v1178_v2 = vmul.f32 %v2198_v62, %v1169_v60  ;;  %v2204_v1 = vpop.eup %2203 }
 0x46a   : > { %v1172_v58 = vpop.f32.mrb[26].mxu0  ;;  %657 = vst.msk [vmem:[#allocation4] sm:$0xff] %vm540_vm2, %v656_v27  ;;  %v2206_v15 = vpop.eup %2205 }
 0x46b   : > { %v1179_v3 = vmul.f32 %v2200_v63, %v1172_v58  ;;  %v1972_v5 = vpop.f32.mrb[27].mxu0  ;;  %v2208_v18 = vpop.eup %2207 }
 0x46c   : > { %v2210_v11 = vpop.eup %2209 }
 0x46d   : > { %v1180_v61 = vpack.c.bf16 %v1179_v3, %v1178_v2  ;;  %v2212_v28 = vpop.eup %2211 }
 0x46f   : > { %1182 = vrot.lane.b32.xlu0 %v1180_v61, %s2468_s30  ;;  %s2359_s30 = sshll.u32 %s2472_s10, 4  ;;  %s2360_s30 = int_to_ptr.vmem [resolvable:$false] %s2359_s30 }
 0x470   : > { %p2362_p3 = scmp.lt.s32.totalorder %s3016_s9, %s2360_s30 }
 0x476   : > { %v1301_v32 = vpop.f32.mrb[28].mxu0 }
 0x477   : > { %v1983_v6 = vpop.f32.mrb[29].mxu0  ;;  %v1310_v4 = vmul.f32 %v2202_v38, %v1301_v32 }
 0x478   : > { %v1304_v8 = vpop.f32.mrb[30].mxu0 }
 0x479   : > { %v1311_v9 = vmul.f32 %v2204_v1, %v1304_v8  ;;  %v1984_v7 = vpop.f32.mrb[31].mxu0 }
 0x47b   : > { %v1312_v10 = vpack.c.bf16 %v1311_v9, %v1310_v4 }
 0x47d   : > { %1314 = vrot.lane.b32.xlu1 %v1312_v10, %s2469_s14  ;;  %s2361_s14 = scalar_lea.vmem %s2360_s30, 512 }
 0x47e   : > { %p2363_p7 = scmp.lt.s32.totalorder %s2361_s14, %s2355_s20 }
 0x480   : > { %p2364_p9 = por %p2363_p7, %p2362_p3 }
 0x482   : > { %p2365_p0 = pnand %p2364_p9, %p2358_p10 }
 0x499   : > { %v1433_v13 = vpop.f32.mrb[32].mxu0 }
 0x49a   : > { %v1995_v17 = vpop.f32.mrb[33].mxu0  ;;  %v1442_v20 = vmul.f32 %v2208_v18, %v1433_v13 }
 0x49b   : > { %v1436_v19 = vpop.f32.mrb[34].mxu0 }
 0x49c   : > { %v1443_v21 = vmul.f32 %v2206_v15, %v1436_v19  ;;  %v1996_v16 = vpop.f32.mrb[35].mxu0 }
 0x49e   : > { %v1444_v23 = vpack.c.bf16 %v1443_v21, %v1442_v20 }
 0x4a0   : > { %1446 = vrot.lane.b32.xlu0 %v1444_v23, %s2470_s6 }
 0x4a1   : > { %v1565_v25 = vpop.f32.mrb[36].mxu0 }
 0x4a2   : > { %v1574_v12 = vmul.f32 %v2210_v11, %v1565_v25  ;;  %v2007_v26 = vpop.f32.mrb[37].mxu0 }
 0x4a3   : > { %v1568_v14 = vpop.f32.mrb[38].mxu0 }
 0x4a4   : > { %v1575_v30 = vmul.f32 %v2212_v28, %v1568_v14  ;;  %v2008_v31 = vpop.f32.mrb[39].mxu0 }
 0x4a6   : > { %v1576_v33 = vpack.c.bf16 %v1575_v30, %v1574_v12 }
 0x4a8   : > { %1578 = vrot.lane.b32.xlu1 %v1576_v33, %s2471_s17 }
 0x4c9   : > { %v787_v24 = vpop.permute.xlu0 %786 }
 0x4ca   : > { %790 = vst.msk [vmem:[#allocation4] sm:$0xff] %vm789_vm4, %v787_v24 }
 0x4d1   : > { %v919_v35 = vpop.permute.xlu1 %918 }
 0x4d2   : > { %922 = vst.msk [vmem:[#allocation4] sm:$0xff] %vm921_vm5, %v919_v35 }
 0x4d9   : > { %v1051_v0 = vpop.permute.xlu1 %1050 }
 0x4da   : > { %1054 = vst.msk [vmem:[#allocation4] sm:$0xff] %vm1053_vm6, %v1051_v0 }
 0x4e1   : > { %v1183_v36 = vpop.permute.xlu0 %1182 }
 0x4e2   : > { %1186 = vst.msk [vmem:[#allocation4] sm:$0xff] %vm1185_vm7, %v1183_v36 }
 0x4ef   : > { %v1315_v39 = vpop.permute.xlu1 %1314 }
 0x4f0   : > { %1318 = vst.msk [vmem:[#allocation4] sm:$0xff] %vm1317_vm8, %v1315_v39 }
 0x512   : > { %v1447_v29 = vpop.permute.xlu0 %1446 }
 0x513   : > { %1450 = vst.msk [vmem:[#allocation4] sm:$0xff] %vm1449_vm9, %v1447_v29 }
 0x51a   : > { %v1579_v41 = vpop.permute.xlu1 %1578 }
 0x51b   : > { %1582 = vst.msk [vmem:[#allocation4] sm:$0xff] %vm1581_vm10, %v1579_v41 }
 0x522   : > { %v1583_v42 = vld [vmem:[#allocation4] sm:$0xff] }
 0x523   : > { %2014 = vmatmul.mubr.msk.bf16.vlgmr.msra.gmra.mrb[36].mxu1 %vm367_vm1, %v1583_v42 }
 0x5f6   : > { %v1644_v45 = vpop.f32.mrb[36].mxu1 }
 0x5f7   : > { %v1645_v46 = vadd.f32 %v1834_v44, %v1644_v45  ;;  %v2015_v47 = vpop.f32.mrb[37].mxu1 }
 0x5f8   : > { %v1647_v48 = vpop.f32.mrb[38].mxu1 }
 0x5f9   : > { %1651 = vst.msk [vmem:[%s341_s7] sm:$0xff] %vm367_vm1, %v1645_v46  ;;  %v1648_v49 = vadd.f32 %v1834_v44, %v1647_v48  ;;  %v2016_v50 = vpop.f32.mrb[39].mxu1 }
 0x5fb   : > { %1652 = vst.msk [vmem:[%s341_s7 + $0x8] sm:$0xff] %vm367_vm1, %v1648_v49 }
 0x5fc   : > { %2368 = shalt.err (!%p2365_p0)
}
 0x5fd   : > { %s2369_s6 = scalar_lea.hbm %s3022_s19, 256  ;;  %s2373_s29 = scalar_lea.hbm %s3103_s16, 512 }
 0x5fe   : > { %p2370_p4 = scmp.ne.s32.totalorder %s3022_s19, %s2369_s6  ;;  %p2374_p12 = scmp.lt.u32.totalorder %s3022_s19, %s3103_s16 }
 0x5ff   : > { %p2375_p1 = scmp.lt.u32.totalorder %s2373_s29, %s2369_s6  ;;  %p2377_p8 = scmp.lt.u32.totalorder %s2369_s6, %s3022_s19 }
 0x600   : > { %p2371_p13 = pnand %p2370_p4, %p2693_p5 }
 0x601   : > { %p2376_p11 = por %p2375_p1, %p2374_p12 }
 0x602   : > { %p2372_p2 = pneg %p2371_p13 }
 0x603   : > { %p2378_p6 = por %p2377_p8, %p2376_p11 }
 0x605   : > { %p2379_p10 = pnand %p2378_p6, %p2372_p2 }
 0x607   : > { %2382 = shalt.err (!%p2379_p10)
}
 0x608   : > { %s2473_s15 = smov 128  }
 0x609   : > { %2035 = dma.vmem_to_hbm [thread:$0]  (%p2693_p5), %s3016_s9, 256, %s3022_s19, %s1654_s24, %s2473_s15, %s2473_s15, %s2466_s27  }
 0x60a PF: > { %s3104_s11 = sld [smem:[#allocation19_spill]]  ;;  %s3105_s20 = sld [smem:[#allocation20_spill]] }
 0x60b   : > { %p3107_p7 = scmp.ge.s32.totalorder %s2445_s26, 2 }
 0x610   : > { %s1684_s10 = sand.u32 1, %s3104_s11   ;;  %p3106_p3 = scmp.ne.s32.totalorder %s3105_s20, 0 }
 0x611   : > { %s1685_s30 = scalar_lea.sflag [#allocation7], %s1684_s10 }
 0x612   : > { %p2055_p9 = pnand %p3107_p7, %p3106_p3 }
 0x614   : > { %2420 = dma.done.wait (!%p2055_p9), %s1685_s30, 256  }
 0x615   : > { %2422 = vsyncadd (!%p2055_p9), %s1685_s30, 4294967040  ;;  %s24_s26 = sadd.s32 1, %s2445_s26   ;;  %s3108_s21 = smov %s2429_s22 }
 0x616   : > { %p21_p0 = scmp.ge.s32.totalorder %s24_s26, 4   ;;  %s3109_s22 = smov %s2433_s23 }
 0x617   : > { %s3110_s23 = smov %s2702_s8  ;;  %s3111_s24 = smov %s2441_s25 }
 0x618   : > { %s3112_s25 = smov %s3114_s28  ;;  %23 = sbr.rel (!%p21_p0) target bundleno = 10 (0xa), region = 109 }
 0x61f   :  { %1690 = vsyncpa [#allocation6], 1 }
 0x620   :  { %1692 = vsyncpa [#allocation6 + $0x1], 1 }
 0x621   :  { %1693 = vsyncpa [#allocation9], 1 }
 0x622   :  { %1694 = vsyncpa [#allocation12], 1 }
 0x623   :  { %1695 = vsyncpa [#allocation7], 1 }
 0x624   :  { %1697 = vsyncpa [#allocation7 + $0x1], 1 }

// kernel: tpu_custom_call.1
= control target key start
LH: loop header
LB: loop body
LE: loop exit
PB: predicated region body
PF: predicated region fallthrough
CT: control target
= control target key end

     0   :  { %s3073_s0 = inlined_call_operand.hbm [shape: f32[2,16,32], index: 0, kind: input, shape index: {}]   ;;  %s3074_s1 = inlined_call_operand.hbm [shape: bf16[32,32], index: 1, kind: input, shape index: {}]   ;;  %s3075_s2 = inlined_call_operand.hbm [shape: bf16[32,32], index: 2, kind: input, shape index: {}]   ;;  %s3076_s3 = inlined_call_operand.hbm [shape: bf16[32,32], index: 3, kind: input, shape index: {}]   ;;  %s3077_s4 = inlined_call_operand.hbm [shape: bf16[32,32], index: 4, kind: input, shape index: {}]   ;;  %s3078_s5 = inlined_call_operand.vmem [shape: f32[1,32], index: 5, kind: input, shape index: {}]   ;;  %s3079_s6 = inlined_call_operand.hbm [shape: f32[2,16,32], index: 6, kind: output, shape index: {}]  }
   0x1   :  { %3087 = sst [smem:[#allocation21_spill]] %s3079_s6 }
   0x2   :  { %11 = vsyncpa [#allocation6], 0 }
   0x3   :  { %13 = vsyncpa [#allocation6 + $0x1], 0 }
   0x4   :  { %14 = vsyncpa [#allocation9], 0 }
   0x5   :  { %15 = vsyncpa [#allocation12], 0 }
   0x6   :  { %16 = vsyncpa [#allocation7], 0 }
   0x7   :  { %18 = vsyncpa [#allocation7 + $0x1], 0  ;;  %s2509_s21 = smov 0   ;;  %s2511_s22 = smov 0  }
   0x8   :  { %s2513_s23 = smov 0   ;;  %s2515_s24 = smov 0  }
   0x9   :  { %s2517_s25 = smov 0   ;;  %s2519_s26 = smov 0  }
   0xa LB: > { %3088 = sst [smem:[#allocation19_spill]] %s2425_s21  ;;  %s1791_s27 = sadd.s32 4294967295, %s2445_s26   ;;  %s2445_s26 = sphi %s2519_s26, %s24_s26   ;;  %s2441_s25 = sphi %s2517_s25, %s3112_s25   ;;  %s2437_s24 = sphi %s2515_s24, %s3111_s24   ;;  %s2433_s23 = sphi %s2513_s23, %s3110_s23   ;;  %s2429_s22 = sphi %s2511_s22, %s3109_s22   ;;  %s2425_s21 = sphi %s2509_s21, %s3108_s21  }
   0xb   : > { %s1792_s28 = sadd.s32 4294967294, %s2445_s26   ;;  %p56_p0 = scmp.ne.s32.totalorder %s2429_s22, %s2425_s21 }
   0xc   : > { %p2543_p1 = scmp.eq.s32.totalorder %s1791_s27, 0  ;;  %p2547_p2 = scmp.eq.s32.totalorder %s1791_s27, 1 }
   0xd   : > { %p193_p3 = scmp.eq.s32.totalorder %s1792_s28, 1  ;;  %p1793_p5 = scmp.ge.s32.totalorder %s2445_s26, 1 }
   0xe   : > { %s3089_s29 = scalar_select %p2543_p1, 1, 0 }
   0xf   : > { %s3090_s30 = scalar_select %p2547_p2, 1, 0 }
  0x10   : > { %p2553_p4 = por %p2543_p1, %p56_p0  ;;  %p2558_p6 = por %p193_p3, %p56_p0 }
  0x11   : > { %p200_p7 = scmp.lt.s32.totalorder %s2445_s26, 3  ;;  %s2447_s10 = smov [#allocation8]  }
  0x12   : > { %s3091_s7 = scalar_select %p2553_p4, 1, 0 }
  0x13   : > { %s3092_s8 = scalar_select %p2558_p6, 1, 0 }
  0x14   : > { %p2563_p8 = pnand %p1793_p5, %p200_p7  ;;  %s212_s11 = sshll.u32 %s2447_s10, 4  ;;  %s2567_s11 = int_to_ptr.vmem [resolvable:$true] %s212_s11 }
  0x15   : > { %3093 = sst [smem:[#allocation20_spill]] %s3092_s8  ;;  %s2448_s13 = smov [#allocation11]  }
  0x16   : > { %s3094_s9 = scalar_select %p2563_p8, 1, 0 }
  0x17   : > { %p2037_p9 = pneg %p2563_p8  ;;  %s238_s14 = sshll.u32 %s2448_s13, 4  ;;  %s2578_s14 = int_to_ptr.vmem [resolvable:$true] %s238_s14 }
  0x18   : > { %s2449_s15 = smov [#allocation10]   ;;  %s2213_s19 = scalar_lea.hbm %s3074_s1, 256 }
  0x19   : > { %p2574_p11 = pnand %p2037_p9, %p2543_p1  ;;  %s2580_s16 = sshll.u32 %s2449_s15, 4  ;;  %s226_s16 = int_to_ptr.vmem [resolvable:$true] %s2580_s16 }
  0x1a   : > { %p2214_p12 = scmp.ne.s32.totalorder %s3074_s1, %s2213_s19  ;;  %p2220_p5 = scmp.lt.u32.totalorder %s2213_s19, %s3074_s1 }
  0x1b   : > { %p2590_p13 = pneg %p2574_p11 }
  0x1d   : > { %p2216_p0 = pnand %p2590_p13, %p2214_p12 }
  0x1f   : > { %p2217_p3 = pneg %p2216_p0 }
  0x21   : > { %p2222_p7 = pnand %p2220_p5, %p2217_p3 }
  0x23   : > { %2225 = shalt.err (!%p2222_p7)
}
  0x24   : > { %s2226_s15 = scalar_lea.vmem %s2567_s11, 256  ;;  %p2234_p1 = scmp.lt.s32.totalorder %s2567_s11, %s2567_s11 }
  0x25   : > { %p2227_p9 = scmp.ne.s32.totalorder %s2567_s11, %s2226_s15  ;;  %p2235_p4 = scmp.lt.s32.totalorder %s2226_s15, %s2226_s15 }
  0x27   : > { %p2229_p10 = pnand %p2227_p9, %p2590_p13  ;;  %p2236_p12 = por %p2235_p4, %p2234_p1 }
  0x29   : > { %p2230_p6 = pneg %p2229_p10 }
  0x2b   : > { %p2237_p0 = pnand %p2236_p12, %p2230_p6 }
  0x2d   : > { %2240 = shalt.err (!%p2237_p0)
}
  0x2e   : > { %s2450_s17 = smov 64   ;;  %s2451_s18 = smov 4  }
  0x2f   : > { %2040 = dma.hbm_to_vmem [thread:$0]  (!%p2574_p11), %s3074_s1, 256, %s2567_s11, [#allocation9], %s2450_s17, %s2450_s17, %s2451_s18  }
  0x30   : > { %s2241_s13 = scalar_lea.hbm %s3076_s3, 256 }
  0x31   : > { %p2242_p1 = scmp.ne.s32.totalorder %s3076_s3, %s2241_s13  ;;  %p2248_p10 = scmp.lt.u32.totalorder %s2241_s13, %s3076_s3 }
  0x33   : > { %p2244_p4 = pnand %p2242_p1, %p2590_p13 }
  0x35   : > { %p2245_p6 = pneg %p2244_p4 }
  0x37   : > { %p2250_p3 = pnand %p2248_p10, %p2245_p6 }
  0x39   : > { %2253 = shalt.err (!%p2250_p3)
}
  0x3a   : > { %s2254_s11 = scalar_lea.vmem %s2578_s14, 256  ;;  %p2262_p12 = scmp.lt.s32.totalorder %s2578_s14, %s2578_s14 }
  0x3b   : > { %p2255_p5 = scmp.ne.s32.totalorder %s2578_s14, %s2254_s11  ;;  %p2263_p0 = scmp.lt.s32.totalorder %s2254_s11, %s2254_s11 }
  0x3d   : > { %p2257_p7 = pnand %p2255_p5, %p2590_p13  ;;  %p2264_p1 = por %p2263_p0, %p2262_p12 }
  0x3f   : > { %p2258_p9 = pneg %p2257_p7 }
  0x41   : > { %p2265_p4 = pnand %p2264_p1, %p2258_p9 }
  0x43   : > { %2268 = shalt.err (!%p2265_p4)
}
  0x44   : > { %2046 = dma.hbm_to_vmem [thread:$0]  (!%p2574_p11), %s3076_s3, 256, %s2578_s14, [#allocation12], %s2450_s17, %s2450_s17, %s2451_s18  }
  0x45   : > { %s2269_s20 = scalar_lea.hbm %s3075_s2, 256 }
  0x46   : > { %p2270_p6 = scmp.ne.s32.totalorder %s3075_s2, %s2269_s20  ;;  %p2276_p5 = scmp.lt.u32.totalorder %s2269_s20, %s3075_s2 }
  0x48   : > { %p2272_p10 = pnand %p2270_p6, %p2590_p13 }
  0x4a   : > { %p2273_p3 = pneg %p2272_p10 }
  0x4c   : > { %p2278_p7 = pnand %p2276_p5, %p2273_p3 }
  0x4e   : > { %2281 = shalt.err (!%p2278_p7)
}
  0x4f   : > { %s2282_s11 = scalar_lea.vmem %s226_s16, 256  ;;  %p2290_p1 = scmp.lt.s32.totalorder %s226_s16, %s226_s16 }
  0x50   : > { %p2283_p9 = scmp.ne.s32.totalorder %s226_s16, %s2282_s11  ;;  %p2291_p4 = scmp.lt.s32.totalorder %s2282_s11, %s2282_s11 }
  0x52   : > { %p2285_p12 = pnand %p2283_p9, %p2590_p13  ;;  %p2292_p8 = por %p2291_p4, %p2290_p1 }
  0x54   : > { %p2286_p0 = pneg %p2285_p12 }
  0x56   : > { %p2293_p2 = pnand %p2292_p8, %p2286_p0 }
  0x58   : > { %2296 = shalt.err (!%p2293_p2)
}
  0x59   : > { %2043 = dma.hbm_to_vmem [thread:$0]  (!%p2574_p11), %s3075_s2, 256, %s226_s16, [#allocation9], %s2450_s17, %s2450_s17, %s2451_s18  }
  0x5a   : > { %s2452_s21 = smov [#allocation13]   ;;  %s2297_s27 = scalar_lea.hbm %s3077_s4, 256 }
  0x5b   : > { %s251_s8 = sshll.u32 %s2452_s21, 4  ;;  %p2298_p2 = scmp.ne.s32.totalorder %s3077_s4, %s2297_s27  ;;  %s252_s8 = int_to_ptr.vmem [resolvable:$true] %s251_s8 }
  0x5c   : > { %p2304_p10 = scmp.lt.u32.totalorder %s2297_s27, %s3077_s4 }
  0x5d   : > { %p2300_p8 = pnand %p2298_p2, %p2590_p13 }
  0x5f   : > { %p2301_p6 = pneg %p2300_p8 }
  0x61   : > { %p2306_p3 = pnand %p2304_p10, %p2301_p6 }
  0x63   : > { %2309 = shalt.err (!%p2306_p3)
}
  0x64   : > { %s2310_s16 = scalar_lea.vmem %s252_s8, 256  ;;  %p2318_p12 = scmp.lt.s32.totalorder %s252_s8, %s252_s8 }
  0x65   : > { %p2311_p5 = scmp.ne.s32.totalorder %s252_s8, %s2310_s16  ;;  %p2319_p0 = scmp.lt.s32.totalorder %s2310_s16, %s2310_s16 }
  0x67   : > { %p2313_p7 = pnand %p2311_p5, %p2590_p13  ;;  %p2320_p1 = por %p2319_p0, %p2318_p12 }
  0x69   : > { %p2314_p9 = pneg %p2313_p7 }
  0x6b   : > { %p2321_p4 = pnand %p2320_p1, %p2314_p9 }
  0x6d   : > { %2324 = shalt.err (!%p2321_p4)
}
  0x6e   : > { %2049 = dma.hbm_to_vmem [thread:$0]  (!%p2574_p11), %s3077_s4, 256, %s252_s8, [#allocation12], %s2450_s17, %s2450_s17, %s2451_s18  }
  0x6f   : > { %s36_s28 = sadd.s32 1, %s2441_s25  ;;  %s43_s12 = sadd.s32 1, %s2433_s23 }
  0x70   : > { %p38_p13 = scmp.ge.s32.totalorder %s36_s28, 2  ;;  %p50_p2 = scmp.ne.s32.totalorder %s2433_s23, %s2429_s22 }
  0x71   : > { %p51_p8 = scmp.eq.s32.totalorder %s2445_s26, 0  ;;  %p2062_p6 = scmp.lt.s32.totalorder %s2445_s26, 2 }
  0x72   : > { %s3114_s28 = smov (%p38_p13, %s36_s28), 0  ;;  %p3097_p3 = scmp.ne.s32.totalorder %s3090_s30, 0 }
  0x73   : > { %p52_p10 = por %p51_p8, %p50_p2  ;;  %s40_s19 = ssub.s32 %s2441_s25, %s3114_s28 }
  0x74   : > { %p2693_p5 = por %p3097_p3, %p50_p2  ;;  %s268_s20 = sand.u32 1, %s2433_s23  }
  0x75   : > { %p41_p7 = scmp.eq.s32.totalorder %s40_s19, 0  ;;  %s1799_s17 = sshll.u32 %s268_s20, 4 }
  0x76   : > { %s1843_s18 = sshll.u32 %s2441_s25, 8  ;;  %s272_s30 = scalar_lea.vmem [#allocation5], %s1799_s17 }
  0x77   : > { %s2702_s8 = scalar_select %p41_p7, %s2433_s23, %s43_s12  }
  0x78   : > { %s2707_s13 = scalar_lea.hbm %s3073_s0, %s1843_s18  ;;  %s279_s15 = sshll.u32 %s272_s30, 4  ;;  %s2715_s15 = int_to_ptr.vmem [resolvable:$true] %s279_s15 }
  0x79   : > { %p2711_p11 = pnand %p2062_p6, %p52_p10  ;;  %s2717_s16 = scalar_lea.sflag [#allocation6], %s268_s20 }
  0x7a   : > { %s2325_s14 = scalar_lea.hbm %s2707_s13, 256  ;;  %s2330_s19 = scalar_lea.hbm %s3073_s0, 512 }
  0x7b   : > { %p2326_p9 = scmp.ne.s32.totalorder %s2707_s13, %s2325_s14  ;;  %p2327_p12 = pneg %p2711_p11 }
  0x7c   : > { %p2331_p4 = scmp.lt.u32.totalorder %s2707_s13, %s3073_s0  ;;  %p2332_p13 = scmp.lt.u32.totalorder %s2330_s19, %s2325_s14 }
  0x7d   : > { %p2328_p0 = pnand %p2327_p12, %p2326_p9  ;;  %p2334_p8 = scmp.lt.u32.totalorder %s2325_s14, %s2707_s13 }
  0x7e   : > { %p2333_p2 = por %p2332_p13, %p2331_p4 }
  0x7f   : > { %p2329_p1 = pneg %p2328_p0 }
  0x80   : > { %p2335_p6 = por %p2334_p8, %p2333_p2 }
  0x82   : > { %p2336_p10 = pnand %p2335_p6, %p2329_p1 }
  0x84   : > { %2339 = shalt.err (!%p2336_p10)
}
  0x85   : > { %s2340_s20 = scalar_lea.vmem %s2715_s15, 256  ;;  %s2453_s27 = smov [#allocation5]  }
  0x86   : > { %p2341_p3 = scmp.ne.s32.totalorder %s2715_s15, %s2340_s20  ;;  %s2345_s10 = sshll.u32 %s2453_s27, 4  ;;  %s2346_s10 = int_to_ptr.vmem [resolvable:$false] %s2345_s10 }
  0x87   : > { %s2347_s30 = scalar_lea.vmem %s2346_s10, 512  ;;  %p2348_p0 = scmp.lt.s32.totalorder %s2715_s15, %s2346_s10 }
  0x88   : > { %p2343_p7 = pnand %p2341_p3, %p2327_p12  ;;  %p2349_p4 = scmp.lt.s32.totalorder %s2347_s30, %s2340_s20 }
  0x8a   : > { %p2344_p9 = pneg %p2343_p7  ;;  %p2350_p13 = por %p2349_p4, %p2348_p0 }
  0x8c   : > { %p2351_p2 = pnand %p2350_p13, %p2344_p9 }
  0x8e   : > { %2354 = shalt.err (!%p2351_p2)
}
  0x8f   : > { %s2454_s14 = smov 128   ;;  %s2455_s6 = smov 8  }
  0x90   : > { %2053 = dma.hbm_to_vmem [thread:$0]  (!%p2711_p11), %s2707_s13, 256, %s2715_s15, %s2717_s16, %s2454_s14, %s2454_s14, %s2455_s6  }
  0x91   : > { %p3100_p12 = scmp.ne.s32.totalorder %s3094_s9, 0 }
  0x92   : > { %s2748_s12 = sand.u32 (!%p3100_p12), 1, %s2429_s22   ;;  %p3101_p1 = scmp.ne.s32.totalorder (!%p3100_p12), %s3091_s7, 0 }
  0x93   : > { %291 = sbr.rel (%p3100_p12) target bundleno = 1546 (0x60a), region = 44  ;;  %s1803_s19 = sshll.u32 (!%p3100_p12), %s2748_s12, 4 }
  0x94   : > { %s294_s17 = scalar_lea.sflag (!%p3100_p12), [#allocation6], %s2748_s12  ;;  %s297_s18 = scalar_lea.vmem (!%p3100_p12), [#allocation5], %s1803_s19 }
  0x9a   : > { %2408 = dma.done.wait (%p3101_p1), %s294_s17, 256  }
  0x9b   : > { %2410 = vsyncadd (%p3101_p1), %s294_s17, 4294967040  ;;  %p3102_p11 = scmp.ne.s32.totalorder %s3089_s29, 0 }
  0x9d   : > { %2412 = dma.done.wait (%p3102_p11), [#allocation9], 512  }
  0x9e   : > { %2414 = vsyncadd (%p3102_p11), [#allocation9], 4294966784 }
  0x9f   : > { %2416 = dma.done.wait (%p3102_p11), [#allocation12], 512  }
  0xa0   : > { %2418 = vsyncadd (%p3102_p11), [#allocation12], 4294966784  ;;  %v2456_v0 = vmov 0.0   ;;  %vm2457_vm0 = vmmov 0   ;;  %v2141_v1 = vld [vmem:[#allocation10] sm:$0xff]   ;;  %v2142_v2 = vld [vmem:[#allocation10 + $0x8] sm:$0xff]  }
  0xa1   : > { %1889 = vmatprep.subr.bf16.mxu0 %v2456_v0  ;;  %1893 = vmatprep.mubr.msk.bf16.mxu0 %vm2457_vm0, %v2456_v0  ;;  %v348_v3 = vld [vmem:[%s297_s18] sm:$0xff]  ;;  %v349_v4 = vld [vmem:[%s297_s18 + $0x8] sm:$0xff]  ;;  %vm367_vm1 = vcmask 261120   ;;  %vm540_vm2 = vcmask 31744   ;;  %s2458_s29 = smov 120   ;;  %s2459_s7 = smov 124  }
  0xa2   : > { %1897 = vmatprep.subr.bf16.mxu1 %v2456_v0  ;;  %1901 = vmatprep.mubr.msk.bf16.mxu1 %vm2457_vm0, %v2456_v0  ;;  %v2143_v5 = vld [vmem:[#allocation8] sm:$0xff]   ;;  %v350_v6 = vpack.c.bf16 %v349_v4, %v348_v3  ;;  %v2146_v8 = vld [vmem:[#allocation11 + $0x8] sm:$0xff]   ;;  %s2460_s9 = smov 116   ;;  %s2461_s13 = smov 112   ;;  %vm588_vm3 = vcmask 130048   ;;  %vm789_vm4 = vcmask 64544  }
  0xa3   : > { %1890 = vmatpush3.bf16.msra.mxu0 %v2141_v1  ;;  %v2145_v7 = vld [vmem:[#allocation11] sm:$0xff]   ;;  %v2144_v9 = vld [vmem:[#allocation8 + $0x8] sm:$0xff]   ;;  %s2462_s15 = smov 108   ;;  %s2463_s11 = smov 104   ;;  %vm921_vm5 = vcmask 97344   ;;  %vm1053_vm6 = vcmask 130144  }
  0xa4   : > { %1891 = vmatprep.subr.bf16.mxu0 %v2456_v0  ;;  %1898 = vmatpush3.bf16.msra.mxu1 %v2145_v7  ;;  %s2464_s16 = smov 100   ;;  %s2465_s20 = smov 4   ;;  %vm1185_vm7 = vcmask 162944   ;;  %vm1317_vm8 = vcmask 195744   ;;  %vm1449_vm9 = vcmask 228544   ;;  %vm1581_vm10 = vcmask 261344  }
  0xa5   : > { %1899 = vmatprep.subr.bf16.mxu1 %v2456_v0  ;;  %s2466_s27 = smov 8   ;;  %s2467_s10 = smov 12  }
  0xa6   : > { %s2468_s30 = smov 16   ;;  %s2469_s14 = smov 20  }
  0xa7   : > { %1892 = vmatpush3.bf16.msra.mxu0 %v2142_v2  ;;  %s2470_s6 = smov 24   ;;  %s2471_s17 = smov 28  }
  0xa8   : > { %1905 = vmatprep.subr.bf16.mxu0 %v2456_v0  ;;  %1900 = vmatpush3.bf16.msra.mxu1 %v2146_v8 }
  0xa9   : > { %1913 = vmatprep.subr.bf16.mxu1 %v2456_v0 }
  0xaa   : > { %1894 = vmatmul.mubr.msk.bf16.vlgmr.msra.gmra.mrb[0].mxu0 %vm367_vm1, %v350_v6 }
  0xab   : > { %1906 = vmatpush3.bf16.msra.mxu0 %v2143_v5  ;;  %1909 = vmatprep.mubr.msk.bf16.mxu0 %vm2457_vm0, %v2456_v0 }
  0xac   : > { %1907 = vmatprep.subr.bf16.mxu0 %v2456_v0  ;;  %1902 = vmatmul.mubr.msk.bf16.vlgmr.msra.gmra.mrb[0].mxu1 %vm367_vm1, %v350_v6 }
  0xad   : > { %1915 = vmatprep.mubr.msk.bf16.mxu1 %vm2457_vm0, %v2456_v0 }
  0xaf   : > { %1908 = vmatpush3.bf16.msra.mxu0 %v2144_v9 }
  0xb0   : > { %1919 = vmatprep.subr.bf16.mxu0 %v2456_v0 }
  0xb2   : > { %1910 = vmatmul.mubr.msk.bf16.vlgmr.msra.gmra.mrb[4].mxu0 %vm367_vm1, %v350_v6 }
  0xb3   : > { %1921 = vmatprep.mubr.msk.bf16.mxu0 %vm2457_vm0, %v2456_v0 }
 0x17d   : > { %v405_v10 = vpop.f32.mrb[0].mxu0 }
 0x17e   : > { %v1895_v11 = vpop.f32.mrb[1].mxu0 }
 0x17f   : > { %v408_v12 = vpop.f32.mrb[2].mxu0  ;;  %v464_v22 = vpop.f32.mrb[0].mxu1 }
 0x180   : > { %v412_v13 = vpack.c.bf16 %v408_v12, %v405_v10  ;;  %v1896_v14 = vpop.f32.mrb[3].mxu0  ;;  %v1903_v23 = vpop.f32.mrb[1].mxu1 }
 0x181   : > { %v467_v24 = vpop.f32.mrb[2].mxu1 }
 0x182   : > { %413 = vst.msk [vmem:[#allocation2] sm:$0xff] %vm367_vm1, %v412_v13  ;;  %v471_v25 = vpack.c.bf16 %v467_v24, %v464_v22  ;;  %v1904_v26 = vpop.f32.mrb[3].mxu1 }
 0x184   : > { %472 = vst.msk [vmem:[#allocation3] sm:$0xff] %vm367_vm1, %v471_v25 }
 0x185   : > { %v530_v15 = vpop.f32.mrb[4].mxu0 }
 0x186   : > { %v1911_v16 = vpop.f32.mrb[5].mxu0 }
 0x187   : > { %v533_v17 = vpop.f32.mrb[6].mxu0 }
 0x188   : > { %v537_v18 = vpack.c.bf16 %v533_v17, %v530_v15  ;;  %v1912_v19 = vpop.f32.mrb[7].mxu0 }
 0x189   : > { %v791_v20 = vld [vmem:[#allocation2] sm:$0xff] }
 0x18a   : > { %796 = vrot.lane.b32.xlu1 %v791_v20, %s2458_s29  ;;  %664 = vrot.lane.b32.xlu0 %v791_v20, %s2459_s7  ;;  %v545_v21 = vsel %vm540_vm2, %v791_v20, 0 }
 0x18b   : > { %1914 = vmatpush3.bf16.xpose.msra.mxu1 %v545_v21  ;;  %v2806_v27 = vld [vmem:[#allocation3] sm:$0xff] }
 0x18c   : > { %1925 = vmatprep.subr.bf16.mxu1 %v2456_v0  ;;  %1920 = vmatpush3.bf16.msra.mxu0 %v2806_v27 }
 0x18d   : > { %1931 = vmatprep.subr.bf16.mxu0 %v2456_v0 }
 0x18e   : > { %793 = vrot.lane.b32.xlu1 %v537_v18, %s2458_s29  ;;  %661 = vrot.lane.b32.xlu0 %v537_v18, %s2459_s7 }
 0x192   : > { %925 = vrot.lane.b32.xlu1 %v537_v18, %s2460_s9  ;;  %928 = vrot.lane.b32.xlu0 %v791_v20, %s2460_s9 }
 0x193   : > { %1916 = vmatmul.mubr.msk.bf16.vlgmr.msra.gmra.mrb[4].mxu1 %vm540_vm2, %v537_v18 }
 0x194   : > { %1927 = vmatprep.mubr.msk.bf16.mxu1 %vm2457_vm0, %v2456_v0 }
 0x196   : > { %1057 = vrot.lane.b32.xlu1 %v537_v18, %s2461_s13  ;;  %1060 = vrot.lane.b32.xlu0 %v791_v20, %s2461_s13 }
 0x19a   : > { %1189 = vrot.lane.b32.xlu1 %v537_v18, %s2462_s15  ;;  %1192 = vrot.lane.b32.xlu0 %v791_v20, %s2462_s15 }
 0x19e   : > { %1321 = vrot.lane.b32.xlu1 %v537_v18, %s2463_s11  ;;  %1324 = vrot.lane.b32.xlu0 %v791_v20, %s2463_s11 }
 0x1a2   : > { %1453 = vrot.lane.b32.xlu1 %v537_v18, %s2464_s16  ;;  %1456 = vrot.lane.b32.xlu0 %v791_v20, %s2464_s16 }
 0x1a6   : > { %733 = vrot.lane.b32.xlu1 %v2806_v27, %s2459_s7  ;;  %865 = vrot.lane.b32.xlu0 %v2806_v27, %s2458_s29  ;;  %s341_s7 = scalar_lea.vmem [#allocation14], %s1803_s19 }
 0x1aa   : > { %997 = vrot.lane.b32.xlu1 %v2806_v27, %s2460_s9  ;;  %s1669_s9 = sshll.u32 %s341_s7, 4  ;;  %s3016_s9 = int_to_ptr.vmem [resolvable:$true] %s1669_s9 }
 0x1fc   : > { %v665_v28 = vpop.permute.xlu0 %664  ;;  %v797_v30 = vpop.permute.xlu1 %796 }
 0x1fd   : > { %v670_v29 = vsel %vm540_vm2, %v665_v28, 0  ;;  %v802_v32 = vsel %vm540_vm2, %v797_v30, 0 }
 0x1fe   : > { %1926 = vmatpush3.bf16.xpose.msra.mxu1 %v670_v29 }
 0x1ff   : > { %1937 = vmatprep.subr.bf16.mxu1 %v2456_v0 }
 0x200   : > { %v662_v31 = vpop.permute.xlu0 %661  ;;  %v794_v34 = vpop.permute.xlu1 %793 }
 0x204   : > { %v929_v33 = vpop.permute.xlu0 %928  ;;  %v926_v37 = vpop.permute.xlu1 %925 }
 0x205   : > { %1928 = vmatmul.mubr.msk.bf16.vlgmr.msra.gmra.mrb[8].mxu1 %vm540_vm2, %v662_v31  ;;  %v934_v35 = vsel %vm540_vm2, %v929_v33, 0 }
 0x206   : > { %1938 = vmatpush3.bf16.xpose.msra.mxu1 %v802_v32  ;;  %1939 = vmatprep.mubr.msk.bf16.mxu1 %vm2457_vm0, %v2456_v0 }
 0x207   : > { %1949 = vmatprep.subr.bf16.mxu1 %v2456_v0 }
 0x208   : > { %v1061_v36 = vpop.permute.xlu0 %1060  ;;  %v1058_v40 = vpop.permute.xlu1 %1057 }
 0x209   : > { %v1066_v38 = vsel %vm540_vm2, %v1061_v36, 0 }
 0x20c   : > { %v1193_v39 = vpop.permute.xlu0 %1192  ;;  %v1190_v43 = vpop.permute.xlu1 %1189 }
 0x20d   : > { %1940 = vmatmul.mubr.msk.bf16.vlgmr.msra.gmra.mrb[12].mxu1 %vm540_vm2, %v794_v34  ;;  %v1198_v41 = vsel %vm540_vm2, %v1193_v39, 0 }
 0x20e   : > { %1950 = vmatpush3.bf16.xpose.msra.mxu1 %v934_v35  ;;  %1951 = vmatprep.mubr.msk.bf16.mxu1 %vm2457_vm0, %v2456_v0 }
 0x20f   : > { %1961 = vmatprep.subr.bf16.mxu1 %v2456_v0 }
 0x210   : > { %v1325_v42 = vpop.permute.xlu0 %1324  ;;  %v1322_v46 = vpop.permute.xlu1 %1321 }
 0x211   : > { %v1330_v44 = vsel %vm540_vm2, %v1325_v42, 0 }
 0x214   : > { %v1457_v45 = vpop.permute.xlu0 %1456  ;;  %v1454_v48 = vpop.permute.xlu1 %1453 }
 0x215   : > { %1952 = vmatmul.mubr.msk.bf16.vlgmr.msra.gmra.mrb[16].mxu1 %vm540_vm2, %v926_v37  ;;  %v1462_v47 = vsel %vm540_vm2, %v1457_v45, 0 }
 0x216   : > { %1962 = vmatpush3.bf16.xpose.msra.mxu1 %v1066_v38  ;;  %1963 = vmatprep.mubr.msk.bf16.mxu1 %vm2457_vm0, %v2456_v0 }
 0x217   : > { %1973 = vmatprep.subr.bf16.mxu1 %v2456_v0 }
 0x218   : > { %v734_v10 = vpop.permute.xlu1 %733  ;;  %v2876_v11 = vpop.permute.xlu0 %865 }
 0x21c   : > { %v2880_v14 = vpop.permute.xlu1 %997 }
 0x21d   : > { %1964 = vmatmul.mubr.msk.bf16.vlgmr.msra.gmra.mrb[20].mxu1 %vm540_vm2, %v1058_v40 }
 0x21e   : > { %1974 = vmatpush3.bf16.xpose.msra.mxu1 %v1198_v41  ;;  %1975 = vmatprep.mubr.msk.bf16.mxu1 %vm2457_vm0, %v2456_v0 }
 0x21f   : > { %1985 = vmatprep.subr.bf16.mxu1 %v2456_v0 }
 0x225   : > { %1976 = vmatmul.mubr.msk.bf16.vlgmr.msra.gmra.mrb[24].mxu1 %vm540_vm2, %v1190_v43 }
 0x226   : > { %1986 = vmatpush3.bf16.xpose.msra.mxu1 %v1330_v44  ;;  %1987 = vmatprep.mubr.msk.bf16.mxu1 %vm2457_vm0, %v2456_v0 }
 0x227   : > { %1997 = vmatprep.subr.bf16.mxu1 %v2456_v0 }
 0x22d   : > { %1988 = vmatmul.mubr.msk.bf16.vlgmr.msra.gmra.mrb[28].mxu1 %vm540_vm2, %v1322_v46 }
 0x22e   : > { %1998 = vmatpush3.bf16.xpose.msra.mxu1 %v1462_v47  ;;  %1999 = vmatprep.mubr.msk.bf16.mxu1 %vm2457_vm0, %v2456_v0 }
 0x22f   : > { %2009 = vmatprep.subr.bf16.mxu1 %v2456_v0 }
 0x235   : > { %2000 = vmatmul.mubr.msk.bf16.vlgmr.msra.gmra.mrb[32].mxu1 %vm540_vm2, %v1454_v48 }
 0x236   : > { %2013 = vmatprep.mubr.msk.bf16.mxu1 %vm2457_vm0, %v2456_v0 }
 0x266   : > { %v581_v49 = vpop.f32.mrb[4].mxu1 }
 0x267   : > { %v1917_v50 = vpop.f32.mrb[5].mxu1  ;;  %v589_v51 = vsel %vm588_vm3, %v581_v49, -inf }
 0x268   : > { %590 = vmax.xlane.f32.xlu0 %v589_v51  ;;  %v584_v52 = vpop.f32.mrb[6].mxu1 }
 0x269   : > { %v1918_v53 = vpop.f32.mrb[7].mxu1  ;;  %v592_v54 = vsel %vm588_vm3, %v584_v52, -inf }
 0x26a   : > { %593 = vmax.xlane.f32.xlu1 %v592_v54 }
 0x2d8   : > { %v2852_v55 = vpop.f32.mrb[8].mxu1 }
 0x2d9   : > { %v1929_v56 = vpop.f32.mrb[9].mxu1  ;;  %v713_v57 = vsel %vm588_vm3, %v2852_v55, -inf }
 0x2da   : > { %714 = vmax.xlane.f32.xlu0 %v713_v57  ;;  %v2856_v58 = vpop.f32.mrb[10].mxu1 }
 0x2db   : > { %v1930_v59 = vpop.f32.mrb[11].mxu1  ;;  %v716_v60 = vsel %vm588_vm3, %v2856_v58, -inf }
 0x2de   : > { %717 = vmax.xlane.f32.xlu0 %v716_v60 }
 0x2e0   : > { %v2860_v61 = vpop.f32.mrb[12].mxu1 }
 0x2e1   : > { %v1941_v62 = vpop.f32.mrb[13].mxu1  ;;  %v845_v63 = vsel %vm588_vm3, %v2860_v61, -inf }
 0x2e2   : > { %846 = vmax.xlane.f32.xlu1 %v845_v63  ;;  %v2864_v1 = vpop.f32.mrb[14].mxu1 }
 0x2e3   : > { %v1942_v2 = vpop.f32.mrb[15].mxu1  ;;  %v848_v3 = vsel %vm588_vm3, %v2864_v1, -inf }
 0x2e4   : > { %849 = vmax.xlane.f32.xlu0 %v848_v3 }
 0x2e8   : > { %v2868_v4 = vpop.f32.mrb[16].mxu1 }
 0x2e9   : > { %v1953_v5 = vpop.f32.mrb[17].mxu1  ;;  %v977_v6 = vsel %vm588_vm3, %v2868_v4, -inf }
 0x2ea   : > { %978 = vmax.xlane.f32.xlu1 %v977_v6  ;;  %v2872_v7 = vpop.f32.mrb[18].mxu1 }
 0x2eb   : > { %v1954_v8 = vpop.f32.mrb[19].mxu1  ;;  %v980_v9 = vsel %vm588_vm3, %v2872_v7, -inf }
 0x2ec   : > { %981 = vmax.xlane.f32.xlu0 %v980_v9 }
 0x2f0   : > { %v2878_v12 = vpop.f32.mrb[20].mxu1 }
 0x2f1   : > { %v1965_v13 = vpop.f32.mrb[21].mxu1  ;;  %v1109_v15 = vsel %vm588_vm3, %v2878_v12, -inf }
 0x2f2   : > { %1110 = vmax.xlane.f32.xlu1 %v1109_v15  ;;  %v2884_v16 = vpop.f32.mrb[22].mxu1 }
 0x2f3   : > { %v1966_v17 = vpop.f32.mrb[23].mxu1  ;;  %v1112_v18 = vsel %vm588_vm3, %v2884_v16, -inf }
 0x2f4   : > { %1113 = vmax.xlane.f32.xlu0 %v1112_v18 }
 0x2f5   : > { %v591_v19 = vpop.xlane.xlu0 %590 }
 0x2f6   : > { %v595_v20 = vsub.f32 %v581_v49, %v591_v19 }
 0x2f7   : > { %v594_v21 = vpop.xlane.xlu1 %593 }
 0x2f8   : > { %v597_v22 = vmul.f32 1.442695, %v595_v20  ;;  %v596_v23 = vsub.f32 %v584_v52, %v594_v21  ;;  %v2888_v24 = vpop.f32.mrb[24].mxu1 }
 0x2f9   : > { %v1977_v25 = vpop.f32.mrb[25].mxu1  ;;  %v1241_v26 = vsel %vm588_vm3, %v2888_v24, -inf }
 0x2fa   : > { %v599_v28 = vmul.f32 1.442695, %v596_v23  ;;  %1242 = vmax.xlane.f32.xlu0 %v1241_v26  ;;  %v2892_v29 = vpop.f32.mrb[26].mxu1  ;;  %2149 = vpow2.f32 %v597_v22 }
 0x2fb   : > { %v1978_v30 = vpop.f32.mrb[27].mxu1  ;;  %v1244_v31 = vsel %vm588_vm3, %v2892_v29, -inf }
 0x2fc   : > { %2151 = vpow2.f32 %v599_v28 }
 0x2fe   : > { %1245 = vmax.xlane.f32.xlu0 %v1244_v31 }
 0x300   : > { %v2896_v32 = vpop.f32.mrb[28].mxu1 }
 0x301   : > { %v1989_v33 = vpop.f32.mrb[29].mxu1  ;;  %v1373_v46 = vsel %vm588_vm3, %v2896_v32, -inf }
 0x302   : > { %v2898_v34 = vpop.f32.mrb[30].mxu1 }
 0x303   : > { %1129 = vrot.lane.b32.xlu1 %v2806_v27, %s2461_s13  ;;  %v1990_v35 = vpop.f32.mrb[31].mxu1  ;;  %v1376_v36 = vsel %vm588_vm3, %v2898_v34, -inf  ;;  %s1844_s13 = sshll.u32 %s2437_s24, 8  ;;  %s1654_s24 = scalar_lea.sflag [#allocation7], %s2748_s12 }
 0x304   : > { %1377 = vmax.xlane.f32.xlu0 %v1376_v36  ;;  %v2904_v37 = vpop.eup %2149 }
 0x306   : > { %v2906_v38 = vpop.eup %2151 }
 0x307   : > { %v607_v39 = vpack.c.bf16 %v2906_v38, %v2904_v37 }
 0x308   : > { %v2910_v40 = vpop.f32.mrb[32].mxu1 }
 0x309   : > { %1922 = vmatmul.mubr.msk.bf16.vlgmr.msra.gmra.mrb[8].mxu0 %vm588_vm3, %v607_v39  ;;  %v2001_v41 = vpop.f32.mrb[33].mxu1  ;;  %v1505_v42 = vsel %vm588_vm3, %v2910_v40, -inf }
 0x30a   : > { %1506 = vmax.xlane.f32.xlu0 %v1505_v42  ;;  %v2915_v43 = vpop.f32.mrb[34].mxu1  ;;  %1932 = vmatpush3.bf16.msra.mxu0 %v734_v10 }
 0x30b   : > { %v2002_v44 = vpop.f32.mrb[35].mxu1  ;;  %1933 = vmatprep.mubr.msk.bf16.mxu0 %vm2457_vm0, %v2456_v0  ;;  %1943 = vmatprep.subr.bf16.mxu0 %v2456_v0  ;;  %v1508_v45 = vsel %vm588_vm3, %v2915_v43, -inf }
 0x30e   : > { %1509 = vmax.xlane.f32.xlu0 %v1508_v45 }
 0x324   : > { %1261 = vrot.lane.b32.xlu0 %v2806_v27, %s2462_s15 }
 0x327   : > { %1374 = vmax.xlane.f32.xlu1 %v1373_v46 }
 0x338   : > { %1393 = vrot.lane.b32.xlu1 %v2806_v27, %s2463_s11 }
 0x33c   : > { %1525 = vrot.lane.b32.xlu1 %v2806_v27, %s2464_s16  ;;  %s3103_s16 = sld [smem:[#allocation21_spill]] }
 0x342   : > { %s3022_s19 = scalar_lea.hbm %s3103_s16, %s1844_s13 }
 0x367   : > { %v715_v47 = vpop.xlane.xlu0 %714 }
 0x368   : > { %v719_v48 = vsub.f32 %v2852_v55, %v715_v47 }
 0x36a   : > { %v721_v49 = vmul.f32 1.442695, %v719_v48 }
 0x36b   : > { %v718_v50 = vpop.xlane.xlu0 %717 }
 0x36c   : > { %2153 = vpow2.f32 %v721_v49  ;;  %v720_v51 = vsub.f32 %v2856_v58, %v718_v50 }
 0x36e   : > { %v723_v52 = vmul.f32 1.442695, %v720_v51 }
 0x36f   : > { %v847_v53 = vpop.xlane.xlu1 %846 }
 0x370   : > { %2155 = vpow2.f32 %v723_v52  ;;  %v851_v54 = vsub.f32 %v2860_v61, %v847_v53 }
 0x371   : > { %v850_v56 = vpop.xlane.xlu0 %849 }
 0x372   : > { %v853_v57 = vmul.f32 1.442695, %v851_v54  ;;  %v852_v59 = vsub.f32 %v2864_v1, %v850_v56 }
 0x374   : > { %2157 = vpow2.f32 %v853_v57  ;;  %v855_v60 = vmul.f32 1.442695, %v852_v59 }
 0x376   : > { %v2154_v27 = vpop.eup %2153  ;;  %2159 = vpow2.f32 %v855_v60 }
 0x377   : > { %v979_v62 = vpop.xlane.xlu1 %978  ;;  %v725_v55 = vsel %vm588_vm3, %v2154_v27, 0.0 }
 0x378   : > { %v983_v63 = vsub.f32 %v2868_v4, %v979_v62  ;;  %726 = vadd.xlane.f32.xlu1 %v725_v55 }
 0x379   : > { %v982_v58 = vpop.xlane.xlu0 %981 }
 0x37a   : > { %v2156_v2 = vpop.eup %2155  ;;  %v985_v3 = vmul.f32 1.442695, %v983_v63  ;;  %v984_v5 = vsub.f32 %v2872_v7, %v982_v58 }
 0x37b   : > { %v728_v61 = vsel %vm588_vm3, %v2156_v2, 0.0  ;;  %v731_v6 = vpack.c.bf16 %v2156_v2, %v2154_v27  ;;  %v604_v27 = vsel %vm588_vm3, %v2906_v38, 0.0  ;;  %v601_v38 = vsel %vm588_vm3, %v2904_v37, 0.0 }
 0x37c   : > { %2161 = vpow2.f32 %v985_v3  ;;  %v987_v1 = vmul.f32 1.442695, %v984_v5  ;;  %729 = vadd.xlane.f32.xlu0 %v728_v61 }
 0x37d   : > { %1934 = vmatmul.mubr.msk.bf16.vlgmr.msra.gmra.mrb[12].mxu0 %vm588_vm3, %v731_v6 }
 0x37e   : > { %v2158_v8 = vpop.eup %2157  ;;  %2163 = vpow2.f32 %v987_v1  ;;  %1944 = vmatpush3.bf16.msra.mxu0 %v2876_v11  ;;  %1945 = vmatprep.mubr.msk.bf16.mxu0 %vm2457_vm0, %v2456_v0 }
 0x37f   : > { %v1111_v4 = vpop.xlane.xlu1 %1110  ;;  %v857_v9 = vsel %vm588_vm3, %v2158_v8, 0.0  ;;  %1955 = vmatprep.subr.bf16.mxu0 %v2456_v0 }
 0x380   : > { %v2160_v7 = vpop.eup %2159  ;;  %v1115_v10 = vsub.f32 %v2878_v12, %v1111_v4  ;;  %858 = vadd.xlane.f32.xlu1 %v857_v9 }
 0x381   : > { %v1114_v13 = vpop.xlane.xlu0 %1113  ;;  %v863_v15 = vpack.c.bf16 %v2160_v7, %v2158_v8  ;;  %v860_v19 = vsel %vm588_vm3, %v2160_v7, 0.0 }
 0x382   : > { %v1117_v17 = vmul.f32 1.442695, %v1115_v10  ;;  %v1116_v18 = vsub.f32 %v2884_v16, %v1114_v13 }
 0x383   : > { %v1130_v30 = vpop.permute.xlu1 %1129 }
 0x384   : > { %2165 = vpow2.f32 %v1117_v17  ;;  %v1119_v11 = vmul.f32 1.442695, %v1116_v18  ;;  %861 = vadd.xlane.f32.xlu1 %v860_v19 }
 0x385   : > { %1946 = vmatmul.mubr.msk.bf16.vlgmr.msra.gmra.mrb[16].mxu0 %vm588_vm3, %v863_v15 }
 0x386   : > { %v2162_v20 = vpop.eup %2161  ;;  %2167 = vpow2.f32 %v1119_v11  ;;  %1956 = vmatpush3.bf16.msra.mxu0 %v2880_v14  ;;  %1957 = vmatprep.mubr.msk.bf16.mxu0 %vm2457_vm0, %v2456_v0 }
 0x387   : > { %v1243_v12 = vpop.xlane.xlu0 %1242  ;;  %v989_v21 = vsel %vm588_vm3, %v2162_v20, 0.0  ;;  %1967 = vmatprep.subr.bf16.mxu0 %v2456_v0 }
 0x388   : > { %v2164_v16 = vpop.eup %2163  ;;  %v1247_v22 = vsub.f32 %v2888_v24, %v1243_v12  ;;  %990 = vadd.xlane.f32.xlu0 %v989_v21 }
 0x389   : > { %v992_v23 = vsel %vm588_vm3, %v2164_v16, 0.0  ;;  %v995_v25 = vpack.c.bf16 %v2164_v16, %v2162_v20 }
 0x38a   : > { %v1249_v26 = vmul.f32 1.442695, %v1247_v22  ;;  %993 = vadd.xlane.f32.xlu1 %v992_v23 }
 0x38b   : > { %v1246_v28 = vpop.xlane.xlu0 %1245 }
 0x38c   : > { %2169 = vpow2.f32 %v1249_v26  ;;  %v1248_v14 = vsub.f32 %v2892_v29, %v1246_v28 }
 0x38d   : > { %1958 = vmatmul.mubr.msk.bf16.vlgmr.msra.gmra.mrb[20].mxu0 %vm588_vm3, %v995_v25 }
 0x38e   : > { %v2166_v31 = vpop.eup %2165  ;;  %v1251_v33 = vmul.f32 1.442695, %v1248_v14  ;;  %1968 = vmatpush3.bf16.msra.mxu0 %v1130_v30  ;;  %1969 = vmatprep.mubr.msk.bf16.mxu0 %vm2457_vm0, %v2456_v0 }
 0x38f   : > { %v1121_v24 = vsel %vm588_vm3, %v2166_v31, 0.0  ;;  %1979 = vmatprep.subr.bf16.mxu0 %v2456_v0 }
 0x390   : > { %v2168_v35 = vpop.eup %2167  ;;  %2171 = vpow2.f32 %v1251_v33  ;;  %1122 = vadd.xlane.f32.xlu0 %v1121_v24 }
 0x391   : > { %v1378_v36 = vpop.xlane.xlu0 %1377  ;;  %v1124_v39 = vsel %vm588_vm3, %v2168_v35, 0.0  ;;  %v1127_v29 = vpack.c.bf16 %v2168_v35, %v2166_v31 }
 0x392   : > { %v1380_v41 = vsub.f32 %v2898_v34, %v1378_v36  ;;  %1125 = vadd.xlane.f32.xlu1 %v1124_v39 }
 0x394   : > { %v1383_v42 = vmul.f32 1.442695, %v1380_v41 }
 0x395   : > { %1970 = vmatmul.mubr.msk.bf16.vlgmr.msra.gmra.mrb[24].mxu0 %vm588_vm3, %v1127_v29 }
 0x396   : > { %v2170_v44 = vpop.eup %2169  ;;  %2173 = vpow2.f32 %v1383_v42  ;;  %1981 = vmatprep.mubr.msk.bf16.mxu0 %vm2457_vm0, %v2456_v0 }
 0x397   : > { %v1507_v45 = vpop.xlane.xlu0 %1506  ;;  %v1253_v46 = vsel %vm588_vm3, %v2170_v44, 0.0 }
 0x398   : > { %v1511_v47 = vsub.f32 %v2910_v40, %v1507_v45  ;;  %1254 = vadd.xlane.f32.xlu0 %v1253_v46 }
 0x39a   : > { %v2172_v48 = vpop.eup %2171  ;;  %v1513_v49 = vmul.f32 1.442695, %v1511_v47 }
 0x39b   : > { %v1510_v50 = vpop.xlane.xlu0 %1509  ;;  %v1256_v34 = vsel %vm588_vm3, %v2172_v48, 0.0  ;;  %v1259_v51 = vpack.c.bf16 %v2172_v48, %v2170_v44 }
 0x39c   : > { %v1512_v52 = vsub.f32 %v2915_v43, %v1510_v50  ;;  %1257 = vadd.xlane.f32.xlu1 %v1256_v34  ;;  %2175 = vpow2.f32 %v1513_v49 }
 0x39e   : > { %v1515_v53 = vmul.f32 1.442695, %v1512_v52 }
 0x39f   : > { %v1262_v54 = vpop.permute.xlu0 %1261 }
 0x3a0   : > { %v2174_v56 = vpop.eup %2173  ;;  %2177 = vpow2.f32 %v1515_v53  ;;  %1980 = vmatpush3.bf16.msra.mxu0 %v1262_v54 }
 0x3a1   : > { %v1388_v57 = vsel %vm588_vm3, %v2174_v56, 0.0  ;;  %1991 = vmatprep.subr.bf16.mxu0 %v2456_v0 }
 0x3a2   : > { %1389 = vadd.xlane.f32.xlu1 %v1388_v57 }
 0x3a3   : > { %1982 = vmatmul.mubr.msk.bf16.vlgmr.msra.gmra.mrb[28].mxu0 %vm588_vm3, %v1259_v51 }
 0x3a4   : > { %1993 = vmatprep.mubr.msk.bf16.mxu0 %vm2457_vm0, %v2456_v0 }
 0x3a6   : > { %v2176_v40 = vpop.eup %2175 }
 0x3aa   : > { %v2178_v59 = vpop.eup %2177 }
 0x3ab   : > { %v1520_v43 = vsel %vm588_vm3, %v2178_v59, 0.0  ;;  %v1523_v60 = vpack.c.bf16 %v2178_v59, %v2176_v40 }
 0x3ac   : > { %1521 = vadd.xlane.f32.xlu1 %v1520_v43 }
 0x3b0   : > { %605 = vadd.xlane.f32.xlu1 %v604_v27 }
 0x3b4   : > { %v1375_v62 = vpop.xlane.xlu1 %1374 }
 0x3b5   : > { %v1379_v55 = vsub.f32 %v2896_v32, %v1375_v62  ;;  %v1517_v32 = vsel %vm588_vm3, %v2176_v40, 0.0 }
 0x3b7   : > { %v1381_v63 = vmul.f32 1.442695, %v1379_v55 }
 0x3b8   : > { %v1394_v58 = vpop.permute.xlu1 %1393 }
 0x3b9   : > { %2179 = vpow2.f32 %v1381_v63  ;;  %1992 = vmatpush3.bf16.msra.mxu0 %v1394_v58 }
 0x3ba   : > { %2003 = vmatprep.subr.bf16.mxu0 %v2456_v0 }
 0x3bc   : > { %v1526_v61 = vpop.permute.xlu1 %1525 }
 0x3c3   : > { %v2180_v2 = vpop.eup %2179 }
 0x3c4   : > { %v1385_v3 = vsel %vm588_vm3, %v2180_v2, 0.0  ;;  %v1391_v5 = vpack.c.bf16 %v2174_v56, %v2180_v2 }
 0x3c5   : > { %1386 = vadd.xlane.f32.xlu0 %v1385_v3 }
 0x3c6   : > { %1994 = vmatmul.mubr.msk.bf16.vlgmr.msra.gmra.mrb[32].mxu0 %vm588_vm3, %v1391_v5 }
 0x3c7   : > { %2004 = vmatpush3.bf16.msra.mxu0 %v1526_v61  ;;  %2005 = vmatprep.mubr.msk.bf16.mxu0 %vm2457_vm0, %v2456_v0 }
 0x3c9   : > { %1518 = vadd.xlane.f32.xlu0 %v1517_v32 }
 0x3cd   : > { %602 = vadd.xlane.f32.xlu0 %v601_v38 }
 0x3ce   : > { %2006 = vmatmul.mubr.msk.bf16.vlgmr.msra.gmra.mrb[36].mxu0 %vm588_vm3, %v1523_v60 }
 0x3dc   : > { %v2988_v6 = vpop.f32.mrb[8].mxu0 }
 0x3dd   : > { %v1923_v1 = vpop.f32.mrb[9].mxu0 }
 0x3de   : > { %v648_v8 = vpop.f32.mrb[10].mxu0 }
 0x3df   : > { %v1924_v4 = vpop.f32.mrb[11].mxu0 }
 0x405   : > { %v727_v9 = vpop.xlane.xlu1 %726 }
 0x406   : > { %2181 = vrcp.f32 %v727_v9 }
 0x409   : > { %v730_v15 = vpop.xlane.xlu0 %729 }
 0x40a   : > { %2183 = vrcp.f32 %v730_v15 }
 0x40d   : > { %v859_v7 = vpop.xlane.xlu1 %858 }
 0x40e   : > { %2185 = vrcp.f32 %v859_v7 }
 0x410   : > { %v2182_v16 = vpop.eup %2181 }
 0x411   : > { %v862_v10 = vpop.xlane.xlu1 %861 }
 0x412   : > { %2187 = vrcp.f32 %v862_v10 }
 0x414   : > { %v2184_v23 = vpop.eup %2183 }
 0x415   : > { %v991_v18 = vpop.xlane.xlu0 %990 }
 0x416   : > { %2189 = vrcp.f32 %v991_v18 }
 0x417   : > { %v994_v13 = vpop.xlane.xlu1 %993 }
 0x418   : > { %2191 = vrcp.f32 %v994_v13  ;;  %v2186_v36 = vpop.eup %2185 }
 0x41c   : > { %v2188_v29 = vpop.eup %2187 }
 0x41d   : > { %v1123_v37 = vpop.xlane.xlu0 %1122 }
 0x41f   : > { %v1126_v17 = vpop.xlane.xlu1 %1125 }
 0x420   : > { %v2190_v49 = vpop.eup %2189 }
 0x422   : > { %v2192_v34 = vpop.eup %2191 }
 0x425   : > { %v1255_v20 = vpop.xlane.xlu0 %1254 }
 0x429   : > { %v2990_v19 = vpop.xlane.xlu1 %1257 }
 0x42f   : > { %v2992_v11 = vpop.xlane.xlu1 %1389 }
 0x439   : > { %v2994_v12 = vpop.xlane.xlu1 %1521 }
 0x43d   : > { %v606_v33 = vpop.xlane.xlu1 %605 }
 0x43e   : > { %2193 = vrcp.f32 %v606_v33 }
 0x448   : > { %v2194_v52 = vpop.eup %2193 }
 0x449   : > { %v655_v59 = vmul.f32 %v2194_v52, %v648_v8 }
 0x450   : > { %v773_v21 = vpop.f32.mrb[12].mxu0 }
 0x451   : > { %v1935_v22 = vpop.f32.mrb[13].mxu0  ;;  %v782_v28 = vmul.f32 %v2182_v16, %v773_v21 }
 0x452   : > { %v2996_v25 = vpop.xlane.xlu0 %1386  ;;  %v776_v26 = vpop.f32.mrb[14].mxu0  ;;  %v2148_v22 = vld [vmem:[#allocation13 + $0x8] sm:$0xff]  }
 0x453   : > { %v783_v14 = vmul.f32 %v2184_v23, %v776_v26  ;;  %v1936_v30 = vpop.f32.mrb[15].mxu0 }
 0x455   : > { %v784_v31 = vpack.c.bf16 %v783_v14, %v782_v28 }
 0x456   : > { %v2998_v24 = vpop.xlane.xlu0 %1518 }
 0x457   : > { %786 = vrot.lane.b32.xlu0 %v784_v31, %s2465_s20  ;;  %s2355_s20 = scalar_lea.vmem %s3016_s9, 256 }
 0x458   : > { %v905_v35 = vpop.f32.mrb[16].mxu0  ;;  %p2356_p8 = scmp.ne.s32.totalorder %s3016_s9, %s2355_s20 }
 0x459   : > { %v1947_v39 = vpop.f32.mrb[17].mxu0  ;;  %v914_v44 = vmul.f32 %v2186_v36, %v905_v35 }
 0x45a   : > { %v603_v41 = vpop.xlane.xlu0 %602  ;;  %v908_v42 = vpop.f32.mrb[18].mxu0  ;;  %p2357_p6 = pnand %p2356_p8, %p2693_p5 }
 0x45b   : > { %2195 = vrcp.f32 %v603_v41  ;;  %v915_v45 = vmul.f32 %v2188_v29, %v908_v42  ;;  %v1948_v46 = vpop.f32.mrb[19].mxu0 }
 0x45c   : > { %2197 = vrcp.f32 %v1123_v37  ;;  %v2147_v37 = vld [vmem:[#allocation13] sm:$0xff]   ;;  %p2358_p10 = pneg %p2357_p6 }
 0x45d   : > { %v916_v47 = vpack.c.bf16 %v915_v45, %v914_v44  ;;  %2199 = vrcp.f32 %v1126_v17  ;;  %2010 = vmatpush3.bf16.msra.mxu1 %v2147_v37  ;;  %v1834_v44 = vld [vmem:[%s3078_s5] ss:$0 sm:$0xff] }
 0x45e   : > { %2201 = vrcp.f32 %v1255_v20  ;;  %2011 = vmatprep.subr.bf16.mxu1 %v2456_v0 }
 0x45f   : > { %918 = vrot.lane.b32.xlu1 %v916_v47, %s2466_s27  ;;  %2203 = vrcp.f32 %v2990_v19 }
 0x460   : > { %v1037_v48 = vpop.f32.mrb[20].mxu0  ;;  %2205 = vrcp.f32 %v2992_v11 }
 0x461   : > { %v1959_v50 = vpop.f32.mrb[21].mxu0  ;;  %v1046_v53 = vmul.f32 %v2190_v49, %v1037_v48  ;;  %2207 = vrcp.f32 %v2996_v25  ;;  %2012 = vmatpush3.bf16.msra.mxu1 %v2148_v22 }
 0x462   : > { %v1040_v51 = vpop.f32.mrb[22].mxu0  ;;  %2209 = vrcp.f32 %v2998_v24 }
 0x463   : > { %v1047_v54 = vmul.f32 %v2192_v34, %v1040_v51  ;;  %v1960_v56 = vpop.f32.mrb[23].mxu0  ;;  %2211 = vrcp.f32 %v2994_v12 }
 0x465   : > { %v2196_v57 = vpop.eup %2195  ;;  %v1048_v40 = vpack.c.bf16 %v1047_v54, %v1046_v53 }
 0x466   : > { %v654_v43 = vmul.f32 %v2196_v57, %v2988_v6  ;;  %v2198_v62 = vpop.eup %2197 }
 0x467   : > { %1050 = vrot.lane.b32.xlu1 %v1048_v40, %s2467_s10  ;;  %v2200_v63 = vpop.eup %2199  ;;  %s2472_s10 = smov [#allocation14]  }
 0x468   : > { %v1169_v60 = vpop.f32.mrb[24].mxu0  ;;  %v656_v27 = vpack.c.bf16 %v655_v59, %v654_v43  ;;  %v2202_v38 = vpop.eup %2201 }
 0x469   : > { %v1971_v55 = vpop.f32.mrb[25].mxu0  ;;  %v1178_v2 = vmul.f32 %v2198_v62, %v1169_v60  ;;  %v2204_v1 = vpop.eup %2203 }
 0x46a   : > { %v1172_v58 = vpop.f32.mrb[26].mxu0  ;;  %657 = vst.msk [vmem:[#allocation4] sm:$0xff] %vm540_vm2, %v656_v27  ;;  %v2206_v15 = vpop.eup %2205 }
 0x46b   : > { %v1179_v3 = vmul.f32 %v2200_v63, %v1172_v58  ;;  %v1972_v5 = vpop.f32.mrb[27].mxu0  ;;  %v2208_v18 = vpop.eup %2207 }
 0x46c   : > { %v2210_v11 = vpop.eup %2209 }
 0x46d   : > { %v1180_v61 = vpack.c.bf16 %v1179_v3, %v1178_v2  ;;  %v2212_v28 = vpop.eup %2211 }
 0x46f   : > { %1182 = vrot.lane.b32.xlu0 %v1180_v61, %s2468_s30  ;;  %s2359_s30 = sshll.u32 %s2472_s10, 4  ;;  %s2360_s30 = int_to_ptr.vmem [resolvable:$false] %s2359_s30 }
 0x470   : > { %p2362_p3 = scmp.lt.s32.totalorder %s3016_s9, %s2360_s30 }
 0x476   : > { %v1301_v32 = vpop.f32.mrb[28].mxu0 }
 0x477   : > { %v1983_v6 = vpop.f32.mrb[29].mxu0  ;;  %v1310_v4 = vmul.f32 %v2202_v38, %v1301_v32 }
 0x478   : > { %v1304_v8 = vpop.f32.mrb[30].mxu0 }
 0x479   : > { %v1311_v9 = vmul.f32 %v2204_v1, %v1304_v8  ;;  %v1984_v7 = vpop.f32.mrb[31].mxu0 }
 0x47b   : > { %v1312_v10 = vpack.c.bf16 %v1311_v9, %v1310_v4 }
 0x47d   : > { %1314 = vrot.lane.b32.xlu1 %v1312_v10, %s2469_s14  ;;  %s2361_s14 = scalar_lea.vmem %s2360_s30, 512 }
 0x47e   : > { %p2363_p7 = scmp.lt.s32.totalorder %s2361_s14, %s2355_s20 }
 0x480   : > { %p2364_p9 = por %p2363_p7, %p2362_p3 }
 0x482   : > { %p2365_p0 = pnand %p2364_p9, %p2358_p10 }
 0x499   : > { %v1433_v13 = vpop.f32.mrb[32].mxu0 }
 0x49a   : > { %v1995_v17 = vpop.f32.mrb[33].mxu0  ;;  %v1442_v20 = vmul.f32 %v2208_v18, %v1433_v13 }
 0x49b   : > { %v1436_v19 = vpop.f32.mrb[34].mxu0 }
 0x49c   : > { %v1443_v21 = vmul.f32 %v2206_v15, %v1436_v19  ;;  %v1996_v16 = vpop.f32.mrb[35].mxu0 }
 0x49e   : > { %v1444_v23 = vpack.c.bf16 %v1443_v21, %v1442_v20 }
 0x4a0   : > { %1446 = vrot.lane.b32.xlu0 %v1444_v23, %s2470_s6 }
 0x4a1   : > { %v1565_v25 = vpop.f32.mrb[36].mxu0 }
 0x4a2   : > { %v1574_v12 = vmul.f32 %v2210_v11, %v1565_v25  ;;  %v2007_v26 = vpop.f32.mrb[37].mxu0 }
 0x4a3   : > { %v1568_v14 = vpop.f32.mrb[38].mxu0 }
 0x4a4   : > { %v1575_v30 = vmul.f32 %v2212_v28, %v1568_v14  ;;  %v2008_v31 = vpop.f32.mrb[39].mxu0 }
 0x4a6   : > { %v1576_v33 = vpack.c.bf16 %v1575_v30, %v1574_v12 }
 0x4a8   : > { %1578 = vrot.lane.b32.xlu1 %v1576_v33, %s2471_s17 }
 0x4c9   : > { %v787_v24 = vpop.permute.xlu0 %786 }
 0x4ca   : > { %790 = vst.msk [vmem:[#allocation4] sm:$0xff] %vm789_vm4, %v787_v24 }
 0x4d1   : > { %v919_v35 = vpop.permute.xlu1 %918 }
 0x4d2   : > { %922 = vst.msk [vmem:[#allocation4] sm:$0xff] %vm921_vm5, %v919_v35 }
 0x4d9   : > { %v1051_v0 = vpop.permute.xlu1 %1050 }
 0x4da   : > { %1054 = vst.msk [vmem:[#allocation4] sm:$0xff] %vm1053_vm6, %v1051_v0 }
 0x4e1   : > { %v1183_v36 = vpop.permute.xlu0 %1182 }
 0x4e2   : > { %1186 = vst.msk [vmem:[#allocation4] sm:$0xff] %vm1185_vm7, %v1183_v36 }
 0x4ef   : > { %v1315_v39 = vpop.permute.xlu1 %1314 }
 0x4f0   : > { %1318 = vst.msk [vmem:[#allocation4] sm:$0xff] %vm1317_vm8, %v1315_v39 }
 0x512   : > { %v1447_v29 = vpop.permute.xlu0 %1446 }
 0x513   : > { %1450 = vst.msk [vmem:[#allocation4] sm:$0xff] %vm1449_vm9, %v1447_v29 }
 0x51a   : > { %v1579_v41 = vpop.permute.xlu1 %1578 }
 0x51b   : > { %1582 = vst.msk [vmem:[#allocation4] sm:$0xff] %vm1581_vm10, %v1579_v41 }
 0x522   : > { %v1583_v42 = vld [vmem:[#allocation4] sm:$0xff] }
 0x523   : > { %2014 = vmatmul.mubr.msk.bf16.vlgmr.msra.gmra.mrb[36].mxu1 %vm367_vm1, %v1583_v42 }
 0x5f6   : > { %v1644_v45 = vpop.f32.mrb[36].mxu1 }
 0x5f7   : > { %v1645_v46 = vadd.f32 %v1834_v44, %v1644_v45  ;;  %v2015_v47 = vpop.f32.mrb[37].mxu1 }
 0x5f8   : > { %v1647_v48 = vpop.f32.mrb[38].mxu1 }
 0x5f9   : > { %1651 = vst.msk [vmem:[%s341_s7] sm:$0xff] %vm367_vm1, %v1645_v46  ;;  %v1648_v49 = vadd.f32 %v1834_v44, %v1647_v48  ;;  %v2016_v50 = vpop.f32.mrb[39].mxu1 }
 0x5fb   : > { %1652 = vst.msk [vmem:[%s341_s7 + $0x8] sm:$0xff] %vm367_vm1, %v1648_v49 }
 0x5fc   : > { %2368 = shalt.err (!%p2365_p0)
}
 0x5fd   : > { %s2369_s6 = scalar_lea.hbm %s3022_s19, 256  ;;  %s2373_s29 = scalar_lea.hbm %s3103_s16, 512 }
 0x5fe   : > { %p2370_p4 = scmp.ne.s32.totalorder %s3022_s19, %s2369_s6  ;;  %p2374_p12 = scmp.lt.u32.totalorder %s3022_s19, %s3103_s16 }
 0x5ff   : > { %p2375_p1 = scmp.lt.u32.totalorder %s2373_s29, %s2369_s6  ;;  %p2377_p8 = scmp.lt.u32.totalorder %s2369_s6, %s3022_s19 }
 0x600   : > { %p2371_p13 = pnand %p2370_p4, %p2693_p5 }
 0x601   : > { %p2376_p11 = por %p2375_p1, %p2374_p12 }
 0x602   : > { %p2372_p2 = pneg %p2371_p13 }
 0x603   : > { %p2378_p6 = por %p2377_p8, %p2376_p11 }
 0x605   : > { %p2379_p10 = pnand %p2378_p6, %p2372_p2 }
 0x607   : > { %2382 = shalt.err (!%p2379_p10)
}
 0x608   : > { %s2473_s15 = smov 128  }
 0x609   : > { %2035 = dma.vmem_to_hbm [thread:$0]  (%p2693_p5), %s3016_s9, 256, %s3022_s19, %s1654_s24, %s2473_s15, %s2473_s15, %s2466_s27  }
 0x60a PF: > { %s3104_s11 = sld [smem:[#allocation19_spill]]  ;;  %s3105_s20 = sld [smem:[#allocation20_spill]] }
 0x60b   : > { %p3107_p7 = scmp.ge.s32.totalorder %s2445_s26, 2 }
 0x610   : > { %s1684_s10 = sand.u32 1, %s3104_s11   ;;  %p3106_p3 = scmp.ne.s32.totalorder %s3105_s20, 0 }
 0x611   : > { %s1685_s30 = scalar_lea.sflag [#allocation7], %s1684_s10 }
 0x612   : > { %p2055_p9 = pnand %p3107_p7, %p3106_p3 }
 0x614   : > { %2420 = dma.done.wait (!%p2055_p9), %s1685_s30, 256  }
 0x615   : > { %2422 = vsyncadd (!%p2055_p9), %s1685_s30, 4294967040  ;;  %s24_s26 = sadd.s32 1, %s2445_s26   ;;  %s3108_s21 = smov %s2429_s22 }
 0x616   : > { %p21_p0 = scmp.ge.s32.totalorder %s24_s26, 4   ;;  %s3109_s22 = smov %s2433_s23 }
 0x617   : > { %s3110_s23 = smov %s2702_s8  ;;  %s3111_s24 = smov %s2441_s25 }
 0x618   : > { %s3112_s25 = smov %s3114_s28  ;;  %23 = sbr.rel (!%p21_p0) target bundleno = 10 (0xa), region = 109 }
 0x61f   :  { %1690 = vsyncpa [#allocation6], 1 }
 0x620   :  { %1692 = vsyncpa [#allocation6 + $0x1], 1 }
 0x621   :  { %1693 = vsyncpa [#allocation9], 1 }
 0x622   :  { %1694 = vsyncpa [#allocation12], 1 }
 0x623   :  { %1695 = vsyncpa [#allocation7], 1 }
 0x624   :  { %1697 = vsyncpa [#allocation7 + $0x1], 1 }

</bundles_post_ra>
